<compile_context>
chip_gen: v6e
topology: v6e:2x2x1
jax: 0.10.0
libtpu: 0.0.40
codegen_flags: <defaults>
</compile_context>

<pallas_src>
import numpy as np
import jax
import jax.numpy as jnp
from jax.experimental import pallas as pl
from jax.experimental.pallas import tpu as pltpu


# ----------------------------------------------------------------------------
# SRM filter bank (identical math to SRMConv2d_simple._build_kernel, single
# channel -- the repeat over input channels is handled by the channel pre-sum)
# ----------------------------------------------------------------------------
_F1 = np.asarray([[0, 0, 0, 0, 0],
                  [0, -1, 2, -1, 0],
                  [0, 2, -4, 2, 0],
                  [0, -1, 2, -1, 0],
                  [0, 0, 0, 0, 0]], dtype=np.float64) / 4.0
_F2 = np.asarray([[-1, 2, -2, 2, -1],
                  [2, -6, 8, -6, 2],
                  [-2, 8, -12, 8, -2],
                  [2, -6, 8, -6, 2],
                  [-1, 2, -2, 2, -1]], dtype=np.float64) / 12.0
_F3 = np.asarray([[0, 0, 0, 0, 0],
                  [0, 0, 0, 0, 0],
                  [0, 1, -2, 1, 0],
                  [0, 0, 0, 0, 0],
                  [0, 0, 0, 0, 0]], dtype=np.float64) / 2.0
_SRM_TAPS = np.stack([_F1, _F2, _F3], axis=0)          # (3, 5, 5)


def _build_srm_filters(inc: int) -> np.ndarray:
    """Full OIHW bank (3, inc, 5, 5) -- used only by the reference check."""
    filters = _SRM_TAPS[:, None, :, :]                  # (3, 1, 5, 5)
    filters = np.repeat(filters, inc, axis=1)           # (3, inc, 5, 5)
    return filters.astype(np.float32)


# ----------------------------------------------------------------------------
# Pallas kernel (batch-on-lanes layout)
# ----------------------------------------------------------------------------
def _srm_kernel(x_ref, o_ref, xpad_ref):
    # x_ref   : (C, H, W, Bn)        input tile, caller dtype       (VMEM)
    # o_ref   : (3, H, W, Bn) f32    output tile, Hardtanh'ed       (VMEM)
    # xpad_ref: (H+4, W+4, Bn) f32   scratch: zero-padded channel sum
    C, H, W, Bn = x_ref.shape

    # Channel pre-sum: the SRM bank is identical across input channels, so the
    # conv of the repeated bank equals the single-channel conv of sum_c x_c.
    xs = jnp.sum(x_ref[...].astype(jnp.float32), axis=0)          # (H, W, Bn)

    # Zero only the 2-wide halo strips (done every step: under megacore each
    # TensorCore has its own scratch, so a pid==0-only init would be wrong).
    zrow = jnp.zeros((2, W + 4, Bn), jnp.float32)
    zcol = jnp.zeros((H, 2, Bn), jnp.float32)
    xpad_ref[0:2, :, :] = zrow
    xpad_ref[H + 2:H + 4, :, :] = zrow
    xpad_ref[2:H + 2, 0:2, :] = zcol
    xpad_ref[2:H + 2, W + 2:W + 4, :] = zcol
    xpad_ref[2:H + 2, 2:W + 2, :] = xs                  # interior, every step

    # Static 5x5 tap windows: shifts are along the major (H) and sublane (W)
    # axes only; batch stays fixed on lanes.
    def win(di, dj):
        return xpad_ref[di:di + H, dj:dj + W, :]        # (H, W, Bn)

    # --- coefficient-grouped window sums (shared between the 3 filters) -----
    c22 = win(2, 2)                                                 # center
    ic = win(1, 1) + win(1, 3) + win(3, 1) + win(3, 3)              # inner corners
    h3 = win(2, 1) + win(2, 3)                                      # F3 side taps
    ie = h3 + win(1, 2) + win(3, 2)                                 # inner edge-mids
    oc = win(0, 0) + win(0, 4) + win(4, 0) + win(4, 4)              # outer corners
    oe = win(0, 2) + win(2, 0) + win(2, 4) + win(4, 2)              # outer edge-mids
    o8 = (win(0, 1) + win(0, 3) + win(1, 0) + win(1, 4)
          + win(3, 0) + win(3, 4) + win(4, 1) + win(4, 3))          # +2/12 ring

    # --- per-filter constant multiply-adds, store each channel directly -----
    # F1 = (-ic + 2*ie - 4*c) / 4
    acc1 = (-0.25) * ic + 0.5 * ie - c22
    o_ref[0] = jnp.clip(acc1, -3.0, 3.0).astype(o_ref.dtype)

    # F2 = (-oc + 2*o8 - 2*oe - 6*ic + 8*ie - 12*c) / 12
    acc2 = ((-1.0 / 12.0) * oc + (1.0 / 6.0) * (o8 - oe)
            + (-0.5) * ic + (2.0 / 3.0) * ie - c22)
    o_ref[1] = jnp.clip(acc2, -3.0, 3.0).astype(o_ref.dtype)

    # F3 = (h3 - 2*c) / 2
    acc3 = 0.5 * h3 - c22
    o_ref[2] = jnp.clip(acc3, -3.0, 3.0).astype(o_ref.dtype)


# ----------------------------------------------------------------------------
# Wrapper
# ----------------------------------------------------------------------------
def srm_conv2d_simple(x: jax.Array) -> jax.Array:
    """x: (N, C, H, W) -> (N, 3, H, W) float32, matching SRMConv2d_simple."""
    N, C, H, W = x.shape

    # Batch-on-lanes layout: (C, H, W, N).  Keep the caller's dtype (cast to
    # f32 happens inside the kernel), halving input DMA bytes for bf16.
    xt = jnp.transpose(x, (1, 2, 3, 0))

    # VMEM budgeting (per image): double-buffered input/output blocks, padded
    # scratch, and f32 live temporaries (xs + group sums + accumulators).
    itemsize = jnp.dtype(x.dtype).itemsize
    bytes_per_img = (2 * C * H * W * itemsize            # input, double-buffered
                     + 2 * 3 * H * W * 4                 # output, double-buffered
                     + (H + 4) * (W + 4) * 4             # padded scratch
                     + 12 * H * W * 4)                   # live temporaries
    vmem_budget = 12 * 1024 * 1024                       # fits v5e/v6e/v7x defaults
    bn_cap = max(1, vmem_budget // max(bytes_per_img, 1))

    if N > 128 and bn_cap >= 128:
        # Tile the batch in 128-lane chunks: lane-dense blocks, several grid
        # steps so both v7x TensorCores pipeline.
        bn = 128
        n_pad = ((N + 127) // 128) * 128
    elif N <= bn_cap:
        bn = N
        n_pad = N
    else:
        # TODO(synk): H/W tiling (4-row halo, 128-lane W tiles) for images so
        # large that even one whole-batch block exceeds the VMEM budget.
        bn = N
        n_pad = N

    if n_pad != N:
        xt = jnp.pad(xt, ((0, 0), (0, 0), (0, 0), (0, n_pad - N)))

    cp_kwargs = dict(dimension_semantics=("parallel",))
    est_bytes = bn * bytes_per_img
    if est_bytes > vmem_budget:
        # Fallback only (never hit at demo shapes): raise the scoped limit.
        cp_kwargs["vmem_limit_bytes"] = int(min(est_bytes * 12 // 10,
                                                48 * 1024 * 1024))

    grid = (n_pad // bn,)
    out = pl.pallas_call(
        _srm_kernel,
        out_shape=jax.ShapeDtypeStruct((3, H, W, n_pad), jnp.float32),
        grid_spec=pltpu.PrefetchScalarGridSpec(
            num_scalar_prefetch=0,
            grid=grid,
            in_specs=[
                pl.BlockSpec((C, H, W, bn), lambda n: (0, 0, 0, n)),
            ],
            out_specs=pl.BlockSpec((3, H, W, bn), lambda n: (0, 0, 0, n)),
            scratch_shapes=[
                pltpu.VMEM((H + 4, W + 4, bn), jnp.float32),
            ],
        ),
        compiler_params=pltpu.CompilerParams(**cp_kwargs),
    )(xt)

    out = out[..., :N]                                   # drop batch padding
    return jnp.transpose(out, (3, 0, 1, 2))              # (N, 3, H, W)


# ----------------------------------------------------------------------------
# Demo / correctness check
# ----------------------------------------------------------------------------
if __name__ == "__main__":
    key = jax.random.PRNGKey(0)
    N, C, H, W = 4, 3, 16, 16          # inc=3 (module default)
    x = jax.random.normal(key, (N, C, H, W), dtype=jnp.float32)

    out = srm_conv2d_simple(x)
    jax.block_until_ready(out)

    # reference: plain-JAX F.conv2d(pad=2) + Hardtanh(-3, 3)
    filters = jnp.asarray(_build_srm_filters(C))
    ref = jax.lax.conv_general_dilated(
        x, filters, window_strides=(1, 1), padding=((2, 2), (2, 2)),
        dimension_numbers=("NCHW", "OIHW", "NCHW"))
    ref = jnp.clip(ref, -3.0, 3.0)
    np.testing.assert_allclose(np.asarray(out), np.asarray(ref),
                               rtol=1e-5, atol=1e-5)

    print("KERNEL_OK")
</pallas_src>

<mosaic_0001>
module attributes {stable_mosaic.version = 11 : i64} {
  func.func @_srm_kernel(%arg0: i32, %arg1: memref<3x16x16x4xf32, #tpu.memory_space<vmem>>, %arg2: memref<3x16x16x4xf32, #tpu.memory_space<vmem>>, %arg3: memref<20x20x4xf32, #tpu.memory_space<vmem>>) attributes {dimension_semantics = [#tpu.dimension_semantics<parallel>], iteration_bounds = array<i64: 1>, scalar_prefetch = 0 : i64, scratch_operands = 1 : i64, tpu.core_type = #tpu.core_type<tc>, window_params = [{transform_indices = @transform_0, window_bounds = array<i64: 3, 16, 16, 4>}, {transform_indices = @transform_1, window_bounds = array<i64: 3, 16, 16, 4>}]} {
    %c0 = arith.constant 0 : index
    %c0_0 = arith.constant 0 : index
    %c0_1 = arith.constant 0 : index
    %c0_2 = arith.constant 0 : index
    %0 = vector.load %arg1[%c0, %c0_0, %c0_1, %c0_2] : memref<3x16x16x4xf32, #tpu.memory_space<vmem>>, vector<3x16x16x4xf32>
    %cst = arith.constant dense<0.000000e+00> : vector<16x16x4xf32>
    %1 = vector.multi_reduction <add>, %0, %cst [0] : vector<3x16x16x4xf32> to vector<16x16x4xf32>
    %cst_3 = arith.constant 0.000000e+00 : f32
    %2 = vector.broadcast %cst_3 : f32 to vector<2x20x4xf32>
    %cst_4 = arith.constant 0.000000e+00 : f32
    %3 = vector.broadcast %cst_4 : f32 to vector<16x2x4xf32>
    %c0_5 = arith.constant 0 : index
    %c0_6 = arith.constant 0 : index
    %c0_7 = arith.constant 0 : index
    %4 = vector.load %arg3[%c0_5, %c0_6, %c0_7] : memref<20x20x4xf32, #tpu.memory_space<vmem>>, vector<2x20x4xf32>
    tpu.vector_store %arg3[%c0_5, %c0_6, %c0_7], %2 {strides = array<i32>} : memref<20x20x4xf32, #tpu.memory_space<vmem>>, vector<2x20x4xf32>,
    %c18 = arith.constant 18 : index
    %c0_8 = arith.constant 0 : index
    %c0_9 = arith.constant 0 : index
    %5 = vector.load %arg3[%c18, %c0_8, %c0_9] : memref<20x20x4xf32, #tpu.memory_space<vmem>>, vector<2x20x4xf32>
    tpu.vector_store %arg3[%c18, %c0_8, %c0_9], %2 {strides = array<i32>} : memref<20x20x4xf32, #tpu.memory_space<vmem>>, vector<2x20x4xf32>,
    %c2 = arith.constant 2 : index
    %c0_10 = arith.constant 0 : index
    %c0_11 = arith.constant 0 : index
    %6 = vector.load %arg3[%c2, %c0_10, %c0_11] : memref<20x20x4xf32, #tpu.memory_space<vmem>>, vector<16x2x4xf32>
    tpu.vector_store %arg3[%c2, %c0_10, %c0_11], %3 {strides = array<i32>} : memref<20x20x4xf32, #tpu.memory_space<vmem>>, vector<16x2x4xf32>,
    %c2_12 = arith.constant 2 : index
    %c18_13 = arith.constant 18 : index
    %c0_14 = arith.constant 0 : index
    %7 = vector.load %arg3[%c2_12, %c18_13, %c0_14] : memref<20x20x4xf32, #tpu.memory_space<vmem>>, vector<16x2x4xf32>
    tpu.vector_store %arg3[%c2_12, %c18_13, %c0_14], %3 {strides = array<i32>} : memref<20x20x4xf32, #tpu.memory_space<vmem>>, vector<16x2x4xf32>,
    %c2_15 = arith.constant 2 : index
    %c2_16 = arith.constant 2 : index
    %c0_17 = arith.constant 0 : index
    %8 = vector.load %arg3[%c2_15, %c2_16, %c0_17] : memref<20x20x4xf32, #tpu.memory_space<vmem>>, vector<16x16x4xf32>
    tpu.vector_store %arg3[%c2_15, %c2_16, %c0_17], %1 {strides = array<i32>} : memref<20x20x4xf32, #tpu.memory_space<vmem>>, vector<16x16x4xf32>,
    %c2_18 = arith.constant 2 : index
    %c2_19 = arith.constant 2 : index
    %c0_20 = arith.constant 0 : index
    %9 = vector.load %arg3[%c2_18, %c2_19, %c0_20] : memref<20x20x4xf32, #tpu.memory_space<vmem>>, vector<16x16x4xf32>
    %c1 = arith.constant 1 : index
    %c1_21 = arith.constant 1 : index
    %c0_22 = arith.constant 0 : index
    %10 = vector.load %arg3[%c1, %c1_21, %c0_22] : memref<20x20x4xf32, #tpu.memory_space<vmem>>, vector<16x16x4xf32>
    %c1_23 = arith.constant 1 : index
    %c3 = arith.constant 3 : index
    %c0_24 = arith.constant 0 : index
    %11 = vector.load %arg3[%c1_23, %c3, %c0_24] : memref<20x20x4xf32, #tpu.memory_space<vmem>>, vector<16x16x4xf32>
    %12 = arith.addf %10, %11 : vector<16x16x4xf32>
    %c3_25 = arith.constant 3 : index
    %c1_26 = arith.constant 1 : index
    %c0_27 = arith.constant 0 : index
    %13 = vector.load %arg3[%c3_25, %c1_26, %c0_27] : memref<20x20x4xf32, #tpu.memory_space<vmem>>, vector<16x16x4xf32>
    %14 = arith.addf %12, %13 : vector<16x16x4xf32>
    %c3_28 = arith.constant 3 : index
    %c3_29 = arith.constant 3 : index
    %c0_30 = arith.constant 0 : index
    %15 = vector.load %arg3[%c3_28, %c3_29, %c0_30] : memref<20x20x4xf32, #tpu.memory_space<vmem>>, vector<16x16x4xf32>
    %16 = arith.addf %14, %15 : vector<16x16x4xf32>
    %c2_31 = arith.constant 2 : index
    %c1_32 = arith.constant 1 : index
    %c0_33 = arith.constant 0 : index
    %17 = vector.load %arg3[%c2_31, %c1_32, %c0_33] : memref<20x20x4xf32, #tpu.memory_space<vmem>>, vector<16x16x4xf32>
    %c2_34 = arith.constant 2 : index
    %c3_35 = arith.constant 3 : index
    %c0_36 = arith.constant 0 : index
    %18 = vector.load %arg3[%c2_34, %c3_35, %c0_36] : memref<20x20x4xf32, #tpu.memory_space<vmem>>, vector<16x16x4xf32>
    %19 = arith.addf %17, %18 : vector<16x16x4xf32>
    %c1_37 = arith.constant 1 : index
    %c2_38 = arith.constant 2 : index
    %c0_39 = arith.constant 0 : index
    %20 = vector.load %arg3[%c1_37, %c2_38, %c0_39] : memref<20x20x4xf32, #tpu.memory_space<vmem>>, vector<16x16x4xf32>
    %21 = arith.addf %19, %20 : vector<16x16x4xf32>
    %c3_40 = arith.constant 3 : index
    %c2_41 = arith.constant 2 : index
    %c0_42 = arith.constant 0 : index
    %22 = vector.load %arg3[%c3_40, %c2_41, %c0_42] : memref<20x20x4xf32, #tpu.memory_space<vmem>>, vector<16x16x4xf32>
    %23 = arith.addf %21, %22 : vector<16x16x4xf32>
    %c0_43 = arith.constant 0 : index
    %c0_44 = arith.constant 0 : index
    %c0_45 = arith.constant 0 : index
    %24 = vector.load %arg3[%c0_43, %c0_44, %c0_45] : memref<20x20x4xf32, #tpu.memory_space<vmem>>, vector<16x16x4xf32>
    %c0_46 = arith.constant 0 : index
    %c4 = arith.constant 4 : index
    %c0_47 = arith.constant 0 : index
    %25 = vector.load %arg3[%c0_46, %c4, %c0_47] : memref<20x20x4xf32, #tpu.memory_space<vmem>>, vector<16x16x4xf32>
    %26 = arith.addf %24, %25 : vector<16x16x4xf32>
    %c4_48 = arith.constant 4 : index
    %c0_49 = arith.constant 0 : index
    %c0_50 = arith.constant 0 : index
    %27 = vector.load %arg3[%c4_48, %c0_49, %c0_50] : memref<20x20x4xf32, #tpu.memory_space<vmem>>, vector<16x16x4xf32>
    %28 = arith.addf %26, %27 : vector<16x16x4xf32>
    %c4_51 = arith.constant 4 : index
    %c4_52 = arith.constant 4 : index
    %c0_53 = arith.constant 0 : index
    %29 = vector.load %arg3[%c4_51, %c4_52, %c0_53] : memref<20x20x4xf32, #tpu.memory_space<vmem>>, vector<16x16x4xf32>
    %30 = arith.addf %28, %29 : vector<16x16x4xf32>
    %c0_54 = arith.constant 0 : index
    %c2_55 = arith.constant 2 : index
    %c0_56 = arith.constant 0 : index
    %31 = vector.load %arg3[%c0_54, %c2_55, %c0_56] : memref<20x20x4xf32, #tpu.memory_space<vmem>>, vector<16x16x4xf32>
    %c2_57 = arith.constant 2 : index
    %c0_58 = arith.constant 0 : index
    %c0_59 = arith.constant 0 : index
    %32 = vector.load %arg3[%c2_57, %c0_58, %c0_59] : memref<20x20x4xf32, #tpu.memory_space<vmem>>, vector<16x16x4xf32>
    %33 = arith.addf %31, %32 : vector<16x16x4xf32>
    %c2_60 = arith.constant 2 : index
    %c4_61 = arith.constant 4 : index
    %c0_62 = arith.constant 0 : index
    %34 = vector.load %arg3[%c2_60, %c4_61, %c0_62] : memref<20x20x4xf32, #tpu.memory_space<vmem>>, vector<16x16x4xf32>
    %35 = arith.addf %33, %34 : vector<16x16x4xf32>
    %c4_63 = arith.constant 4 : index
    %c2_64 = arith.constant 2 : index
    %c0_65 = arith.constant 0 : index
    %36 = vector.load %arg3[%c4_63, %c2_64, %c0_65] : memref<20x20x4xf32, #tpu.memory_space<vmem>>, vector<16x16x4xf32>
    %37 = arith.addf %35, %36 : vector<16x16x4xf32>
    %c0_66 = arith.constant 0 : index
    %c1_67 = arith.constant 1 : index
    %c0_68 = arith.constant 0 : index
    %38 = vector.load %arg3[%c0_66, %c1_67, %c0_68] : memref<20x20x4xf32, #tpu.memory_space<vmem>>, vector<16x16x4xf32>
    %c0_69 = arith.constant 0 : index
    %c3_70 = arith.constant 3 : index
    %c0_71 = arith.constant 0 : index
    %39 = vector.load %arg3[%c0_69, %c3_70, %c0_71] : memref<20x20x4xf32, #tpu.memory_space<vmem>>, vector<16x16x4xf32>
    %40 = arith.addf %38, %39 : vector<16x16x4xf32>
    %c1_72 = arith.constant 1 : index
    %c0_73 = arith.constant 0 : index
    %c0_74 = arith.constant 0 : index
    %41 = vector.load %arg3[%c1_72, %c0_73, %c0_74] : memref<20x20x4xf32, #tpu.memory_space<vmem>>, vector<16x16x4xf32>
    %42 = arith.addf %40, %41 : vector<16x16x4xf32>
    %c1_75 = arith.constant 1 : index
    %c4_76 = arith.constant 4 : index
    %c0_77 = arith.constant 0 : index
    %43 = vector.load %arg3[%c1_75, %c4_76, %c0_77] : memref<20x20x4xf32, #tpu.memory_space<vmem>>, vector<16x16x4xf32>
    %44 = arith.addf %42, %43 : vector<16x16x4xf32>
    %c3_78 = arith.constant 3 : index
    %c0_79 = arith.constant 0 : index
    %c0_80 = arith.constant 0 : index
    %45 = vector.load %arg3[%c3_78, %c0_79, %c0_80] : memref<20x20x4xf32, #tpu.memory_space<vmem>>, vector<16x16x4xf32>
    %46 = arith.addf %44, %45 : vector<16x16x4xf32>
    %c3_81 = arith.constant 3 : index
    %c4_82 = arith.constant 4 : index
    %c0_83 = arith.constant 0 : index
    %47 = vector.load %arg3[%c3_81, %c4_82, %c0_83] : memref<20x20x4xf32, #tpu.memory_space<vmem>>, vector<16x16x4xf32>
    %48 = arith.addf %46, %47 : vector<16x16x4xf32>
    %c4_84 = arith.constant 4 : index
    %c1_85 = arith.constant 1 : index
    %c0_86 = arith.constant 0 : index
    %49 = vector.load %arg3[%c4_84, %c1_85, %c0_86] : memref<20x20x4xf32, #tpu.memory_space<vmem>>, vector<16x16x4xf32>
    %50 = arith.addf %48, %49 : vector<16x16x4xf32>
    %c4_87 = arith.constant 4 : index
    %c3_88 = arith.constant 3 : index
    %c0_89 = arith.constant 0 : index
    %51 = vector.load %arg3[%c4_87, %c3_88, %c0_89] : memref<20x20x4xf32, #tpu.memory_space<vmem>>, vector<16x16x4xf32>
    %52 = arith.addf %50, %51 : vector<16x16x4xf32>
    %cst_90 = arith.constant -2.500000e-01 : f32
    %53 = vector.broadcast %cst_90 : f32 to vector<16x16x4xf32>
    %54 = arith.mulf %53, %16 : vector<16x16x4xf32>
    %cst_91 = arith.constant 5.000000e-01 : f32
    %55 = vector.broadcast %cst_91 : f32 to vector<16x16x4xf32>
    %56 = arith.mulf %55, %23 : vector<16x16x4xf32>
    %57 = arith.addf %54, %56 : vector<16x16x4xf32>
    %58 = arith.subf %57, %9 : vector<16x16x4xf32>
    %cst_92 = arith.constant -3.000000e+00 : f32
    %cst_93 = arith.constant 3.000000e+00 : f32
    %59 = vector.broadcast %cst_92 : f32 to vector<16x16x4xf32>
    %60 = arith.maximumf %59, %58 : vector<16x16x4xf32>
    %61 = vector.broadcast %cst_93 : f32 to vector<16x16x4xf32>
    %62 = arith.minimumf %61, %60 : vector<16x16x4xf32>
    %c0_94 = arith.constant 0 : index
    %c0_95 = arith.constant 0 : index
    %c0_96 = arith.constant 0 : index
    %c0_97 = arith.constant 0 : index
    %63 = vector.load %arg2[%c0_94, %c0_95, %c0_96, %c0_97] : memref<3x16x16x4xf32, #tpu.memory_space<vmem>>, vector<1x16x16x4xf32>
    %64 = vector.shape_cast %63 : vector<1x16x16x4xf32> to vector<16x16x4xf32>
    %65 = vector.shape_cast %62 : vector<16x16x4xf32> to vector<1x16x16x4xf32>
    tpu.vector_store %arg2[%c0_94, %c0_95, %c0_96, %c0_97], %65 {strides = array<i32>} : memref<3x16x16x4xf32, #tpu.memory_space<vmem>>, vector<1x16x16x4xf32>,
    %cst_98 = arith.constant -0.0833333358 : f32
    %66 = vector.broadcast %cst_98 : f32 to vector<16x16x4xf32>
    %67 = arith.mulf %66, %30 : vector<16x16x4xf32>
    %68 = arith.subf %52, %37 : vector<16x16x4xf32>
    %cst_99 = arith.constant 0.166666672 : f32
    %69 = vector.broadcast %cst_99 : f32 to vector<16x16x4xf32>
    %70 = arith.mulf %69, %68 : vector<16x16x4xf32>
    %71 = arith.addf %67, %70 : vector<16x16x4xf32>
    %cst_100 = arith.constant -5.000000e-01 : f32
    %72 = vector.broadcast %cst_100 : f32 to vector<16x16x4xf32>
    %73 = arith.mulf %72, %16 : vector<16x16x4xf32>
    %74 = arith.addf %71, %73 : vector<16x16x4xf32>
    %cst_101 = arith.constant 0.666666686 : f32
    %75 = vector.broadcast %cst_101 : f32 to vector<16x16x4xf32>
    %76 = arith.mulf %75, %23 : vector<16x16x4xf32>
    %77 = arith.addf %74, %76 : vector<16x16x4xf32>
    %78 = arith.subf %77, %9 : vector<16x16x4xf32>
    %cst_102 = arith.constant -3.000000e+00 : f32
    %cst_103 = arith.constant 3.000000e+00 : f32
    %79 = vector.broadcast %cst_102 : f32 to vector<16x16x4xf32>
    %80 = arith.maximumf %79, %78 : vector<16x16x4xf32>
    %81 = vector.broadcast %cst_103 : f32 to vector<16x16x4xf32>
    %82 = arith.minimumf %81, %80 : vector<16x16x4xf32>
    %c1_104 = arith.constant 1 : index
    %c0_105 = arith.constant 0 : index
    %c0_106 = arith.constant 0 : index
    %c0_107 = arith.constant 0 : index
    %83 = vector.load %arg2[%c1_104, %c0_105, %c0_106, %c0_107] : memref<3x16x16x4xf32, #tpu.memory_space<vmem>>, vector<1x16x16x4xf32>
    %84 = vector.shape_cast %83 : vector<1x16x16x4xf32> to vector<16x16x4xf32>
    %85 = vector.shape_cast %82 : vector<16x16x4xf32> to vector<1x16x16x4xf32>
    tpu.vector_store %arg2[%c1_104, %c0_105, %c0_106, %c0_107], %85 {strides = array<i32>} : memref<3x16x16x4xf32, #tpu.memory_space<vmem>>, vector<1x16x16x4xf32>,
    %cst_108 = arith.constant 5.000000e-01 : f32
    %86 = vector.broadcast %cst_108 : f32 to vector<16x16x4xf32>
    %87 = arith.mulf %86, %19 : vector<16x16x4xf32>
    %88 = arith.subf %87, %9 : vector<16x16x4xf32>
    %cst_109 = arith.constant -3.000000e+00 : f32
    %cst_110 = arith.constant 3.000000e+00 : f32
    %89 = vector.broadcast %cst_109 : f32 to vector<16x16x4xf32>
    %90 = arith.maximumf %89, %88 : vector<16x16x4xf32>
    %91 = vector.broadcast %cst_110 : f32 to vector<16x16x4xf32>
    %92 = arith.minimumf %91, %90 : vector<16x16x4xf32>
    %c2_111 = arith.constant 2 : index
    %c0_112 = arith.constant 0 : index
    %c0_113 = arith.constant 0 : index
    %c0_114 = arith.constant 0 : index
    %93 = vector.load %arg2[%c2_111, %c0_112, %c0_113, %c0_114] : memref<3x16x16x4xf32, #tpu.memory_space<vmem>>, vector<1x16x16x4xf32>
    %94 = vector.shape_cast %93 : vector<1x16x16x4xf32> to vector<16x16x4xf32>
    %95 = vector.shape_cast %92 : vector<16x16x4xf32> to vector<1x16x16x4xf32>
    tpu.vector_store %arg2[%c2_111, %c0_112, %c0_113, %c0_114], %95 {strides = array<i32>} : memref<3x16x16x4xf32, #tpu.memory_space<vmem>>, vector<1x16x16x4xf32>,
    return
  }
  func.func @transform_0(%arg0: i32) -> (i32, i32, i32, i32) {
    %c0_i32 = arith.constant 0 : i32
    %c0_i32_0 = arith.constant 0 : i32
    %c0_i32_1 = arith.constant 0 : i32
    %c0_i32_2 = arith.constant 0 : i32
    return %c0_i32, %c0_i32_0, %c0_i32_1, %arg0 : i32, i32, i32, i32
  }
  func.func @transform_1(%arg0: i32) -> (i32, i32, i32, i32) {
    %c0_i32 = arith.constant 0 : i32
    %c0_i32_0 = arith.constant 0 : i32
    %c0_i32_1 = arith.constant 0 : i32
    %c0_i32_2 = arith.constant 0 : i32
    return %c0_i32, %c0_i32_0, %c0_i32_1, %arg0 : i32, i32, i32, i32
  }
}

</mosaic_0001>

<bundles_post_ra>
// kernel: tpu_custom_call.1
= control target key start
LH: loop header
LB: loop body
LE: loop exit
PB: predicated region body
PF: predicated region fallthrough
CT: control target
= control target key end

     0   :  { %vm104_vm0 = vcmask 31744   ;;  %vm267_vm1 = vcmask 27648   ;;  %vm280_vm2 = vcmask 25600   ;;  %v2723_v0 = vmov 0.0   ;;  %s5250_s0 = inlined_call_operand.vmem [shape: f32[3,16,16,4], index: 0, kind: input, shape index: {}]   ;;  %s5251_s1 = inlined_call_operand.vmem [shape: f32[3,16,16,4], index: 1, kind: output, shape index: {}]  }
   0x1   :  { %265 = vst.msk [vmem:[#allocation2] sm:$0xff] %vm104_vm0, %v2723_v0  ;;  %266 = vst.msk [vmem:[#allocation2 + $0x8] sm:$0xff] %vm104_vm0, %v2723_v0  ;;  %v8_v1 = vld [vmem:[%s5250_s0] sm:$0xff]  ;;  %v9_v7 = vld [vmem:[%s5250_s0 + $0x8] sm:$0xff] }
   0x2   :  { %269 = vst.msk [vmem:[#allocation2 + $0x18] sm:$0xff] %vm104_vm0, %v2723_v0  ;;  %270 = vst.msk [vmem:[#allocation2 + $0x20] sm:$0xff] %vm104_vm0, %v2723_v0  ;;  %v40_v2 = vld [vmem:[%s5250_s0 + $0x100] sm:$0xff]  ;;  %v105_v4 = vsel %vm104_vm0, %v8_v1, 0.0  ;;  %v41_v8 = vld [vmem:[%s5250_s0 + $0x108] sm:$0xff]  ;;  %v110_v11 = vsel %vm104_vm0, %v9_v7, 0.0 }
   0x3   :  { %273 = vst.msk [vmem:[#allocation2 + $0x1b0] sm:$0xff] %vm104_vm0, %v2723_v0  ;;  %274 = vst.msk [vmem:[#allocation2 + $0x1b8] sm:$0xff] %vm104_vm0, %v2723_v0  ;;  %v72_v3 = vld [vmem:[%s5250_s0 + $0x200] sm:$0xff]  ;;  %v106_v5 = vsel %vm104_vm0, %v40_v2, 0.0  ;;  %v73_v9 = vld [vmem:[%s5250_s0 + $0x208] sm:$0xff]  ;;  %v111_v12 = vsel %vm104_vm0, %v41_v8, 0.0 }
   0x4   :  { %276 = vst.msk [vmem:[#allocation2 + $0x1c8] sm:$0xff] %vm104_vm0, %v2723_v0  ;;  %277 = vst.msk [vmem:[#allocation2 + $0x1d0] sm:$0xff] %vm104_vm0, %v2723_v0  ;;  %v108_v6 = vsel %vm104_vm0, %v72_v3, 0.0  ;;  %v107_v10 = vadd.f32 %v106_v5, %v105_v4  ;;  %v113_v13 = vsel %vm104_vm0, %v73_v9, 0.0  ;;  %v10_v14 = vld [vmem:[%s5250_s0 + $0x10] sm:$0xff]  ;;  %v112_v17 = vadd.f32 %v111_v12, %v110_v11  ;;  %v11_v21 = vld [vmem:[%s5250_s0 + $0x18] sm:$0xff] }
   0x5   :  { %268 = vst.msk [vmem:[#allocation2 + $0x10] sm:$0xf] %vm267_vm1, %v2723_v0  ;;  %271 = vst.msk [vmem:[#allocation2 + $0x28] sm:$0xf] %vm267_vm1, %v2723_v0  ;;  %v42_v15 = vld [vmem:[%s5250_s0 + $0x110] sm:$0xff]  ;;  %v115_v18 = vsel %vm104_vm0, %v10_v14, 0.0 }
   0x6   :  { %275 = vst.msk [vmem:[#allocation2 + $0x1c0] sm:$0xf] %vm267_vm1, %v2723_v0  ;;  %278 = vst.msk [vmem:[#allocation2 + $0x1d8] sm:$0xf] %vm267_vm1, %v2723_v0  ;;  %v74_v16 = vld [vmem:[%s5250_s0 + $0x210] sm:$0xff]  ;;  %v116_v19 = vsel %vm104_vm0, %v42_v15, 0.0  ;;  %v109_v24 = vadd.f32 %v108_v6, %v107_v10  ;;  %v114_v31 = vadd.f32 %v113_v13, %v112_v17 }
   0x7   :  { %281 = vst.msk [vmem:[#allocation2 + $0x30] sm:$0x3] %vm280_vm2, %v2723_v0  ;;  %282 = vst.msk [vmem:[#allocation2 + $0x48] sm:$0x3] %vm280_vm2, %v2723_v0  ;;  %v118_v20 = vsel %vm104_vm0, %v74_v16, 0.0  ;;  %v43_v22 = vld [vmem:[%s5250_s0 + $0x118] sm:$0xff]  ;;  %v117_v25 = vadd.f32 %v116_v19, %v115_v18 }
   0x8   :  { %283 = vst.msk [vmem:[#allocation2 + $0x60] sm:$0x3] %vm280_vm2, %v2723_v0  ;;  %284 = vst.msk [vmem:[#allocation2 + $0x78] sm:$0x3] %vm280_vm2, %v2723_v0  ;;  %v75_v23 = vld [vmem:[%s5250_s0 + $0x218] sm:$0xff]  ;;  %v120_v26 = vsel %vm104_vm0, %v11_v21, 0.0 }
   0x9   :  { %285 = vst.msk [vmem:[#allocation2 + $0x90] sm:$0x3] %vm280_vm2, %v2723_v0  ;;  %286 = vst.msk [vmem:[#allocation2 + $0xa8] sm:$0x3] %vm280_vm2, %v2723_v0  ;;  %v121_v27 = vsel %vm104_vm0, %v43_v22, 0.0  ;;  %v12_v28 = vld [vmem:[%s5250_s0 + $0x20] sm:$0xff]  ;;  %v119_v38 = vadd.f32 %v118_v20, %v117_v25 }
   0xa   :  { %287 = vst.msk [vmem:[#allocation2 + $0xc0] sm:$0x3] %vm280_vm2, %v2723_v0  ;;  %288 = vst.msk [vmem:[#allocation2 + $0xd8] sm:$0x3] %vm280_vm2, %v2723_v0  ;;  %v44_v29 = vld [vmem:[%s5250_s0 + $0x120] sm:$0xff]  ;;  %v122_v32 = vadd.f32 %v121_v27, %v120_v26  ;;  %v123_v33 = vsel %vm104_vm0, %v75_v23, 0.0 }
   0xb   :  { %289 = vst.msk [vmem:[#allocation2 + $0xf0] sm:$0x3] %vm280_vm2, %v2723_v0  ;;  %290 = vst.msk [vmem:[#allocation2 + $0x108] sm:$0x3] %vm280_vm2, %v2723_v0  ;;  %v76_v30 = vld [vmem:[%s5250_s0 + $0x220] sm:$0xff]  ;;  %v125_v34 = vsel %vm104_vm0, %v12_v28, 0.0 }
   0xc   :  { %291 = vst.msk [vmem:[#allocation2 + $0x120] sm:$0x3] %vm280_vm2, %v2723_v0  ;;  %292 = vst.msk [vmem:[#allocation2 + $0x138] sm:$0x3] %vm280_vm2, %v2723_v0  ;;  %v13_v35 = vld [vmem:[%s5250_s0 + $0x28] sm:$0xff]  ;;  %v126_v39 = vsel %vm104_vm0, %v44_v29, 0.0  ;;  %v124_v45 = vadd.f32 %v123_v33, %v122_v32 }
   0xd   :  { %293 = vst.msk [vmem:[#allocation2 + $0x150] sm:$0x3] %vm280_vm2, %v2723_v0  ;;  %294 = vst.msk [vmem:[#allocation2 + $0x168] sm:$0x3] %vm280_vm2, %v2723_v0  ;;  %v45_v36 = vld [vmem:[%s5250_s0 + $0x128] sm:$0xff]  ;;  %v128_v40 = vsel %vm104_vm0, %v76_v30, 0.0  ;;  %v127_v46 = vadd.f32 %v126_v39, %v125_v34 }
   0xe   :  { %295 = vst.msk [vmem:[#allocation2 + $0x180] sm:$0x3] %vm280_vm2, %v2723_v0  ;;  %296 = vst.msk [vmem:[#allocation2 + $0x198] sm:$0x3] %vm280_vm2, %v2723_v0  ;;  %v77_v37 = vld [vmem:[%s5250_s0 + $0x228] sm:$0xff]  ;;  %v130_v41 = vsel %vm104_vm0, %v13_v35, 0.0 }
   0xf   :  { %297 = vst.msk [vmem:[#allocation2 + $0x42] sm:$0x3] %vm280_vm2, %v2723_v0  ;;  %298 = vst.msk [vmem:[#allocation2 + $0x5a] sm:$0x3] %vm280_vm2, %v2723_v0  ;;  %v14_v42 = vld [vmem:[%s5250_s0 + $0x30] sm:$0xff]  ;;  %v131_v47 = vsel %vm104_vm0, %v45_v36, 0.0  ;;  %v129_v59 = vadd.f32 %v128_v40, %v127_v46 }
  0x10   :  { %299 = vst.msk [vmem:[#allocation2 + $0x72] sm:$0x3] %vm280_vm2, %v2723_v0  ;;  %300 = vst.msk [vmem:[#allocation2 + $0x8a] sm:$0x3] %vm280_vm2, %v2723_v0  ;;  %v46_v43 = vld [vmem:[%s5250_s0 + $0x130] sm:$0xff]  ;;  %v133_v48 = vsel %vm104_vm0, %v77_v37, 0.0  ;;  %v132_v52 = vadd.f32 %v131_v47, %v130_v41 }
  0x11   :  { %301 = vst.msk [vmem:[#allocation2 + $0xa2] sm:$0x3] %vm280_vm2, %v2723_v0  ;;  %302 = vst.msk [vmem:[#allocation2 + $0xba] sm:$0x3] %vm280_vm2, %v2723_v0  ;;  %v78_v44 = vld [vmem:[%s5250_s0 + $0x230] sm:$0xff]  ;;  %v15_v49 = vld [vmem:[%s5250_s0 + $0x38] sm:$0xff] }
  0x12   :  { %303 = vst.msk [vmem:[#allocation2 + $0xd2] sm:$0x3] %vm280_vm2, %v2723_v0  ;;  %304 = vst.msk [vmem:[#allocation2 + $0xea] sm:$0x3] %vm280_vm2, %v2723_v0  ;;  %v47_v50 = vld [vmem:[%s5250_s0 + $0x138] sm:$0xff]  ;;  %v135_v53 = vsel %vm104_vm0, %v14_v42, 0.0  ;;  %v134_v2 = vadd.f32 %v133_v48, %v132_v52 }
  0x13   :  { %305 = vst.msk [vmem:[#allocation2 + $0x102] sm:$0x3] %vm280_vm2, %v2723_v0  ;;  %306 = vst.msk [vmem:[#allocation2 + $0x11a] sm:$0x3] %vm280_vm2, %v2723_v0  ;;  %v79_v51 = vld [vmem:[%s5250_s0 + $0x238] sm:$0xff]  ;;  %v136_v54 = vsel %vm104_vm0, %v46_v43, 0.0 }
  0x14   :  { %307 = vst.msk [vmem:[#allocation2 + $0x132] sm:$0x3] %vm280_vm2, %v2723_v0  ;;  %308 = vst.msk [vmem:[#allocation2 + $0x14a] sm:$0x3] %vm280_vm2, %v2723_v0  ;;  %v138_v55 = vsel %vm104_vm0, %v78_v44, 0.0  ;;  %v16_v56 = vld [vmem:[%s5250_s0 + $0x40] sm:$0xff]  ;;  %v137_v60 = vadd.f32 %v136_v54, %v135_v53 }
  0x15   :  { %309 = vst.msk [vmem:[#allocation2 + $0x162] sm:$0x3] %vm280_vm2, %v2723_v0  ;;  %310 = vst.msk [vmem:[#allocation2 + $0x17a] sm:$0x3] %vm280_vm2, %v2723_v0  ;;  %v48_v57 = vld [vmem:[%s5250_s0 + $0x140] sm:$0xff]  ;;  %v140_v61 = vsel %vm104_vm0, %v15_v49, 0.0 }
  0x16   :  { %311 = vst.msk [vmem:[#allocation2 + $0x192] sm:$0x3] %vm280_vm2, %v2723_v0  ;;  %312 = vst.msk [vmem:[#allocation2 + $0x1aa] sm:$0x3] %vm280_vm2, %v2723_v0  ;;  %v80_v58 = vld [vmem:[%s5250_s0 + $0x240] sm:$0xff]  ;;  %v141_v62 = vsel %vm104_vm0, %v47_v50, 0.0  ;;  %v139_v9 = vadd.f32 %v138_v55, %v137_v60 }
  0x17   :  { %313 = vst.msk [vmem:[#allocation2 + $0x32] sm:$0xff] %vm104_vm0, %v109_v24  ;;  %314 = vst.msk [vmem:[#allocation2 + $0x3a] sm:$0xff] %vm104_vm0, %v114_v31  ;;  %v17_v63 = vld [vmem:[%s5250_s0 + $0x48] sm:$0xff]  ;;  %v142_v3 = vadd.f32 %v141_v62, %v140_v61  ;;  %v143_v4 = vsel %vm104_vm0, %v79_v51, 0.0  ;;  %v145_v5 = vsel %vm104_vm0, %v16_v56, 0.0  ;;  %v18_v6 = vld [vmem:[%s5250_s0 + $0x50] sm:$0xff] }
  0x18   :  { %315 = vst.msk [vmem:[#allocation2 + $0x4a] sm:$0xff] %vm104_vm0, %v119_v38  ;;  %316 = vst.msk [vmem:[#allocation2 + $0x52] sm:$0xff] %vm104_vm0, %v124_v45  ;;  %v49_v0 = vld [vmem:[%s5250_s0 + $0x148] sm:$0xff]  ;;  %v50_v7 = vld [vmem:[%s5250_s0 + $0x150] sm:$0xff]  ;;  %v146_v10 = vsel %vm104_vm0, %v48_v57, 0.0  ;;  %v148_v11 = vsel %vm104_vm0, %v80_v58, 0.0 }
  0x19   :  { %v81_v1 = vld [vmem:[%s5250_s0 + $0x248] sm:$0xff]  ;;  %v82_v8 = vld [vmem:[%s5250_s0 + $0x250] sm:$0xff]  ;;  %317 = vst.msk [vmem:[#allocation2 + $0x62] sm:$0xff] %vm104_vm0, %v129_v59  ;;  %v150_v12 = vsel %vm104_vm0, %v17_v63, 0.0  ;;  %v19_v13 = vld [vmem:[%s5250_s0 + $0x58] sm:$0xff]  ;;  %v144_v15 = vadd.f32 %v143_v4, %v142_v3  ;;  %v147_v16 = vadd.f32 %v146_v10, %v145_v5  ;;  %v151_v17 = vsel %vm104_vm0, %v49_v0, 0.0 }
  0x1a   :  { %v51_v14 = vld [vmem:[%s5250_s0 + $0x158] sm:$0xff]  ;;  %318 = vst.msk [vmem:[#allocation2 + $0x6a] sm:$0xff] %vm104_vm0, %v134_v2  ;;  %v153_v18 = vsel %vm104_vm0, %v81_v1, 0.0  ;;  %v20_v20 = vld [vmem:[%s5250_s0 + $0x60] sm:$0xff]  ;;  %319 = vst.msk [vmem:[#allocation2 + $0x7a] sm:$0xff] %vm104_vm0, %v139_v9  ;;  %v152_v21 = vadd.f32 %v151_v17, %v150_v12  ;;  %v155_v22 = vsel %vm104_vm0, %v18_v6, 0.0 }
  0x1b   :  { %v83_v19 = vld [vmem:[%s5250_s0 + $0x258] sm:$0xff]  ;;  %v156_v23 = vsel %vm104_vm0, %v50_v7, 0.0  ;;  %v158_v24 = vsel %vm104_vm0, %v82_v8, 0.0  ;;  %v52_v25 = vld [vmem:[%s5250_s0 + $0x160] sm:$0xff]  ;;  %v21_v27 = vld [vmem:[%s5250_s0 + $0x68] sm:$0xff]  ;;  %320 = vst.msk [vmem:[#allocation2 + $0x82] sm:$0xff] %vm104_vm0, %v144_v15  ;;  %v149_v28 = vadd.f32 %v148_v11, %v147_v16 }
  0x1c   :  { %v84_v26 = vld [vmem:[%s5250_s0 + $0x260] sm:$0xff]  ;;  %v157_v29 = vadd.f32 %v156_v23, %v155_v22  ;;  %v160_v30 = vsel %vm104_vm0, %v19_v13, 0.0  ;;  %v161_v31 = vsel %vm104_vm0, %v51_v14, 0.0  ;;  %v53_v32 = vld [vmem:[%s5250_s0 + $0x168] sm:$0xff]  ;;  %v154_v34 = vadd.f32 %v153_v18, %v152_v21  ;;  %v22_v38 = vld [vmem:[%s5250_s0 + $0x70] sm:$0xff] }
  0x1d   :  { %v85_v33 = vld [vmem:[%s5250_s0 + $0x268] sm:$0xff]  ;;  %v162_v35 = vadd.f32 %v161_v31, %v160_v30  ;;  %v163_v36 = vsel %vm104_vm0, %v83_v19, 0.0  ;;  %v165_v37 = vsel %vm104_vm0, %v20_v20, 0.0  ;;  %v54_v39 = vld [vmem:[%s5250_s0 + $0x170] sm:$0xff]  ;;  %321 = vst.msk [vmem:[#allocation2 + $0x92] sm:$0xff] %vm104_vm0, %v149_v28  ;;  %v166_v42 = vsel %vm104_vm0, %v52_v25, 0.0 }
  0x1e   :  { %v86_v40 = vld [vmem:[%s5250_s0 + $0x270] sm:$0xff]  ;;  %v159_v41 = vadd.f32 %v158_v24, %v157_v29  ;;  %v168_v43 = vsel %vm104_vm0, %v84_v26, 0.0  ;;  %v170_v44 = vsel %vm104_vm0, %v21_v27, 0.0  ;;  %v23_v45 = vld [vmem:[%s5250_s0 + $0x78] sm:$0xff]  ;;  %322 = vst.msk [vmem:[#allocation2 + $0x9a] sm:$0xff] %vm104_vm0, %v154_v34  ;;  %v167_v48 = vadd.f32 %v166_v42, %v165_v37  ;;  %v24_v52 = vld [vmem:[%s5250_s0 + $0x80] sm:$0xff] }
  0x1f   :  { %v55_v46 = vld [vmem:[%s5250_s0 + $0x178] sm:$0xff]  ;;  %v164_v47 = vadd.f32 %v163_v36, %v162_v35  ;;  %v171_v49 = vsel %vm104_vm0, %v53_v32, 0.0  ;;  %v173_v50 = vsel %vm104_vm0, %v85_v33, 0.0  ;;  %v175_v54 = vsel %vm104_vm0, %v22_v38, 0.0  ;;  %v56_v57 = vld [vmem:[%s5250_s0 + $0x180] sm:$0xff]  ;;  %v25_v59 = vld [vmem:[%s5250_s0 + $0x88] sm:$0xff] }
  0x20   :  { %v87_v51 = vld [vmem:[%s5250_s0 + $0x278] sm:$0xff]  ;;  %323 = vst.msk [vmem:[#allocation2 + $0xaa] sm:$0xff] %vm104_vm0, %v159_v41  ;;  %v172_v53 = vadd.f32 %v171_v49, %v170_v44  ;;  %v176_v55 = vsel %vm104_vm0, %v54_v39, 0.0  ;;  %v178_v56 = vsel %vm104_vm0, %v86_v40, 0.0  ;;  %v88_v58 = vld [vmem:[%s5250_s0 + $0x280] sm:$0xff]  ;;  %v169_v60 = vadd.f32 %v168_v43, %v167_v48  ;;  %v57_v0 = vld [vmem:[%s5250_s0 + $0x188] sm:$0xff] }
  0x21   :  { %324 = vst.msk [vmem:[#allocation2 + $0xb2] sm:$0xff] %vm104_vm0, %v164_v47  ;;  %v177_v61 = vadd.f32 %v176_v55, %v175_v54  ;;  %v180_v62 = vsel %vm104_vm0, %v23_v45, 0.0  ;;  %v181_v63 = vsel %vm104_vm0, %v55_v46, 0.0  ;;  %v89_v1 = vld [vmem:[%s5250_s0 + $0x288] sm:$0xff]  ;;  %v183_v4 = vsel %vm104_vm0, %v87_v51, 0.0  ;;  %v26_v6 = vld [vmem:[%s5250_s0 + $0x90] sm:$0xff] }
  0x22   :  { %v174_v2 = vadd.f32 %v173_v50, %v172_v53  ;;  %v182_v3 = vadd.f32 %v181_v63, %v180_v62  ;;  %v185_v5 = vsel %vm104_vm0, %v24_v52, 0.0  ;;  %v58_v7 = vld [vmem:[%s5250_s0 + $0x190] sm:$0xff]  ;;  %325 = vst.msk [vmem:[#allocation2 + $0xc2] sm:$0xff] %vm104_vm0, %v169_v60  ;;  %v186_v10 = vsel %vm104_vm0, %v56_v57, 0.0  ;;  %v27_v13 = vld [vmem:[%s5250_s0 + $0x98] sm:$0xff]  ;;  %v28_v20 = vld [vmem:[%s5250_s0 + $0xa0] sm:$0xff] }
  0x23   :  { %v90_v8 = vld [vmem:[%s5250_s0 + $0x290] sm:$0xff]  ;;  %v179_v9 = vadd.f32 %v178_v56, %v177_v61  ;;  %v188_v11 = vsel %vm104_vm0, %v88_v58, 0.0  ;;  %v190_v12 = vsel %vm104_vm0, %v25_v59, 0.0  ;;  %v59_v14 = vld [vmem:[%s5250_s0 + $0x198] sm:$0xff]  ;;  %v187_v16 = vadd.f32 %v186_v10, %v185_v5  ;;  %v60_v25 = vld [vmem:[%s5250_s0 + $0x1a0] sm:$0xff] }
  0x24   :  { %326 = vst.msk [vmem:[#allocation2 + $0xca] sm:$0xff] %vm104_vm0, %v174_v2  ;;  %v184_v15 = vadd.f32 %v183_v4, %v182_v3  ;;  %v191_v17 = vsel %vm104_vm0, %v57_v0, 0.0  ;;  %v193_v18 = vsel %vm104_vm0, %v89_v1, 0.0  ;;  %v91_v19 = vld [vmem:[%s5250_s0 + $0x298] sm:$0xff]  ;;  %v195_v22 = vsel %vm104_vm0, %v26_v6, 0.0  ;;  %v92_v26 = vld [vmem:[%s5250_s0 + $0x2a0] sm:$0xff] }
  0x25   :  { %327 = vst.msk [vmem:[#allocation2 + $0xda] sm:$0xff] %vm104_vm0, %v179_v9  ;;  %v192_v21 = vadd.f32 %v191_v17, %v190_v12  ;;  %v196_v23 = vsel %vm104_vm0, %v58_v7, 0.0  ;;  %v198_v24 = vsel %vm104_vm0, %v90_v8, 0.0  ;;  %v29_v27 = vld [vmem:[%s5250_s0 + $0xa8] sm:$0xff]  ;;  %v189_v28 = vadd.f32 %v188_v11, %v187_v16  ;;  %v30_v38 = vld [vmem:[%s5250_s0 + $0xb0] sm:$0xff]  ;;  %v31_v45 = vld [vmem:[%s5250_s0 + $0xb8] sm:$0xff] }
  0x26   :  { %328 = vst.msk [vmem:[#allocation2 + $0xe2] sm:$0xff] %vm104_vm0, %v184_v15  ;;  %v197_v29 = vadd.f32 %v196_v23, %v195_v22  ;;  %v200_v30 = vsel %vm104_vm0, %v27_v13, 0.0  ;;  %v201_v31 = vsel %vm104_vm0, %v59_v14, 0.0  ;;  %v61_v32 = vld [vmem:[%s5250_s0 + $0x1a8] sm:$0xff]  ;;  %v203_v36 = vsel %vm104_vm0, %v91_v19, 0.0  ;;  %v62_v39 = vld [vmem:[%s5250_s0 + $0x1b0] sm:$0xff] }
  0x27   :  { %v93_v33 = vld [vmem:[%s5250_s0 + $0x2a8] sm:$0xff]  ;;  %v194_v34 = vadd.f32 %v193_v18, %v192_v21  ;;  %v202_v35 = vadd.f32 %v201_v31, %v200_v30  ;;  %v205_v37 = vsel %vm104_vm0, %v28_v20, 0.0  ;;  %v94_v40 = vld [vmem:[%s5250_s0 + $0x2b0] sm:$0xff]  ;;  %329 = vst.msk [vmem:[#allocation2 + $0xf2] sm:$0xff] %vm104_vm0, %v189_v28  ;;  %v206_v42 = vsel %vm104_vm0, %v60_v25, 0.0  ;;  %v63_v46 = vld [vmem:[%s5250_s0 + $0x1b8] sm:$0xff] }
  0x28   :  { %v199_v41 = vadd.f32 %v198_v24, %v197_v29  ;;  %v208_v43 = vsel %vm104_vm0, %v92_v26, 0.0  ;;  %v210_v44 = vsel %vm104_vm0, %v29_v27, 0.0  ;;  %v207_v48 = vadd.f32 %v206_v42, %v205_v37  ;;  %v95_v51 = vld [vmem:[%s5250_s0 + $0x2b8] sm:$0xff]  ;;  %v32_v52 = vld [vmem:[%s5250_s0 + $0xc0] sm:$0xff]  ;;  %v33_v59 = vld [vmem:[%s5250_s0 + $0xc8] sm:$0xff] }
  0x29   :  { %330 = vst.msk [vmem:[#allocation2 + $0xfa] sm:$0xff] %vm104_vm0, %v194_v34  ;;  %v204_v47 = vadd.f32 %v203_v36, %v202_v35  ;;  %v211_v49 = vsel %vm104_vm0, %v61_v32, 0.0  ;;  %v213_v50 = vsel %vm104_vm0, %v93_v33, 0.0  ;;  %v215_v54 = vsel %vm104_vm0, %v30_v38, 0.0  ;;  %v64_v57 = vld [vmem:[%s5250_s0 + $0x1c0] sm:$0xff]  ;;  %v65_v0 = vld [vmem:[%s5250_s0 + $0x1c8] sm:$0xff] }
  0x2a   :  { %331 = vst.msk [vmem:[#allocation2 + $0x10a] sm:$0xff] %vm104_vm0, %v199_v41  ;;  %v212_v53 = vadd.f32 %v211_v49, %v210_v44  ;;  %v216_v55 = vsel %vm104_vm0, %v62_v39, 0.0  ;;  %v218_v56 = vsel %vm104_vm0, %v94_v40, 0.0  ;;  %v96_v58 = vld [vmem:[%s5250_s0 + $0x2c0] sm:$0xff]  ;;  %v209_v60 = vadd.f32 %v208_v43, %v207_v48  ;;  %v97_v1 = vld [vmem:[%s5250_s0 + $0x2c8] sm:$0xff]  ;;  %v34_v6 = vld [vmem:[%s5250_s0 + $0xd0] sm:$0xff] }
  0x2b   :  { %332 = vst.msk [vmem:[#allocation2 + $0x112] sm:$0xff] %vm104_vm0, %v204_v47  ;;  %v217_v61 = vadd.f32 %v216_v55, %v215_v54  ;;  %v220_v62 = vsel %vm104_vm0, %v31_v45, 0.0  ;;  %v221_v63 = vsel %vm104_vm0, %v63_v46, 0.0  ;;  %v223_v4 = vsel %vm104_vm0, %v95_v51, 0.0  ;;  %v66_v7 = vld [vmem:[%s5250_s0 + $0x1d0] sm:$0xff]  ;;  %v35_v13 = vld [vmem:[%s5250_s0 + $0xd8] sm:$0xff] }
  0x2c   :  { %v214_v2 = vadd.f32 %v213_v50, %v212_v53  ;;  %v222_v3 = vadd.f32 %v221_v63, %v220_v62  ;;  %v225_v5 = vsel %vm104_vm0, %v32_v52, 0.0  ;;  %v98_v8 = vld [vmem:[%s5250_s0 + $0x2d0] sm:$0xff]  ;;  %333 = vst.msk [vmem:[#allocation2 + $0x122] sm:$0xff] %vm104_vm0, %v209_v60  ;;  %v226_v10 = vsel %vm104_vm0, %v64_v57, 0.0  ;;  %v67_v14 = vld [vmem:[%s5250_s0 + $0x1d8] sm:$0xff]  ;;  %v36_v20 = vld [vmem:[%s5250_s0 + $0xe0] sm:$0xff] }
  0x2d   :  { %v219_v9 = vadd.f32 %v218_v56, %v217_v61  ;;  %v228_v11 = vsel %vm104_vm0, %v96_v58, 0.0  ;;  %v230_v12 = vsel %vm104_vm0, %v33_v59, 0.0  ;;  %v227_v16 = vadd.f32 %v226_v10, %v225_v5  ;;  %v99_v19 = vld [vmem:[%s5250_s0 + $0x2d8] sm:$0xff]  ;;  %v68_v21 = vld [vmem:[%s5250_s0 + $0x1e0] sm:$0xff]  ;;  %v37_v27 = vld [vmem:[%s5250_s0 + $0xe8] sm:$0xff] }
  0x2e   :  { %334 = vst.msk [vmem:[#allocation2 + $0x12a] sm:$0xff] %vm104_vm0, %v214_v2  ;;  %v224_v15 = vadd.f32 %v223_v4, %v222_v3  ;;  %v231_v17 = vsel %vm104_vm0, %v65_v0, 0.0  ;;  %v233_v18 = vsel %vm104_vm0, %v97_v1, 0.0  ;;  %v235_v23 = vsel %vm104_vm0, %v34_v6, 0.0  ;;  %v100_v26 = vld [vmem:[%s5250_s0 + $0x2e0] sm:$0xff]  ;;  %v69_v28 = vld [vmem:[%s5250_s0 + $0x1e8] sm:$0xff] }
  0x2f   :  { %335 = vst.msk [vmem:[#allocation2 + $0x13a] sm:$0xff] %vm104_vm0, %v219_v9  ;;  %v232_v22 = vadd.f32 %v231_v17, %v230_v12  ;;  %v236_v24 = vsel %vm104_vm0, %v66_v7, 0.0  ;;  %v238_v25 = vsel %vm104_vm0, %v98_v8, 0.0  ;;  %v229_v29 = vadd.f32 %v228_v11, %v227_v16  ;;  %v101_v33 = vld [vmem:[%s5250_s0 + $0x2e8] sm:$0xff]  ;;  %v38_v34 = vld [vmem:[%s5250_s0 + $0xf0] sm:$0xff]  ;;  %v39_v41 = vld [vmem:[%s5250_s0 + $0xf8] sm:$0xff] }
  0x30   :  { %336 = vst.msk [vmem:[#allocation2 + $0x142] sm:$0xff] %vm104_vm0, %v224_v15  ;;  %v237_v30 = vadd.f32 %v236_v24, %v235_v23  ;;  %v240_v31 = vsel %vm104_vm0, %v35_v13, 0.0  ;;  %v241_v32 = vsel %vm104_vm0, %v67_v14, 0.0  ;;  %v70_v35 = vld [vmem:[%s5250_s0 + $0x1f0] sm:$0xff]  ;;  %v243_v38 = vsel %vm104_vm0, %v99_v19, 0.0  ;;  %v71_v42 = vld [vmem:[%s5250_s0 + $0x1f8] sm:$0xff] }
  0x31   :  { %v234_v36 = vadd.f32 %v233_v18, %v232_v22  ;;  %v242_v37 = vadd.f32 %v241_v32, %v240_v31  ;;  %v245_v39 = vsel %vm104_vm0, %v36_v20, 0.0  ;;  %v102_v40 = vld [vmem:[%s5250_s0 + $0x2f0] sm:$0xff]  ;;  %337 = vst.msk [vmem:[#allocation2 + $0x152] sm:$0xff] %vm104_vm0, %v229_v29  ;;  %v246_v44 = vsel %vm104_vm0, %v68_v21, 0.0  ;;  %v103_v47 = vld [vmem:[%s5250_s0 + $0x2f8] sm:$0xff]  ;;  %v3193_v4 = vld [vmem:[#allocation2 + $0x61] sm:$0xff] }
  0x32   :  { %v239_v43 = vadd.f32 %v238_v25, %v237_v30  ;;  %v248_v45 = vsel %vm104_vm0, %v100_v26, 0.0  ;;  %v250_v46 = vsel %vm104_vm0, %v37_v27, 0.0  ;;  %v603_v48 = vld [vmem:[#allocation2 + $0x31] sm:$0xff]  ;;  %v247_v51 = vadd.f32 %v246_v44, %v245_v39  ;;  %v604_v54 = vld [vmem:[#allocation2 + $0x39] sm:$0xff]  ;;  %v3178_v56 = vld [vmem:[#allocation2 + $0x49] sm:$0xff] }
  0x33   :  { %v635_v49 = vld [vmem:[#allocation2 + $0x33] sm:$0xff]  ;;  %338 = vst.msk [vmem:[#allocation2 + $0x15a] sm:$0xff] %vm104_vm0, %v234_v36  ;;  %v244_v50 = vadd.f32 %v243_v38, %v242_v37  ;;  %v251_v52 = vsel %vm104_vm0, %v69_v28, 0.0  ;;  %v253_v53 = vsel %vm104_vm0, %v101_v33, 0.0  ;;  %v636_v55 = vld [vmem:[#allocation2 + $0x3b] sm:$0xff]  ;;  %v255_v58 = vsel %vm104_vm0, %v38_v34, 0.0 }
  0x34   :  { %339 = vst.msk [vmem:[#allocation2 + $0x16a] sm:$0xff] %vm104_vm0, %v239_v43  ;;  %v252_v57 = vadd.f32 %v251_v52, %v250_v46  ;;  %v256_v59 = vsel %vm104_vm0, %v70_v35, 0.0  ;;  %v258_v60 = vsel %vm104_vm0, %v102_v40, 0.0  ;;  %v3184_v61 = vld [vmem:[#allocation2 + $0x4b] sm:$0xff]  ;;  %v3188_v63 = vld [vmem:[#allocation2 + $0x53] sm:$0xff]  ;;  %v249_v0 = vadd.f32 %v248_v45, %v247_v51  ;;  %v3195_v5 = vld [vmem:[#allocation2 + $0x63] sm:$0xff] }
  0x35   :  { %v3186_v62 = vld [vmem:[#allocation2 + $0x51] sm:$0xff]  ;;  %340 = vst.msk [vmem:[#allocation2 + $0x172] sm:$0xff] %vm104_vm0, %v244_v50  ;;  %v257_v1 = vadd.f32 %v256_v59, %v255_v58  ;;  %v260_v2 = vsel %vm104_vm0, %v39_v41, 0.0  ;;  %v261_v3 = vsel %vm104_vm0, %v71_v42, 0.0  ;;  %v263_v8 = vsel %vm104_vm0, %v103_v47, 0.0  ;;  %v699_v11 = vld [vmem:[#allocation2 + $0x1a] sm:$0xff] }
  0x36   :  { %v254_v6 = vadd.f32 %v253_v53, %v252_v57  ;;  %v262_v7 = vadd.f32 %v261_v3, %v260_v2  ;;  %v3198_v9 = vld [vmem:[#allocation2 + $0x32] sm:$0xff]  ;;  %v3200_v10 = vadd.f32 %v635_v49, %v603_v48  ;;  %341 = vst.msk [vmem:[#allocation2 + $0x182] sm:$0xff] %vm104_vm0, %v249_v0  ;;  %v3203_v13 = vld [vmem:[#allocation2 + $0x3a] sm:$0xff]  ;;  %v3205_v14 = vadd.f32 %v636_v55, %v604_v54  ;;  %v700_v15 = vld [vmem:[#allocation2 + $0x22] sm:$0xff] }
  0x37   :  { %v259_v12 = vadd.f32 %v258_v60, %v257_v1  ;;  %v3207_v16 = vld [vmem:[#allocation2 + $0x4a] sm:$0xff]  ;;  %v3211_v17 = vadd.f32 %v3184_v61, %v3178_v56  ;;  %v3215_v18 = vadd.f32 %v3188_v63, %v3186_v62  ;;  %v3224_v22 = vadd.f32 %v3195_v5, %v3193_v4  ;;  %v3230_v25 = vld [vmem:[#allocation2 + $0x79] sm:$0xff]  ;;  %v3244_v31 = vld [vmem:[#allocation2 + $0x81] sm:$0xff] }
  0x38   :  { %342 = vst.msk [vmem:[#allocation2 + $0x18a] sm:$0xff] %vm104_vm0, %v254_v6  ;;  %v264_v19 = vadd.f32 %v263_v8, %v262_v7  ;;  %v3219_v20 = vadd.f32 %v699_v11, %v3200_v10  ;;  %v2365_v21 = vmul.f32 0.5, %v3200_v10  ;;  %v3226_v23 = vld [vmem:[#allocation2 + $0x69] sm:$0xff]  ;;  %v3234_v26 = vadd.f32 %v700_v15, %v3205_v14  ;;  %v3242_v30 = vld [vmem:[#allocation2 + $0x7b] sm:$0xff]  ;;  %v3261_v39 = vld [vmem:[#allocation2 + $0x52] sm:$0xff] }
  0x39   :  { %v3228_v24 = vld [vmem:[#allocation2 + $0x6b] sm:$0xff]  ;;  %343 = vst.msk [vmem:[#allocation2 + $0x19a] sm:$0xff] %vm104_vm0, %v259_v12  ;;  %v2366_v27 = vmul.f32 0.5, %v3205_v14  ;;  %v3239_v28 = vadd.f32 %v3211_v17, %v3198_v9  ;;  %v2367_v29 = vmul.f32 0.5, %v3211_v17  ;;  %v3246_v32 = vld [vmem:[#allocation2 + $0x83] sm:$0xff]  ;;  %v3252_v34 = vadd.f32 %v3215_v18, %v3203_v13  ;;  %v3281_v48 = vld [vmem:[#allocation2 + $0x93] sm:$0xff] }
  0x3a   :  { %344 = vst.msk [vmem:[#allocation2 + $0x1a2] sm:$0xff] %vm104_vm0, %v264_v19  ;;  %v2397_v33 = vsub.f32 %v2365_v21, %v3198_v9  ;;  %v2368_v35 = vmul.f32 0.5, %v3215_v18  ;;  %v3257_v36 = vadd.f32 %v3224_v22, %v3207_v16  ;;  %v3263_v40 = vld [vmem:[#allocation2 + $0x62] sm:$0xff]  ;;  %v2369_v41 = vmul.f32 0.5, %v3224_v22  ;;  %v3279_v47 = vld [vmem:[#allocation2 + $0x91] sm:$0xff]  ;;  %v3283_v49 = vld [vmem:[#allocation2 + $0x99] sm:$0xff] }
  0x3b   :  { %v2398_v37 = vsub.f32 %v2366_v27, %v3203_v13  ;;  %v2399_v38 = vsub.f32 %v2367_v29, %v3207_v16  ;;  %v3268_v42 = vadd.f32 %v3228_v24, %v3226_v23  ;;  %v3273_v45 = vadd.f32 %v3242_v30, %v3230_v25  ;;  %v3290_v54 = vld [vmem:[#allocation2 + $0x9b] sm:$0xff]  ;;  %v3292_v55 = vld [vmem:[#allocation2 + $0xa9] sm:$0xff]  ;;  %v3308_v2 = vld [vmem:[#allocation2 + $0xb1] sm:$0xff] }
  0x3c   :  { %v2626_v43 = vclamps-f32 %v2397_v33, 3.0  ;;  %v2400_v44 = vsub.f32 %v2368_v35, %v3261_v39  ;;  %v3277_v46 = vadd.f32 %v3246_v32, %v3244_v31  ;;  %v2401_v52 = vsub.f32 %v2369_v41, %v3263_v40  ;;  %5403 = vst [vmem:[#allocation5_spill] sm:$0xff] %v3290_v54  ;;  %v3294_v57 = vld [vmem:[#allocation2 + $0xab] sm:$0xff]  ;;  %5405 = vst [vmem:[#allocation7_spill] sm:$0xff] %v3308_v2  ;;  %v3310_v3 = vld [vmem:[#allocation2 + $0xb3] sm:$0xff] }
  0x3d   :  { %5401 = vst [vmem:[#allocation3_spill] sm:$0xff] %v3273_v45  ;;  %v2627_v50 = vclamps-f32 %v2398_v37, 3.0  ;;  %v2628_v51 = vclamps-f32 %v2399_v38, 3.0  ;;  %v3288_v53 = vadd.f32 %v3268_v42, %v3261_v39  ;;  %5404 = vst [vmem:[#allocation6_spill] sm:$0xff] %v3294_v57  ;;  %v3300_v59 = vld [vmem:[#allocation2 + $0x6a] sm:$0xff]  ;;  %v2370_v60 = vmul.f32 0.5, %v3268_v42 }
  0x3e   :  { %5402 = vst [vmem:[#allocation4_spill] sm:$0xff] %v3277_v46  ;;  %2658 = vst.msk [vmem:[%s5251_s1 + $0x200] sm:$0xff] %vm104_vm0, %v2626_v43  ;;  %v2629_v58 = vclamps-f32 %v2400_v44, 3.0  ;;  %v3305_v0 = vadd.f32 %v3273_v45, %v3263_v40  ;;  %v2371_v1 = vmul.f32 0.5, %v3273_v45  ;;  %v2630_v6 = vclamps-f32 %v2401_v52, 3.0  ;;  %v3320_v7 = vld [vmem:[#allocation2 + $0x7a] sm:$0xff] }
  0x3f   :  { %5406 = vst [vmem:[#allocation8_spill] sm:$0xff] %v3310_v3  ;;  %2659 = vst.msk [vmem:[%s5251_s1 + $0x208] sm:$0xff] %vm104_vm0, %v2627_v50  ;;  %v3324_v8 = vadd.f32 %v3277_v46, %v3300_v59  ;;  %v2372_v11 = vmul.f32 0.5, %v3277_v46  ;;  %v3329_v12 = vadd.f32 %v3281_v48, %v3279_v47  ;;  %v2402_v15 = vsub.f32 %v2370_v60, %v3300_v59  ;;  %v3337_v21 = vld [vmem:[#allocation2 + $0x82] sm:$0xff]  ;;  %v3339_v27 = vld [vmem:[#allocation2 + $0x92] sm:$0xff] }
  0x40   :  { %2660 = vst.msk [vmem:[%s5251_s1 + $0x210] sm:$0xff] %vm104_vm0, %v2628_v51  ;;  %2661 = vst.msk [vmem:[%s5251_s1 + $0x218] sm:$0xff] %vm104_vm0, %v2629_v58  ;;  %v2403_v19 = vsub.f32 %v2371_v1, %v3320_v7  ;;  %v3343_v29 = vadd.f32 %v3290_v54, %v3283_v49  ;;  %v3347_v33 = vadd.f32 %v3294_v57, %v3292_v55  ;;  %v3363_v43 = vld [vmem:[#allocation2 + $0xc1] sm:$0xff]  ;;  %v3367_v50 = vld [vmem:[#allocation2 + $0xc9] sm:$0xff] }
  0x41   :  { %5407 = vst [vmem:[#allocation9_spill] sm:$0xff] %v3329_v12  ;;  %2662 = vst.msk [vmem:[%s5251_s1 + $0x220] sm:$0xff] %vm104_vm0, %v2630_v6  ;;  %v2404_v35 = vsub.f32 %v2372_v11, %v3337_v21  ;;  %v3356_v37 = vadd.f32 %v3329_v12, %v3320_v7  ;;  %v2373_v38 = vmul.f32 0.5, %v3329_v12  ;;  %v3361_v41 = vadd.f32 %v3310_v3, %v3308_v2  ;;  %v3365_v44 = vld [vmem:[#allocation2 + $0xc3] sm:$0xff]  ;;  %v3374_v1 = vld [vmem:[#allocation2 + $0xcb] sm:$0xff] }
  0x42   :  { %5408 = vst [vmem:[#allocation10_spill] sm:$0xff] %v3343_v29  ;;  %5409 = vst [vmem:[#allocation11_spill] sm:$0xff] %v3347_v33  ;;  %v2631_v51 = vclamps-f32 %v2402_v15, 3.0  ;;  %v2632_v52 = vclamps-f32 %v2403_v19, 3.0  ;;  %v3371_v58 = vadd.f32 %v3343_v29, %v3337_v21  ;;  %v2374_v60 = vmul.f32 0.5, %v3343_v29  ;;  %v3376_v6 = vld [vmem:[#allocation2 + $0xd9] sm:$0xff] }
  0x43   :  { %5410 = vst [vmem:[#allocation12_spill] sm:$0xff] %v3356_v37  ;;  %5411 = vst [vmem:[#allocation13_spill] sm:$0xff] %v3361_v41  ;;  %v3378_v11 = vld [vmem:[#allocation2 + $0xdb] sm:$0xff]  ;;  %v2633_v12 = vclamps-f32 %v2404_v35, 3.0  ;;  %v2405_v3 = vsub.f32 %v2373_v38, %v3339_v27  ;;  %v3383_v2 = vld [vmem:[#allocation2 + $0xaa] sm:$0xff]  ;;  %v3387_v15 = vadd.f32 %v3347_v33, %v3339_v27  ;;  %v2375_v19 = vmul.f32 0.5, %v3347_v33 }
  0x44   :  { %5412 = vst [vmem:[#allocation14_spill] sm:$0xff] %v3363_v43  ;;  %5413 = vst [vmem:[#allocation15_spill] sm:$0xff] %v3365_v44  ;;  %v3381_v46 = vld [vmem:[#allocation2 + $0x9a] sm:$0xff]  ;;  %v3390_v29 = vld [vmem:[#allocation2 + $0xb2] sm:$0xff]  ;;  %v2376_v33 = vmul.f32 0.5, %v3361_v41 }
  0x45   :  { %5414 = vst [vmem:[#allocation16_spill] sm:$0xff] %v3367_v50  ;;  %5415 = vst [vmem:[#allocation17_spill] sm:$0xff] %v3371_v58  ;;  %v2406_v35 = vsub.f32 %v2374_v60, %v3381_v46  ;;  %v3403_v38 = vadd.f32 %v3361_v41, %v3381_v46  ;;  %v3410_v58 = vadd.f32 %v3365_v44, %v3363_v43  ;;  %v3414_v57 = vld [vmem:[#allocation2 + $0xe3] sm:$0xff]  ;;  %v3429_v44 = vld [vmem:[#allocation2 + $0xf1] sm:$0xff] }
  0x46   :  { %5416 = vst [vmem:[#allocation18_spill] sm:$0xff] %v3374_v1  ;;  %5417 = vst [vmem:[#allocation19_spill] sm:$0xff] %v3376_v6  ;;  %v2407_v60 = vsub.f32 %v2375_v19, %v3383_v2  ;;  %v3423_v41 = vadd.f32 %v3374_v1, %v3367_v50  ;;  %v3431_v43 = vld [vmem:[#allocation2 + $0xf3] sm:$0xff]  ;;  %v3441_v1 = vld [vmem:[#allocation2 + $0xfb] sm:$0xff] }
  0x47   :  { %5418 = vst [vmem:[#allocation20_spill] sm:$0xff] %v3378_v11  ;;  %5419 = vst [vmem:[#allocation21_spill] sm:$0xff] %v3383_v2  ;;  %v3433_v37 = vld [vmem:[#allocation2 + $0xf9] sm:$0xff]  ;;  %v2635_v54 = vclamps-f32 %v2406_v35, 3.0  ;;  %v2377_v19 = vmul.f32 0.5, %v3410_v58  ;;  %v3443_v50 = vld [vmem:[#allocation2 + $0x109] sm:$0xff] }
  0x48   :  { %5420 = vst [vmem:[#allocation22_spill] sm:$0xff] %v3387_v15  ;;  %5421 = vst [vmem:[#allocation23_spill] sm:$0xff] %v3390_v29  ;;  %v3406_v15 = vld [vmem:[#allocation2 + $0xc2] sm:$0xff]  ;;  %v2636_v35 = vclamps-f32 %v2407_v60, 3.0  ;;  %v3467_v60 = vld [vmem:[#allocation2 + $0xda] sm:$0xff] }
  0x49   :  { %2663 = vst.msk [vmem:[%s5251_s1 + $0x228] sm:$0xff] %vm104_vm0, %v2631_v51  ;;  %2664 = vst.msk [vmem:[%s5251_s1 + $0x230] sm:$0xff] %vm104_vm0, %v2632_v52  ;;  %v3412_v51 = vld [vmem:[#allocation2 + $0xe1] sm:$0xff]  ;;  %v2634_v52 = vclamps-f32 %v2405_v3, 3.0  ;;  %v3438_v3 = vadd.f32 %v3410_v58, %v3383_v2  ;;  %v2409_v2 = vsub.f32 %v2377_v19, %v3406_v15  ;;  %v3485_v19 = vadd.f32 %v3431_v43, %v3429_v44  ;;  %v3547_v45 = vld [vmem:[#allocation2 + $0x10a] sm:$0xff] }
  0x4a   :  { %5422 = vst [vmem:[#allocation24_spill] sm:$0xff] %v3403_v38  ;;  %5423 = vst [vmem:[#allocation25_spill] sm:$0xff] %v3406_v15  ;;  %v3427_v38 = vadd.f32 %v3378_v11, %v3376_v6  ;;  %v3445_v11 = vld [vmem:[#allocation2 + $0x10b] sm:$0xff] }
  0x4b   :  { %5424 = vst [vmem:[#allocation26_spill] sm:$0xff] %v3410_v58  ;;  %5425 = vst [vmem:[#allocation27_spill] sm:$0xff] %v3412_v51 }
  0x4c   :  { %5426 = vst [vmem:[#allocation28_spill] sm:$0xff] %v3414_v57  ;;  %2665 = vst.msk [vmem:[%s5251_s1 + $0x238] sm:$0xff] %vm104_vm0, %v2633_v12  ;;  %v2408_v12 = vsub.f32 %v2376_v33, %v3390_v29  ;;  %v3453_v33 = vadd.f32 %v3423_v41, %v3390_v29  ;;  %v3458_v58 = vadd.f32 %v3427_v38, %v3406_v15  ;;  %v3470_v29 = vld [vmem:[#allocation2 + $0xe2] sm:$0xff] }
  0x4d   :  { %5427 = vst [vmem:[#allocation29_spill] sm:$0xff] %v3423_v41  ;;  %5428 = vst [vmem:[#allocation30_spill] sm:$0xff] %v3427_v38  ;;  %v3517_v15 = vadd.f32 %v3485_v19, %v3467_v60 }
  0x4e   :  { %5429 = vst [vmem:[#allocation31_spill] sm:$0xff] %v3429_v44  ;;  %5430 = vst [vmem:[#allocation32_spill] sm:$0xff] %v3431_v43  ;;  %v2637_v6 = vclamps-f32 %v2408_v12, 3.0  ;;  %v3481_v12 = vld [vmem:[#allocation2 + $0xf2] sm:$0xff]  ;;  %v3513_v43 = vld [vmem:[#allocation2 + $0x129] sm:$0xff] }
  0x4f   :  { %5431 = vst [vmem:[#allocation33_spill] sm:$0xff] %v3433_v37  ;;  %5432 = vst [vmem:[#allocation34_spill] sm:$0xff] %v3438_v3  ;;  %v2378_v3 = vmul.f32 0.5, %v3423_v41  ;;  %v3474_v41 = vadd.f32 %v3414_v57, %v3412_v51  ;;  %v3495_v57 = vld [vmem:[#allocation2 + $0x111] sm:$0xff] }
  0x50   :  { %5433 = vst [vmem:[#allocation35_spill] sm:$0xff] %v3441_v1  ;;  %5434 = vst [vmem:[#allocation36_spill] sm:$0xff] %v3443_v50  ;;  %v3497_v51 = vld [vmem:[#allocation2 + $0x113] sm:$0xff] }
  0x51   :  { %5435 = vst [vmem:[#allocation37_spill] sm:$0xff] %v3445_v11  ;;  %2666 = vst.msk [vmem:[%s5251_s1 + $0x240] sm:$0xff] %vm104_vm0, %v2634_v52  ;;  %v3465_v52 = vld [vmem:[#allocation2 + $0xca] sm:$0xff] }
  0x52   :  { %5436 = vst [vmem:[#allocation38_spill] sm:$0xff] %v3453_v33  ;;  %5437 = vst [vmem:[#allocation39_spill] sm:$0xff] %v3458_v58  ;;  %v2379_v33 = vmul.f32 0.5, %v3427_v38  ;;  %v3489_v38 = vadd.f32 %v3441_v1, %v3433_v37  ;;  %v3493_v58 = vadd.f32 %v3445_v11, %v3443_v50  ;;  %v3506_v1 = vadd.f32 %v3474_v41, %v3465_v52  ;;  %v3509_v11 = vld [vmem:[#allocation2 + $0x121] sm:$0xff] }
  0x53   :  { %2667 = vst.msk [vmem:[%s5251_s1 + $0x248] sm:$0xff] %vm104_vm0, %v2635_v54  ;;  %5438 = vst [vmem:[#allocation40_spill] sm:$0xff] %v3465_v52  ;;  %v2410_v54 = vsub.f32 %v2378_v3, %v3465_v52  ;;  %v2638_v3 = vclamps-f32 %v2409_v2, 3.0  ;;  %v2380_v37 = vmul.f32 0.5, %v3474_v41  ;;  %v3511_v50 = vld [vmem:[#allocation2 + $0x123] sm:$0xff]  ;;  %v2381_v2 = vmul.f32 0.5, %v3485_v19 }
  0x54   :  { %5439 = vst [vmem:[#allocation41_spill] sm:$0xff] %v3467_v60  ;;  %5440 = vst [vmem:[#allocation42_spill] sm:$0xff] %v3470_v29  ;;  %v3545_v52 = vld [vmem:[#allocation2 + $0xfa] sm:$0xff] }
  0x55   :  { %5441 = vst [vmem:[#allocation43_spill] sm:$0xff] %v3474_v41  ;;  %2668 = vst.msk [vmem:[%s5251_s1 + $0x250] sm:$0xff] %vm104_vm0, %v2636_v35  ;;  %v2411_v35 = vsub.f32 %v2379_v33, %v3467_v60  ;;  %v2639_v44 = vclamps-f32 %v2410_v54, 3.0  ;;  %v3524_v33 = vld [vmem:[#allocation2 + $0x12b] sm:$0xff]  ;;  %v3526_v41 = vld [vmem:[#allocation2 + $0x139] sm:$0xff]  ;;  %v3538_v60 = vadd.f32 %v3493_v58, %v3481_v12 }
  0x56   :  { %5442 = vst [vmem:[#allocation44_spill] sm:$0xff] %v3481_v12  ;;  %5443 = vst [vmem:[#allocation45_spill] sm:$0xff] %v3485_v19  ;;  %v2382_v19 = vmul.f32 0.5, %v3489_v38 }
  0x57   :  { %5444 = vst [vmem:[#allocation46_spill] sm:$0xff] %v3489_v38  ;;  %5445 = vst [vmem:[#allocation47_spill] sm:$0xff] %v3493_v58  ;;  %v2640_v54 = vclamps-f32 %v2411_v35, 3.0  ;;  %v3554_v35 = vadd.f32 %v3497_v51, %v3495_v57 }
  0x58   :  { %5446 = vst [vmem:[#allocation48_spill] sm:$0xff] %v3495_v57  ;;  %5447 = vst [vmem:[#allocation49_spill] sm:$0xff] %v3497_v51 }
  0x59   :  { %2669 = vst.msk [vmem:[%s5251_s1 + $0x258] sm:$0xff] %vm104_vm0, %v2637_v6  ;;  %5448 = vst [vmem:[#allocation50_spill] sm:$0xff] %v3506_v1  ;;  %v3522_v6 = vadd.f32 %v3489_v38, %v3470_v29  ;;  %v3528_v1 = vld [vmem:[#allocation2 + $0x13b] sm:$0xff]  ;;  %v3558_v38 = vadd.f32 %v3511_v50, %v3509_v11 }
  0x5a   :  { %5449 = vst [vmem:[#allocation51_spill] sm:$0xff] %v3509_v11  ;;  %5450 = vst [vmem:[#allocation52_spill] sm:$0xff] %v3511_v50  ;;  %v3573_v51 = vadd.f32 %v3528_v1, %v3526_v41  ;;  %v3575_v50 = vld [vmem:[#allocation2 + $0x141] sm:$0xff] }
  0x5b   :  { %5451 = vst [vmem:[#allocation53_spill] sm:$0xff] %v3513_v43  ;;  %5452 = vst [vmem:[#allocation54_spill] sm:$0xff] %v3517_v15  ;;  %v2412_v15 = vsub.f32 %v2380_v37, %v3470_v29  ;;  %v3550_v37 = vld [vmem:[#allocation2 + $0x112] sm:$0xff]  ;;  %v3577_v11 = vld [vmem:[#allocation2 + $0x143] sm:$0xff] }
  0x5c   :  { %5453 = vst [vmem:[#allocation55_spill] sm:$0xff] %v3522_v6  ;;  %5454 = vst [vmem:[#allocation56_spill] sm:$0xff] %v3524_v33  ;;  %v2413_v6 = vsub.f32 %v2381_v2, %v3481_v12  ;;  %v2414_v2 = vsub.f32 %v2382_v19, %v3545_v52  ;;  %v2384_v19 = vmul.f32 0.5, %v3554_v35  ;;  %v3585_v12 = vld [vmem:[#allocation2 + $0x151] sm:$0xff]  ;;  %v3627_v29 = vld [vmem:[#allocation2 + $0x13a] sm:$0xff] }
  0x5d   :  { %5455 = vst [vmem:[#allocation57_spill] sm:$0xff] %v3526_v41  ;;  %5456 = vst [vmem:[#allocation58_spill] sm:$0xff] %v3528_v1  ;;  %v2385_v1 = vmul.f32 0.5, %v3558_v38  ;;  %v3604_v41 = vld [vmem:[#allocation2 + $0x15b] sm:$0xff] }
  0x5e   :  { %2670 = vst.msk [vmem:[%s5251_s1 + $0x260] sm:$0xff] %vm104_vm0, %v2638_v3  ;;  %5457 = vst [vmem:[#allocation59_spill] sm:$0xff] %v3538_v60  ;;  %v2383_v3 = vmul.f32 0.5, %v3493_v58  ;;  %v3565_v60 = vld [vmem:[#allocation2 + $0x122] sm:$0xff]  ;;  %v3569_v58 = vadd.f32 %v3524_v33, %v3513_v43  ;;  %v2642_v57 = vclamps-f32 %v2413_v6, 3.0  ;;  %v3587_v33 = vld [vmem:[#allocation2 + $0x153] sm:$0xff] }
  0x5f   :  { %2671 = vst.msk [vmem:[%s5251_s1 + $0x268] sm:$0xff] %vm104_vm0, %v2639_v44  ;;  %5458 = vst [vmem:[#allocation60_spill] sm:$0xff] %v3545_v52  ;;  %v2641_v44 = vclamps-f32 %v2412_v15, 3.0  ;;  %v3582_v15 = vadd.f32 %v3554_v35, %v3545_v52  ;;  %v3589_v43 = vld [vmem:[#allocation2 + $0x159] sm:$0xff]  ;;  %v2643_v6 = vclamps-f32 %v2414_v2, 3.0  ;;  %v3608_v52 = vld [vmem:[#allocation2 + $0x16b] sm:$0xff]  ;;  %v2416_v2 = vsub.f32 %v2384_v19, %v3550_v37 }
  0x60   :  { %5459 = vst [vmem:[#allocation61_spill] sm:$0xff] %v3547_v45  ;;  %5460 = vst [vmem:[#allocation62_spill] sm:$0xff] %v3550_v37  ;;  %v3634_v19 = vadd.f32 %v3577_v11, %v3575_v50 }
  0x61   :  { %5461 = vst [vmem:[#allocation63_spill] sm:$0xff] %v3554_v35  ;;  %5462 = vst [vmem:[#allocation64_spill] sm:$0xff] %v3558_v38  ;;  %v3602_v35 = vadd.f32 %v3569_v58, %v3550_v37  ;;  %v3707_v37 = vld [vmem:[#allocation2 + $0x16a] sm:$0xff] }
  0x62   :  { %2672 = vst.msk [vmem:[%s5251_s1 + $0x270] sm:$0xff] %vm104_vm0, %v2640_v54  ;;  %5463 = vst [vmem:[#allocation65_spill] sm:$0xff] %v3565_v60  ;;  %v2415_v54 = vsub.f32 %v2383_v3, %v3547_v45  ;;  %v3597_v3 = vadd.f32 %v3558_v38, %v3547_v45  ;;  %v2386_v38 = vmul.f32 0.5, %v3569_v58  ;;  %v3625_v45 = vld [vmem:[#allocation2 + $0x12a] sm:$0xff] }
  0x63   :  { %5464 = vst [vmem:[#allocation66_spill] sm:$0xff] %v3569_v58  ;;  %5465 = vst [vmem:[#allocation67_spill] sm:$0xff] %v3573_v51  ;;  %v3638_v58 = vadd.f32 %v3587_v33, %v3585_v12 }
  0x64   :  { %5466 = vst [vmem:[#allocation68_spill] sm:$0xff] %v3575_v50  ;;  %5467 = vst [vmem:[#allocation69_spill] sm:$0xff] %v3577_v11 }
  0x65   :  { %5468 = vst [vmem:[#allocation70_spill] sm:$0xff] %v3582_v15  ;;  %5469 = vst [vmem:[#allocation71_spill] sm:$0xff] %v3585_v12  ;;  %v3606_v15 = vld [vmem:[#allocation2 + $0x169] sm:$0xff]  ;;  %v3657_v12 = vld [vmem:[#allocation2 + $0x173] sm:$0xff] }
  0x66   :  { %5470 = vst [vmem:[#allocation72_spill] sm:$0xff] %v3587_v33  ;;  %5471 = vst [vmem:[#allocation73_spill] sm:$0xff] %v3589_v43  ;;  %v3653_v11 = vadd.f32 %v3608_v52, %v3606_v15  ;;  %v3655_v33 = vld [vmem:[#allocation2 + $0x171] sm:$0xff] }
  0x67   :  { %2673 = vst.msk [vmem:[%s5251_s1 + $0x278] sm:$0xff] %vm104_vm0, %v2641_v44  ;;  %5472 = vst [vmem:[#allocation74_spill] sm:$0xff] %v3597_v3  ;;  %v2644_v44 = vclamps-f32 %v2415_v54, 3.0  ;;  %v3618_v3 = vadd.f32 %v3573_v51, %v3565_v60  ;;  %v3630_v54 = vld [vmem:[#allocation2 + $0x142] sm:$0xff] }
  0x68   :  { %5473 = vst [vmem:[#allocation75_spill] sm:$0xff] %v3602_v35  ;;  %5474 = vst [vmem:[#allocation76_spill] sm:$0xff] %v3604_v41  ;;  %v2417_v35 = vsub.f32 %v2385_v1, %v3565_v60  ;;  %v2645_v1 = vclamps-f32 %v2416_v2, 3.0  ;;  %v2388_v2 = vmul.f32 0.5, %v3634_v19  ;;  %v3665_v60 = vld [vmem:[#allocation2 + $0x181] sm:$0xff] }
  0x69   :  { %5475 = vst [vmem:[#allocation77_spill] sm:$0xff] %v3606_v15  ;;  %5476 = vst [vmem:[#allocation78_spill] sm:$0xff] %v3608_v52  ;;  %v2389_v52 = vmul.f32 0.5, %v3638_v58  ;;  %v3684_v15 = vld [vmem:[#allocation2 + $0x18b] sm:$0xff] }
  0x6a   :  { %2674 = vst.msk [vmem:[%s5251_s1 + $0x280] sm:$0xff] %vm104_vm0, %v2642_v57  ;;  %5477 = vst [vmem:[#allocation79_spill] sm:$0xff] %v3618_v3  ;;  %v2387_v57 = vmul.f32 0.5, %v3573_v51  ;;  %v3645_v3 = vld [vmem:[#allocation2 + $0x152] sm:$0xff]  ;;  %v3649_v51 = vadd.f32 %v3604_v41, %v3589_v43  ;;  %v2646_v50 = vclamps-f32 %v2417_v35, 3.0  ;;  %v3667_v41 = vld [vmem:[#allocation2 + $0x183] sm:$0xff] }
  0x6b   :  { %2675 = vst.msk [vmem:[%s5251_s1 + $0x288] sm:$0xff] %vm104_vm0, %v2643_v6  ;;  %5478 = vst [vmem:[#allocation80_spill] sm:$0xff] %v3625_v45  ;;  %v2418_v6 = vsub.f32 %v2386_v38, %v3625_v45  ;;  %v3662_v38 = vadd.f32 %v3634_v19, %v3625_v45  ;;  %v3669_v43 = vld [vmem:[#allocation2 + $0x189] sm:$0xff]  ;;  %v3688_v45 = vld [vmem:[#allocation2 + $0x19b] sm:$0xff] }
  0x6c   :  { %5479 = vst [vmem:[#allocation81_spill] sm:$0xff] %v3627_v29  ;;  %5480 = vst [vmem:[#allocation82_spill] sm:$0xff] %v3630_v54 }
  0x6d   :  { %5481 = vst [vmem:[#allocation83_spill] sm:$0xff] %v3634_v19  ;;  %5482 = vst [vmem:[#allocation84_spill] sm:$0xff] %v3638_v58  ;;  %v2647_v35 = vclamps-f32 %v2418_v6, 3.0  ;;  %v3682_v19 = vadd.f32 %v3649_v51, %v3630_v54  ;;  %v2420_v6 = vsub.f32 %v2388_v2, %v3630_v54  ;;  %v3716_v2 = vadd.f32 %v3667_v41, %v3665_v60  ;;  %v410_v54 = vld [vmem:[#allocation2 + $0x1b] sm:$0xff] }
  0x6e   :  { %2676 = vst.msk [vmem:[%s5251_s1 + $0x290] sm:$0xff] %vm104_vm0, %v2644_v44  ;;  %5483 = vst [vmem:[#allocation85_spill] sm:$0xff] %v3645_v3  ;;  %v2419_v44 = vsub.f32 %v2387_v57, %v3627_v29  ;;  %v3677_v57 = vadd.f32 %v3638_v58, %v3627_v29  ;;  %v2390_v58 = vmul.f32 0.5, %v3649_v51  ;;  %v3705_v29 = vld [vmem:[#allocation2 + $0x15a] sm:$0xff] }
  0x6f   :  { %5484 = vst [vmem:[#allocation86_spill] sm:$0xff] %v3649_v51  ;;  %5485 = vst [vmem:[#allocation87_spill] sm:$0xff] %v3653_v11  ;;  %v3723_v51 = vld [vmem:[#allocation2 + $0x172] sm:$0xff] }
  0x70   :  { %5486 = vst [vmem:[#allocation88_spill] sm:$0xff] %v3655_v33  ;;  %5487 = vst [vmem:[#allocation89_spill] sm:$0xff] %v3657_v12 }
  0x71   :  { %5488 = vst [vmem:[#allocation90_spill] sm:$0xff] %v3662_v38  ;;  %5489 = vst [vmem:[#allocation91_spill] sm:$0xff] %v3665_v60  ;;  %v3686_v38 = vld [vmem:[#allocation2 + $0x199] sm:$0xff] }
  0x72   :  { %5490 = vst [vmem:[#allocation92_spill] sm:$0xff] %v3667_v41  ;;  %5491 = vst [vmem:[#allocation93_spill] sm:$0xff] %v3669_v43  ;;  %v697_v41 = vadd.f32 %v3688_v45, %v3686_v38 }
  0x73   :  { %2677 = vst.msk [vmem:[%s5251_s1 + $0x298] sm:$0xff] %vm104_vm0, %v2645_v1  ;;  %5492 = vst [vmem:[#allocation94_spill] sm:$0xff] %v3677_v57  ;;  %v2648_v1 = vclamps-f32 %v2419_v44, 3.0  ;;  %v3698_v57 = vadd.f32 %v3653_v11, %v3645_v3  ;;  %v3712_v44 = vadd.f32 %v3657_v12, %v3655_v33  ;;  %v3733_v12 = vld [vmem:[#allocation2 + $0x1a1] sm:$0xff] }
  0x74   :  { %5493 = vst [vmem:[#allocation95_spill] sm:$0xff] %v3682_v19  ;;  %5494 = vst [vmem:[#allocation96_spill] sm:$0xff] %v3684_v15  ;;  %v2421_v19 = vsub.f32 %v2389_v52, %v3645_v3  ;;  %v2649_v52 = vclamps-f32 %v2420_v6, 3.0  ;;  %v3741_v6 = vld [vmem:[#allocation2 + $0x1a3] sm:$0xff]  ;;  %v378_v3 = vld [vmem:[#allocation2 + $0x19] sm:$0xff] }
  0x75   :  { %5495 = vst [vmem:[#allocation97_spill] sm:$0xff] %v3686_v38  ;;  %5496 = vst [vmem:[#allocation98_spill] sm:$0xff] %v3688_v45 }
  0x76   :  { %2678 = vst.msk [vmem:[%s5251_s1 + $0x2a0] sm:$0xff] %vm104_vm0, %v2646_v50  ;;  %5497 = vst [vmem:[#allocation99_spill] sm:$0xff] %v3698_v57  ;;  %v2391_v50 = vmul.f32 0.5, %v3653_v11  ;;  %v3725_v57 = vld [vmem:[#allocation2 + $0x182] sm:$0xff]  ;;  %v3729_v11 = vadd.f32 %v3684_v15, %v3669_v43  ;;  %v2650_v60 = vclamps-f32 %v2421_v19, 3.0  ;;  %v3749_v19 = vadd.f32 %v3716_v2, %v3707_v37 }
  0x77   :  { %2679 = vst.msk [vmem:[%s5251_s1 + $0x2a8] sm:$0xff] %vm104_vm0, %v2647_v35  ;;  %5498 = vst [vmem:[#allocation100_spill] sm:$0xff] %v3712_v44  ;;  %v2422_v35 = vsub.f32 %v2390_v58, %v3705_v29  ;;  %v2392_v58 = vmul.f32 0.5, %v3712_v44  ;;  %v411_v15 = vld [vmem:[#allocation2 + $0x23] sm:$0xff]  ;;  %v2395_v43 = vmul.f32 0.5, %v697_v41 }
  0x78   :  { %5499 = vst [vmem:[#allocation101_spill] sm:$0xff] %v3716_v2  ;;  %2680 = vst.msk [vmem:[%s5251_s1 + $0x2b0] sm:$0xff] %vm104_vm0, %v2648_v1  ;;  %v2423_v33 = vsub.f32 %v2391_v50, %v3707_v37  ;;  %v3738_v1 = vadd.f32 %v3712_v44, %v3705_v29  ;;  %v2393_v50 = vmul.f32 0.5, %v3716_v2  ;;  %v3754_v38 = vadd.f32 %v3729_v11, %v3723_v51  ;;  %v379_v44 = vld [vmem:[#allocation2 + $0x21] sm:$0xff] }
  0x79   :  { %5500 = vst [vmem:[#allocation102_spill] sm:$0xff] %v3725_v57  ;;  %5501 = vst [vmem:[#allocation103_spill] sm:$0xff] %v3729_v11  ;;  %v2651_v45 = vclamps-f32 %v2422_v35, 3.0  ;;  %v3761_v35 = vld [vmem:[#allocation2 + $0x18a] sm:$0xff]  ;;  %v3765_v2 = vadd.f32 %v697_v41, %v3725_v57 }
  0x7a   :  { %5502 = vst [vmem:[#allocation104_spill] sm:$0xff] %v3738_v1  ;;  %2681 = vst.msk [vmem:[%s5251_s1 + $0x2b8] sm:$0xff] %vm104_vm0, %v2649_v52  ;;  %v2652_v1 = vclamps-f32 %v2423_v33, 3.0  ;;  %v2424_v52 = vsub.f32 %v2392_v58, %v3723_v51  ;;  %v442_v33 = vadd.f32 %v410_v54, %v378_v3 }
  0x7b   :  { %5503 = vst [vmem:[#allocation105_spill] sm:$0xff] %v3749_v19  ;;  %5504 = vst [vmem:[#allocation106_spill] sm:$0xff] %v3754_v38  ;;  %v2394_v19 = vmul.f32 0.5, %v3729_v11  ;;  %v2425_v38 = vsub.f32 %v2393_v50, %v3725_v57  ;;  %v443_v50 = vadd.f32 %v411_v15, %v379_v44  ;;  %v3805_v44 = vadd.f32 %v3234_v26, %v3261_v39 }
  0x7c   :  { %2682 = vst.msk [vmem:[%s5251_s1 + $0x2c0] sm:$0xff] %vm104_vm0, %v2650_v60  ;;  %5505 = vst [vmem:[#allocation107_spill] sm:$0xff] %v3765_v2  ;;  %v698_v60 = vadd.f32 %v3741_v6, %v3733_v12  ;;  %v2653_v58 = vclamps-f32 %v2424_v52, 3.0  ;;  %v3779_v2 = vld [vmem:[#allocation2 + $0x19a] sm:$0xff]  ;;  %v507_v52 = vadd.f32 %v3178_v56, %v442_v33  ;;  %v510_v26 = vadd.f32 %v3205_v14, %v3226_v23 }
  0x7d   :  { %2683 = vst.msk [vmem:[%s5251_s1 + $0x2c8] sm:$0xff] %vm104_vm0, %v2651_v45  ;;  %2684 = vst.msk [vmem:[%s5251_s1 + $0x2d0] sm:$0xff] %vm104_vm0, %v2652_v1  ;;  %v2426_v11 = vsub.f32 %v2394_v19, %v3761_v35  ;;  %v3783_v45 = vadd.f32 %v3219_v20, %v3207_v16  ;;  %v2654_v41 = vclamps-f32 %v2425_v38, 3.0  ;;  %v2427_v57 = vsub.f32 %v2395_v43, %v3779_v2  ;;  %v3793_v19 = vld [vmem:[#allocation2 + $0x1a2] sm:$0xff] }
  0x7e   :  { %v3787_v3 = vadd.f32 %v698_v60, %v3761_v35  ;;  %v2396_v54 = vmul.f32 0.5, %v698_v60  ;;  %2685 = vst.msk [vmem:[%s5251_s1 + $0x2d8] sm:$0xff] %vm104_vm0, %v2653_v58  ;;  %v508_v15 = vadd.f32 %v3186_v62, %v443_v50  ;;  %v3814_v56 = vadd.f32 %v3184_v61, %v507_v52 }
  0x7f   :  { %v2655_v1 = vclamps-f32 %v2426_v11, 3.0  ;;  %v1788_v20 = vmul.f32 0.5, %v3783_v45  ;;  %2686 = vst.msk [vmem:[%s5251_s1 + $0x2e0] sm:$0xff] %vm104_vm0, %v2654_v41  ;;  %v2656_v43 = vclamps-f32 %v2427_v57, 3.0  ;;  %v509_v11 = vadd.f32 %v3200_v10, %v3193_v4 }
  0x80   :  { %v2428_v38 = vsub.f32 %v2396_v54, %v3793_v19  ;;  %v3817_v62 = vadd.f32 %v3188_v63, %v508_v15  ;;  %v3821_v57 = vadd.f32 %v3239_v28, %v3263_v40  ;;  %v1789_v10 = vmul.f32 0.5, %v3805_v44 }
  0x81   :  { %2687 = vst.msk [vmem:[%s5251_s1 + $0x2e8] sm:$0xff] %vm104_vm0, %v2655_v1  ;;  %2688 = vst.msk [vmem:[%s5251_s1 + $0x2f0] sm:$0xff] %vm104_vm0, %v2656_v43  ;;  %v3831_v61 = vadd.f32 %v3195_v5, %v509_v11  ;;  %v3835_v63 = vadd.f32 %v3252_v34, %v3300_v59  ;;  %v1756_v28 = vmul.f32 -0.25, %v3814_v56  ;;  %v3841_v23 = vadd.f32 %v3228_v24, %v510_v26 }
  0x82   :  { %v2657_v4 = vclamps-f32 %v2428_v38, 3.0  ;;  %v1757_v60 = vmul.f32 -0.25, %v3817_v62  ;;  %v1790_v14 = vmul.f32 0.5, %v3821_v57  ;;  %v511_v34 = vadd.f32 %v3211_v17, %v3230_v25 }
  0x83   :  { %v1758_v5 = vmul.f32 -0.25, %v3831_v61  ;;  %v1791_v33 = vmul.f32 0.5, %v3835_v63  ;;  %v3853_v58 = vadd.f32 %v3257_v36, %v3320_v7  ;;  %v1820_v50 = vadd.f32 %v1788_v20, %v1756_v28 }
  0x84   :  { %2689 = vst.msk [vmem:[%s5251_s1 + $0x2f8] sm:$0xff] %vm104_vm0, %v2657_v4  ;;  %v1821_v41 = vadd.f32 %v1789_v10, %v1757_v60  ;;  %v1759_v24 = vmul.f32 -0.25, %v3841_v23  ;;  %v512_v54 = vadd.f32 %v3215_v18, %v3244_v31  ;;  %v3859_v52 = vadd.f32 %v3242_v30, %v511_v34  ;;  %v5506_v60 = vld [vmem:[#allocation3_spill] sm:$0xff] }
  0x85   :  { %v1822_v1 = vadd.f32 %v1790_v14, %v1758_v5  ;;  %v1792_v15 = vmul.f32 0.5, %v3853_v58  ;;  %v3864_v17 = vadd.f32 %v3288_v53, %v3337_v21  ;;  %v1852_v25 = vsub.f32 %v1820_v50, %v3198_v9 }
  0x86   :  { %v1853_v36 = vsub.f32 %v1821_v41, %v3203_v13  ;;  %v1823_v20 = vadd.f32 %v1791_v33, %v1759_v24  ;;  %v3869_v43 = vadd.f32 %v3246_v32, %v512_v54  ;;  %v1760_v31 = vmul.f32 -0.25, %v3859_v52  ;;  %v5509_v33 = vld [vmem:[#allocation12_spill] sm:$0xff]  ;;  %v5511_v24 = vld [vmem:[#allocation6_spill] sm:$0xff]  ;;  %v5513_v54 = vld [vmem:[#allocation7_spill] sm:$0xff] }
  0x87   :  { %v1854_v18 = vsub.f32 %v1822_v1, %v3207_v16  ;;  %v1793_v30 = vmul.f32 0.5, %v3864_v17  ;;  %v513_v38 = vadd.f32 %v3224_v22, %v3279_v47  ;;  %v2530_v11 = vclamps-f32 %v1852_v25, 3.0  ;;  %v5514_v1 = vld [vmem:[#allocation4_spill] sm:$0xff] }
  0x88   :  { %v2531_v53 = vclamps-f32 %v1853_v36, 3.0  ;;  %v1855_v26 = vsub.f32 %v1823_v20, %v3261_v39  ;;  %v1761_v9 = vmul.f32 -0.25, %v3869_v43  ;;  %v1824_v4 = vadd.f32 %v1792_v15, %v1760_v31  ;;  %v5515_v20 = vld [vmem:[#allocation23_spill] sm:$0xff] }
  0x89   :  { %v2532_v13 = vclamps-f32 %v1854_v18, 3.0  ;;  %v3879_v32 = vadd.f32 %v3281_v48, %v513_v38  ;;  %v3883_v16 = vadd.f32 %v3305_v0, %v3339_v27  ;;  %1948 = vst.msk [vmem:[%s5251_s1] sm:$0xff] %vm104_vm0, %v2530_v11  ;;  %v514_v47 = vadd.f32 %v3268_v42, %v3283_v49  ;;  %v5507_v49 = vld [vmem:[#allocation5_spill] sm:$0xff]  ;;  %v5518_v11 = vld [vmem:[#allocation8_spill] sm:$0xff] }
  0x8a   :  { %1949 = vst.msk [vmem:[%s5251_s1 + $0x8] sm:$0xff] %vm104_vm0, %v2531_v53  ;;  %v2533_v22 = vclamps-f32 %v1855_v26, 3.0  ;;  %v1825_v39 = vadd.f32 %v1793_v30, %v1761_v9  ;;  %v3897_v48 = vadd.f32 %v3324_v8, %v3381_v46  ;;  %v1856_v0 = vsub.f32 %v1824_v4, %v3263_v40  ;;  %v5508_v40 = vld [vmem:[#allocation21_spill] sm:$0xff]  ;;  %v5520_v26 = vld [vmem:[#allocation14_spill] sm:$0xff] }
  0x8b   :  { %1950 = vst.msk [vmem:[%s5251_s1 + $0x10] sm:$0xff] %vm104_vm0, %v2532_v13  ;;  %v1762_v10 = vmul.f32 -0.25, %v3879_v32  ;;  %v1794_v28 = vmul.f32 0.5, %v3883_v16  ;;  %v515_v14 = vadd.f32 %v5506_v60, %v3292_v55  ;;  %v3914_v8 = vadd.f32 %v5507_v49, %v514_v47  ;;  %v5516_v18 = vld [vmem:[#allocation17_spill] sm:$0xff]  ;;  %v5523_v47 = vld [vmem:[#allocation22_spill] sm:$0xff]  ;;  %v5527_v49 = vld [vmem:[#allocation15_spill] sm:$0xff] }
  0x8c   :  { %1951 = vst.msk [vmem:[%s5251_s1 + $0x18] sm:$0xff] %vm104_vm0, %v2533_v22  ;;  %v1857_v42 = vsub.f32 %v1825_v39, %v3300_v59  ;;  %v1795_v5 = vmul.f32 0.5, %v3897_v48  ;;  %v3919_v34 = vadd.f32 %v5509_v33, %v5508_v40  ;;  %v2534_v50 = vclamps-f32 %v1856_v0, 3.0  ;;  %v5521_v9 = vld [vmem:[#allocation9_spill] sm:$0xff] }
  0x8d   :  { %v1826_v41 = vadd.f32 %v1794_v28, %v1762_v10  ;;  %v3922_v55 = vadd.f32 %v5511_v24, %v515_v14  ;;  %v516_v15 = vadd.f32 %v5514_v1, %v5513_v54  ;;  %v1763_v59 = vmul.f32 -0.25, %v3914_v8  ;;  %v5522_v39 = vld [vmem:[#allocation25_spill] sm:$0xff]  ;;  %v5526_v10 = vld [vmem:[#allocation10_spill] sm:$0xff]  ;;  %v5531_v54 = vld [vmem:[#allocation40_spill] sm:$0xff] }
  0x8e   :  { %5510 = vst [vmem:[#allocation3_spill] sm:$0xff] %v3919_v34  ;;  %v2535_v25 = vclamps-f32 %v1857_v42, 3.0  ;;  %v1796_v36 = vmul.f32 0.5, %v3919_v34  ;;  %v3930_v31 = vadd.f32 %v5516_v18, %v5515_v20  ;;  %1952 = vst.msk [vmem:[%s5251_s1 + $0x20] sm:$0xff] %vm104_vm0, %v2534_v50  ;;  %v517_v13 = vadd.f32 %v5521_v9, %v5520_v26  ;;  %v5532_v1 = vld [vmem:[#allocation24_spill] sm:$0xff]  ;;  %v5535_v18 = vld [vmem:[#allocation11_spill] sm:$0xff] }
  0x8f   :  { %5512 = vst [vmem:[#allocation5_spill] sm:$0xff] %v3922_v55  ;;  %v1858_v30 = vsub.f32 %v1826_v41, %v3320_v7  ;;  %v1764_v38 = vmul.f32 -0.25, %v3922_v55  ;;  %v3939_v53 = vadd.f32 %v5518_v11, %v516_v15  ;;  %v1827_v4 = vadd.f32 %v1795_v5, %v1763_v59  ;;  %v5525_v7 = vld [vmem:[#allocation16_spill] sm:$0xff]  ;;  %v5529_v41 = vld [vmem:[#allocation18_spill] sm:$0xff]  ;;  %v5536_v9 = vld [vmem:[#allocation41_spill] sm:$0xff] }
  0x90   :  { %5517 = vst [vmem:[#allocation21_spill] sm:$0xff] %v3930_v31  ;;  %1953 = vst.msk [vmem:[%s5251_s1 + $0x28] sm:$0xff] %vm104_vm0, %v2535_v25  ;;  %v1797_v22 = vmul.f32 0.5, %v3930_v31  ;;  %v3950_v0 = vadd.f32 %v5523_v47, %v5522_v39  ;;  %v518_v28 = vadd.f32 %v5526_v10, %v5525_v7  ;;  %v3956_v33 = vadd.f32 %v5527_v49, %v517_v13  ;;  %v5537_v13 = vld [vmem:[#allocation34_spill] sm:$0xff]  ;;  %v4412_v55 = vld [vmem:[#allocation2 + $0x84] sm:$0xff] }
  0x91   :  { %5519 = vst [vmem:[#allocation12_spill] sm:$0xff] %v3939_v53  ;;  %v2536_v60 = vclamps-f32 %v1858_v30, 3.0  ;;  %v1828_v14 = vadd.f32 %v1796_v36, %v1764_v38  ;;  %v1765_v42 = vmul.f32 -0.25, %v3939_v53  ;;  %v1859_v50 = vsub.f32 %v1827_v4, %v3337_v21  ;;  %v5534_v21 = vld [vmem:[#allocation19_spill] sm:$0xff]  ;;  %v1056_v34 = vld [vmem:[#allocation2 + $0x32] sm:$0xff] }
  0x92   :  { %5524 = vst [vmem:[#allocation6_spill] sm:$0xff] %v3950_v0  ;;  %5528 = vst [vmem:[#allocation7_spill] sm:$0xff] %v3956_v33  ;;  %v1798_v5 = vmul.f32 0.5, %v3950_v0  ;;  %v3961_v24 = vadd.f32 %v5529_v41, %v518_v28  ;;  %v3965_v15 = vadd.f32 %v5532_v1, %v5531_v54  ;;  %v1766_v36 = vmul.f32 -0.25, %v3956_v33  ;;  %v5544_v41 = vld [vmem:[#allocation38_spill] sm:$0xff]  ;;  %v4389_v0 = vld [vmem:[#allocation2 + $0x6b] sm:$0xff] }
  0x93   :  { %1954 = vst.msk [vmem:[%s5251_s1 + $0x30] sm:$0xff] %vm104_vm0, %v2536_v60  ;;  %v1860_v25 = vsub.f32 %v1828_v14, %v3339_v27  ;;  %v1829_v59 = vadd.f32 %v1797_v22, %v1765_v42  ;;  %v519_v30 = vadd.f32 %v5535_v18, %v5534_v21  ;;  %v2537_v38 = vclamps-f32 %v1859_v50, 3.0  ;;  %v5539_v27 = vld [vmem:[#allocation20_spill] sm:$0xff]  ;;  %v5541_v14 = vld [vmem:[#allocation27_spill] sm:$0xff]  ;;  %v5542_v42 = vld [vmem:[#allocation13_spill] sm:$0xff] }
  0x94   :  { %5530 = vst [vmem:[#allocation4_spill] sm:$0xff] %v3961_v24  ;;  %5533 = vst [vmem:[#allocation23_spill] sm:$0xff] %v3965_v15  ;;  %v1767_v11 = vmul.f32 -0.25, %v3961_v24  ;;  %v1799_v26 = vmul.f32 0.5, %v3965_v15  ;;  %v3979_v4 = vadd.f32 %v5537_v13, %v5536_v9  ;;  %v1830_v10 = vadd.f32 %v1798_v5, %v1766_v36  ;;  %v5543_v50 = vld [vmem:[#allocation42_spill] sm:$0xff]  ;;  %v5551_v13 = vld [vmem:[#allocation39_spill] sm:$0xff] }
  0x95   :  { %v2538_v47 = vclamps-f32 %v1860_v25, 3.0  ;;  %v1861_v7 = vsub.f32 %v1829_v59, %v3381_v46  ;;  %v3983_v22 = vadd.f32 %v5539_v27, %v519_v30  ;;  %1955 = vst.msk [vmem:[%s5251_s1 + $0x38] sm:$0xff] %vm104_vm0, %v2537_v38  ;;  %v520_v49 = vadd.f32 %v5542_v42, %v5541_v14  ;;  %v5546_v59 = vld [vmem:[#allocation31_spill] sm:$0xff]  ;;  %v5547_v36 = vld [vmem:[#allocation26_spill] sm:$0xff]  ;;  %v5548_v30 = vld [vmem:[#allocation28_spill] sm:$0xff] }
  0x96   :  { %5538 = vst [vmem:[#allocation17_spill] sm:$0xff] %v3979_v4  ;;  %v1831_v28 = vadd.f32 %v1799_v26, %v1767_v11  ;;  %v1800_v60 = vmul.f32 0.5, %v3979_v4  ;;  %v3994_v1 = vadd.f32 %v5544_v41, %v5543_v50  ;;  %v1862_v5 = vsub.f32 %v1830_v10, %v5508_v40  ;;  %v5550_v26 = vld [vmem:[#allocation44_spill] sm:$0xff]  ;;  %v1280_v24 = vld [vmem:[#allocation2 + $0x31] sm:$0xff] }
  0x97   :  { %5540 = vst [vmem:[#allocation8_spill] sm:$0xff] %v3983_v22  ;;  %1956 = vst.msk [vmem:[%s5251_s1 + $0x40] sm:$0xff] %vm104_vm0, %v2538_v47  ;;  %v2539_v46 = vclamps-f32 %v1861_v7, 3.0  ;;  %v1768_v25 = vmul.f32 -0.25, %v3983_v22  ;;  %v521_v21 = vadd.f32 %v5547_v36, %v5546_v59  ;;  %v4006_v38 = vadd.f32 %v5548_v30, %v520_v49  ;;  %v5553_v7 = vld [vmem:[#allocation32_spill] sm:$0xff]  ;;  %v5558_v36 = vld [vmem:[#allocation50_spill] sm:$0xff] }
  0x98   :  { %5545 = vst [vmem:[#allocation14_spill] sm:$0xff] %v3994_v1  ;;  %v1863_v18 = vsub.f32 %v1831_v28, %v5515_v20  ;;  %v1801_v11 = vmul.f32 0.5, %v3994_v1  ;;  %v4011_v27 = vadd.f32 %v5551_v13, %v5550_v26  ;;  %v2540_v40 = vclamps-f32 %v1862_v5, 3.0  ;;  %v5555_v20 = vld [vmem:[#allocation33_spill] sm:$0xff]  ;;  %v5557_v59 = vld [vmem:[#allocation60_spill] sm:$0xff]  ;;  %v5560_v5 = vld [vmem:[#allocation35_spill] sm:$0xff] }
  0x99   :  { %5549 = vst [vmem:[#allocation9_spill] sm:$0xff] %v4006_v38  ;;  %1957 = vst.msk [vmem:[%s5251_s1 + $0x48] sm:$0xff] %vm104_vm0, %v2539_v46  ;;  %v1832_v47 = vadd.f32 %v1800_v60, %v1768_v25  ;;  %v4018_v10 = vadd.f32 %v5553_v7, %v521_v21  ;;  %v5556_v28 = vld [vmem:[#allocation29_spill] sm:$0xff]  ;;  %v1769_v49 = vmul.f32 -0.25, %v4006_v38  ;;  %v4026_v30 = vadd.f32 %v5558_v36, %v5557_v59  ;;  %v5562_v21 = vld [vmem:[#allocation36_spill] sm:$0xff] }
  0x9a   :  { %5552 = vst [vmem:[#allocation25_spill] sm:$0xff] %v4011_v27  ;;  %v522_v14 = vadd.f32 %v5556_v28, %v5555_v20  ;;  %v2541_v42 = vclamps-f32 %v1863_v18, 3.0  ;;  %v1802_v41 = vmul.f32 0.5, %v4011_v27  ;;  %1958 = vst.msk [vmem:[%s5251_s1 + $0x50] sm:$0xff] %vm104_vm0, %v2540_v40  ;;  %v5563_v18 = vld [vmem:[#allocation30_spill] sm:$0xff]  ;;  %v5564_v28 = vld [vmem:[#allocation61_spill] sm:$0xff] }
  0x9b   :  { %5554 = vst [vmem:[#allocation22_spill] sm:$0xff] %v4018_v10  ;;  %5559 = vst [vmem:[#allocation16_spill] sm:$0xff] %v4026_v30  ;;  %v1864_v60 = vsub.f32 %v1832_v47, %v5522_v39  ;;  %v1770_v46 = vmul.f32 -0.25, %v4018_v10  ;;  %v523_v13 = vadd.f32 %v5563_v18, %v5562_v21  ;;  %v1833_v7 = vadd.f32 %v1801_v11, %v1769_v49  ;;  %v5565_v40 = vld [vmem:[#allocation54_spill] sm:$0xff]  ;;  %v5567_v39 = vld [vmem:[#allocation48_spill] sm:$0xff] }
  0x9c   :  { %v4035_v25 = vadd.f32 %v5560_v5, %v522_v14  ;;  %1959 = vst.msk [vmem:[%s5251_s1 + $0x58] sm:$0xff] %vm104_vm0, %v2541_v42  ;;  %v1803_v20 = vmul.f32 0.5, %v4026_v30  ;;  %v4046_v36 = vadd.f32 %v5565_v40, %v5564_v28  ;;  %v5568_v47 = vld [vmem:[#allocation43_spill] sm:$0xff]  ;;  %v5569_v21 = vld [vmem:[#allocation37_spill] sm:$0xff]  ;;  %v5573_v30 = vld [vmem:[#allocation62_spill] sm:$0xff] }
  0x9d   :  { %v524_v27 = vadd.f32 %v5568_v47, %v5567_v39  ;;  %v2542_v14 = vclamps-f32 %v1864_v60, 3.0  ;;  %v1834_v5 = vadd.f32 %v1802_v41, %v1770_v46  ;;  %v4052_v18 = vadd.f32 %v5569_v21, %v523_v13  ;;  %v5571_v42 = vld [vmem:[#allocation49_spill] sm:$0xff]  ;;  %v5574_v40 = vld [vmem:[#allocation55_spill] sm:$0xff] }
  0x9e   :  { %5561 = vst [vmem:[#allocation10_spill] sm:$0xff] %v4035_v25  ;;  %5566 = vst [vmem:[#allocation15_spill] sm:$0xff] %v4046_v36  ;;  %v1771_v10 = vmul.f32 -0.25, %v4035_v25  ;;  %v1865_v1 = vsub.f32 %v1833_v7, %v5531_v54  ;;  %v1804_v11 = vmul.f32 0.5, %v4046_v36  ;;  %v4061_v38 = vadd.f32 %v5574_v40, %v5573_v30  ;;  %v5576_v54 = vld [vmem:[#allocation51_spill] sm:$0xff]  ;;  %v5577_v13 = vld [vmem:[#allocation45_spill] sm:$0xff] }
  0x9f   :  { %5570 = vst [vmem:[#allocation18_spill] sm:$0xff] %v4052_v18  ;;  %v4057_v49 = vadd.f32 %v5571_v42, %v524_v27  ;;  %1960 = vst.msk [vmem:[%s5251_s1 + $0x60] sm:$0xff] %vm104_vm0, %v2542_v14  ;;  %v1866_v41 = vsub.f32 %v1834_v5, %v5536_v9  ;;  %v1772_v46 = vmul.f32 -0.25, %v4052_v18  ;;  %v525_v7 = vadd.f32 %v5577_v13, %v5576_v54  ;;  %v5578_v21 = vld [vmem:[#allocation65_spill] sm:$0xff]  ;;  %v5579_v42 = vld [vmem:[#allocation59_spill] sm:$0xff] }
  0xa0   :  { %5575 = vst [vmem:[#allocation24_spill] sm:$0xff] %v4061_v38  ;;  %v1835_v60 = vadd.f32 %v1803_v20, %v1771_v10  ;;  %v2543_v39 = vclamps-f32 %v1865_v1, 3.0  ;;  %v1805_v47 = vmul.f32 0.5, %v4061_v38  ;;  %v4075_v40 = vadd.f32 %v5579_v42, %v5578_v21  ;;  %v5581_v9 = vld [vmem:[#allocation52_spill] sm:$0xff]  ;;  %v5583_v5 = vld [vmem:[#allocation53_spill] sm:$0xff]  ;;  %v5584_v54 = vld [vmem:[#allocation46_spill] sm:$0xff] }
  0xa1   :  { %5572 = vst [vmem:[#allocation40_spill] sm:$0xff] %v4057_v49  ;;  %v1773_v27 = vmul.f32 -0.25, %v4057_v49  ;;  %v2544_v36 = vclamps-f32 %v1866_v41, 3.0  ;;  %v1836_v25 = vadd.f32 %v1804_v11, %v1772_v46  ;;  %v4079_v10 = vadd.f32 %v5581_v9, %v525_v7  ;;  %v5585_v42 = vld [vmem:[#allocation80_spill] sm:$0xff]  ;;  %v5586_v38 = vld [vmem:[#allocation70_spill] sm:$0xff]  ;;  %v5588_v46 = vld [vmem:[#allocation57_spill] sm:$0xff] }
  0xa2   :  { %5580 = vst [vmem:[#allocation19_spill] sm:$0xff] %v4075_v40  ;;  %v1867_v14 = vsub.f32 %v1835_v60, %v5543_v50  ;;  %1961 = vst.msk [vmem:[%s5251_s1 + $0x68] sm:$0xff] %vm104_vm0, %v2543_v39  ;;  %v1806_v20 = vmul.f32 0.5, %v4075_v40  ;;  %v526_v13 = vadd.f32 %v5584_v54, %v5583_v5  ;;  %v4090_v41 = vadd.f32 %v5586_v38, %v5585_v42  ;;  %v5589_v7 = vld [vmem:[#allocation47_spill] sm:$0xff]  ;;  %v5592_v5 = vld [vmem:[#allocation81_spill] sm:$0xff] }
  0xa3   :  { %5582 = vst [vmem:[#allocation11_spill] sm:$0xff] %v4079_v10  ;;  %v1837_v1 = vadd.f32 %v1805_v47, %v1773_v27  ;;  %1962 = vst.msk [vmem:[%s5251_s1 + $0x70] sm:$0xff] %vm104_vm0, %v2544_v36  ;;  %v1868_v11 = vsub.f32 %v1836_v25, %v5550_v26  ;;  %v1774_v60 = vmul.f32 -0.25, %v4079_v10  ;;  %v527_v39 = vadd.f32 %v5589_v7, %v5588_v46  ;;  %v5590_v47 = vld [vmem:[#allocation56_spill] sm:$0xff]  ;;  %v5593_v54 = vld [vmem:[#allocation74_spill] sm:$0xff] }
  0xa4   :  { %5587 = vst [vmem:[#allocation41_spill] sm:$0xff] %v4090_v41  ;;  %v2545_v50 = vclamps-f32 %v1867_v14, 3.0  ;;  %v4102_v9 = vadd.f32 %v5590_v47, %v526_v13  ;;  %v1807_v38 = vmul.f32 0.5, %v4090_v41  ;;  %v4107_v40 = vadd.f32 %v5593_v54, %v5592_v5  ;;  %v5595_v36 = vld [vmem:[#allocation58_spill] sm:$0xff]  ;;  %v5600_v41 = vld [vmem:[#allocation75_spill] sm:$0xff]  ;;  %v4370_v18 = vld [vmem:[#allocation2 + $0x6a] sm:$0xff] }
  0xa5   :  { %v1869_v27 = vsub.f32 %v1837_v1, %v5557_v59  ;;  %v2546_v26 = vclamps-f32 %v1868_v11, 3.0  ;;  %v1838_v25 = vadd.f32 %v1806_v20, %v1774_v60  ;;  %v4114_v14 = vadd.f32 %v5595_v36, %v527_v39  ;;  %v5597_v59 = vld [vmem:[#allocation68_spill] sm:$0xff]  ;;  %v5598_v1 = vld [vmem:[#allocation63_spill] sm:$0xff]  ;;  %v5599_v54 = vld [vmem:[#allocation82_spill] sm:$0xff] }
  0xa6   :  { %5591 = vst [vmem:[#allocation34_spill] sm:$0xff] %v4102_v9  ;;  %5594 = vst [vmem:[#allocation20_spill] sm:$0xff] %v4107_v40  ;;  %v528_v13 = vadd.f32 %v5598_v1, %v5597_v59  ;;  %v1775_v7 = vmul.f32 -0.25, %v4102_v9  ;;  %v1808_v47 = vmul.f32 0.5, %v4107_v40  ;;  %v4122_v10 = vadd.f32 %v5600_v41, %v5599_v54  ;;  %v5602_v11 = vld [vmem:[#allocation69_spill] sm:$0xff]  ;;  %v5604_v39 = vld [vmem:[#allocation71_spill] sm:$0xff] }
  0xa7   :  { %1963 = vst.msk [vmem:[%s5251_s1 + $0x78] sm:$0xff] %vm104_vm0, %v2545_v50  ;;  %5596 = vst [vmem:[#allocation27_spill] sm:$0xff] %v4114_v14  ;;  %v2547_v46 = vclamps-f32 %v1869_v27, 3.0  ;;  %v1870_v20 = vsub.f32 %v1838_v25, %v5564_v28  ;;  %v1776_v50 = vmul.f32 -0.25, %v4114_v14  ;;  %v5605_v27 = vld [vmem:[#allocation64_spill] sm:$0xff]  ;;  %v5606_v1 = vld [vmem:[#allocation85_spill] sm:$0xff] }
  0xa8   :  { %5601 = vst [vmem:[#allocation13_spill] sm:$0xff] %v4122_v10  ;;  %1964 = vst.msk [vmem:[%s5251_s1 + $0x80] sm:$0xff] %vm104_vm0, %v2546_v26  ;;  %v4131_v60 = vadd.f32 %v5602_v11, %v528_v13  ;;  %v529_v36 = vadd.f32 %v5605_v27, %v5604_v39  ;;  %v1839_v41 = vadd.f32 %v1807_v38, %v1775_v7  ;;  %v1809_v59 = vmul.f32 0.5, %v4122_v10  ;;  %v5607_v26 = vld [vmem:[#allocation79_spill] sm:$0xff]  ;;  %v5609_v28 = vld [vmem:[#allocation73_spill] sm:$0xff] }
  0xa9   :  { %1965 = vst.msk [vmem:[%s5251_s1 + $0x88] sm:$0xff] %vm104_vm0, %v2547_v46  ;;  %v4142_v40 = vadd.f32 %v5607_v26, %v5606_v1  ;;  %v5610_v25 = vld [vmem:[#allocation66_spill] sm:$0xff]  ;;  %v2548_v13 = vclamps-f32 %v1870_v20, 3.0  ;;  %v1840_v11 = vadd.f32 %v1808_v47, %v1776_v50  ;;  %v5611_v39 = vld [vmem:[#allocation72_spill] sm:$0xff] }
  0xaa   :  { %5603 = vst [vmem:[#allocation42_spill] sm:$0xff] %v4131_v60  ;;  %v530_v14 = vadd.f32 %v5610_v25, %v5609_v28  ;;  %v1777_v9 = vmul.f32 -0.25, %v4131_v60  ;;  %v4148_v27 = vadd.f32 %v5611_v39, %v529_v36  ;;  %v1871_v49 = vsub.f32 %v1839_v41, %v5573_v30  ;;  %v5613_v46 = vld [vmem:[#allocation76_spill] sm:$0xff]  ;;  %v5615_v26 = vld [vmem:[#allocation90_spill] sm:$0xff]  ;;  %v5617_v30 = vld [vmem:[#allocation77_spill] sm:$0xff] }
  0xab   :  { %5608 = vst [vmem:[#allocation38_spill] sm:$0xff] %v4142_v40  ;;  %v1810_v38 = vmul.f32 0.5, %v4142_v40  ;;  %v4157_v10 = vadd.f32 %v5615_v26, %v3705_v29  ;;  %1966 = vst.msk [vmem:[%s5251_s1 + $0x90] sm:$0xff] %vm104_vm0, %v2548_v13  ;;  %v1872_v47 = vsub.f32 %v1840_v11, %v5578_v21  ;;  %v5618_v36 = vld [vmem:[#allocation67_spill] sm:$0xff]  ;;  %v5619_v39 = vld [vmem:[#allocation94_spill] sm:$0xff] }
  0xac   :  { %5612 = vst [vmem:[#allocation31_spill] sm:$0xff] %v4148_v27  ;;  %v4153_v7 = vadd.f32 %v5613_v46, %v530_v14  ;;  %v1841_v20 = vadd.f32 %v1809_v59, %v1777_v9  ;;  %v1778_v50 = vmul.f32 -0.25, %v4148_v27  ;;  %v531_v41 = vadd.f32 %v5618_v36, %v5617_v30  ;;  %v5621_v21 = vld [vmem:[#allocation78_spill] sm:$0xff]  ;;  %v5623_v11 = vld [vmem:[#allocation88_spill] sm:$0xff]  ;;  %v5624_v30 = vld [vmem:[#allocation83_spill] sm:$0xff] }
  0xad   :  { %5616 = vst [vmem:[#allocation28_spill] sm:$0xff] %v4157_v10  ;;  %v2549_v28 = vclamps-f32 %v1871_v49, 3.0  ;;  %v1811_v25 = vmul.f32 0.5, %v4157_v10  ;;  %v4171_v46 = vadd.f32 %v5619_v39, %v3707_v37  ;;  %v2550_v26 = vclamps-f32 %v1872_v47, 3.0  ;;  %v5625_v39 = vld [vmem:[#allocation95_spill] sm:$0xff]  ;;  %v4341_v10 = vld [vmem:[#allocation2 + $0x78] sm:$0xff] }
  0xae   :  { %5614 = vst [vmem:[#allocation26_spill] sm:$0xff] %v4153_v7  ;;  %v1779_v14 = vmul.f32 -0.25, %v4153_v7  ;;  %v1873_v13 = vsub.f32 %v1841_v20, %v5585_v42  ;;  %v1842_v40 = vadd.f32 %v1810_v38, %v1778_v50  ;;  %v4175_v9 = vadd.f32 %v5621_v21, %v531_v41  ;;  %v5627_v50 = vld [vmem:[#allocation91_spill] sm:$0xff]  ;;  %v5628_v41 = vld [vmem:[#allocation84_spill] sm:$0xff]  ;;  %v4363_v60 = vld [vmem:[#allocation2 + $0x54] sm:$0xff] }
  0xaf   :  { %5620 = vst [vmem:[#allocation44_spill] sm:$0xff] %v4171_v46  ;;  %1967 = vst.msk [vmem:[%s5251_s1 + $0x98] sm:$0xff] %vm104_vm0, %v2549_v28  ;;  %v1812_v59 = vmul.f32 0.5, %v4171_v46  ;;  %v532_v36 = vadd.f32 %v5624_v30, %v5623_v11  ;;  %v4186_v47 = vadd.f32 %v5625_v39, %v3723_v51  ;;  %v533_v28 = vadd.f32 %v5628_v41, %v5627_v50  ;;  %v5631_v30 = vld [vmem:[#allocation102_spill] sm:$0xff]  ;;  %v5632_v39 = vld [vmem:[#allocation99_spill] sm:$0xff] }
  0xb0   :  { %5622 = vst [vmem:[#allocation39_spill] sm:$0xff] %v4175_v9  ;;  %v1843_v49 = vadd.f32 %v1811_v25, %v1779_v14  ;;  %1968 = vst.msk [vmem:[%s5251_s1 + $0xa0] sm:$0xff] %vm104_vm0, %v2550_v26  ;;  %v2551_v42 = vclamps-f32 %v1873_v13, 3.0  ;;  %v1874_v38 = vsub.f32 %v1842_v40, %v5592_v5  ;;  %v1780_v20 = vmul.f32 -0.25, %v4175_v9  ;;  %v5629_v25 = vld [vmem:[#allocation89_spill] sm:$0xff]  ;;  %v5634_v26 = vld [vmem:[#allocation92_spill] sm:$0xff] }
  0xb1   :  { %5626 = vst [vmem:[#allocation32_spill] sm:$0xff] %v4186_v47  ;;  %v4198_v21 = vadd.f32 %v5629_v25, %v532_v36  ;;  %v1813_v11 = vmul.f32 0.5, %v4186_v47  ;;  %v4203_v46 = vadd.f32 %v5632_v39, %v5631_v30  ;;  %v4210_v13 = vadd.f32 %v5634_v26, %v533_v28  ;;  %v5638_v39 = vld [vmem:[#allocation104_spill] sm:$0xff]  ;;  %v5642_v28 = vld [vmem:[#allocation97_spill] sm:$0xff] }
  0xb2   :  { %v1875_v14 = vsub.f32 %v1843_v49, %v5599_v54  ;;  %1969 = vst.msk [vmem:[%s5251_s1 + $0xa8] sm:$0xff] %vm104_vm0, %v2551_v42  ;;  %v2552_v40 = vclamps-f32 %v1874_v38, 3.0  ;;  %v1844_v5 = vadd.f32 %v1812_v59, %v1780_v20  ;;  %v5636_v54 = vld [vmem:[#allocation93_spill] sm:$0xff]  ;;  %v5637_v49 = vld [vmem:[#allocation86_spill] sm:$0xff]  ;;  %v4218_v47 = vadd.f32 %v5638_v39, %v3761_v35  ;;  %v5640_v38 = vld [vmem:[#allocation96_spill] sm:$0xff] }
  0xb3   :  { %5630 = vst [vmem:[#allocation33_spill] sm:$0xff] %v4198_v21  ;;  %5633 = vst [vmem:[#allocation29_spill] sm:$0xff] %v4203_v46  ;;  %v534_v36 = vadd.f32 %v5637_v49, %v5636_v54  ;;  %v1781_v41 = vmul.f32 -0.25, %v4198_v21  ;;  %v1814_v25 = vmul.f32 0.5, %v4203_v46  ;;  %v1782_v42 = vmul.f32 -0.25, %v4210_v13  ;;  %v793_v21 = vld [vmem:[#allocation2 + $0x1b2] sm:$0xff] }
  0xb4   :  { %5635 = vst [vmem:[#allocation60_spill] sm:$0xff] %v4210_v13  ;;  %v2553_v50 = vclamps-f32 %v1875_v14, 3.0  ;;  %5639 = vst [vmem:[#allocation50_spill] sm:$0xff] %v4218_v47  ;;  %v1876_v59 = vsub.f32 %v1844_v5, %v5606_v1  ;;  %v5643_v14 = vld [vmem:[#allocation87_spill] sm:$0xff]  ;;  %v1815_v49 = vmul.f32 0.5, %v4218_v47  ;;  %v5646_v1 = vld [vmem:[#allocation100_spill] sm:$0xff] }
  0xb5   :  { %1970 = vst.msk [vmem:[%s5251_s1 + $0xb0] sm:$0xff] %vm104_vm0, %v2552_v40  ;;  %v4227_v20 = vadd.f32 %v5640_v38, %v534_v36  ;;  %v535_v26 = vadd.f32 %v5643_v14, %v5642_v28  ;;  %v1845_v54 = vadd.f32 %v1813_v11, %v1781_v41  ;;  %v5644_v40 = vld [vmem:[#allocation105_spill] sm:$0xff]  ;;  %v536_v5 = vadd.f32 %v5646_v1, %v3733_v12  ;;  %v5647_v14 = vld [vmem:[#allocation98_spill] sm:$0xff]  ;;  %v859_v9 = vld [vmem:[#allocation2 + $0x4] sm:$0xff] }
  0xb6   :  { %1971 = vst.msk [vmem:[%s5251_s1 + $0xb8] sm:$0xff] %vm104_vm0, %v2553_v50  ;;  %v4238_v39 = vadd.f32 %v5644_v40, %v3779_v2  ;;  %v505_v36 = vld [vmem:[#allocation2 + $0x1b1] sm:$0xff]  ;;  %v2554_v38 = vclamps-f32 %v1876_v59, 3.0  ;;  %v1846_v46 = vadd.f32 %v1814_v25, %v1782_v42  ;;  %v4348_v7 = vld [vmem:[#allocation2 + $0x61] sm:$0xff]  ;;  %v4378_v22 = vld [vmem:[#allocation2 + $0x69] sm:$0xff] }
  0xb7   :  { %5641 = vst [vmem:[#allocation35_spill] sm:$0xff] %v4227_v20  ;;  %v1783_v28 = vmul.f32 -0.25, %v4227_v20  ;;  %v4244_v13 = vadd.f32 %v5647_v14, %v535_v26  ;;  %v1877_v11 = vsub.f32 %v1845_v54, %v3705_v29  ;;  %v4249_v41 = vadd.f32 %v3741_v6, %v536_v5  ;;  %v5650_v40 = vld [vmem:[#allocation106_spill] sm:$0xff]  ;;  %v5652_v42 = vld [vmem:[#allocation101_spill] sm:$0xff]  ;;  %v827_v20 = vld [vmem:[#allocation2] sm:$0xff] }
  0xb8   :  { %5645 = vst [vmem:[#allocation36_spill] sm:$0xff] %v4238_v39  ;;  %v1816_v50 = vmul.f32 0.5, %v4238_v39  ;;  %v4253_v47 = vadd.f32 %v5650_v40, %v3793_v19  ;;  %v569_v12 = vld [vmem:[#allocation2 + $0x1b3] sm:$0xff]  ;;  %1972 = vst.msk [vmem:[%s5251_s1 + $0xc0] sm:$0xff] %vm104_vm0, %v2554_v38  ;;  %v1878_v25 = vsub.f32 %v1846_v46, %v3707_v37  ;;  %v537_v26 = vadd.f32 %v5652_v42, %v505_v36  ;;  %v5653_v40 = vld [vmem:[#allocation107_spill] sm:$0xff] }
  0xb9   :  { %5648 = vst [vmem:[#allocation30_spill] sm:$0xff] %v4244_v13  ;;  %5649 = vst [vmem:[#allocation61_spill] sm:$0xff] %v4249_v41  ;;  %v1847_v59 = vadd.f32 %v1815_v49, %v1783_v28  ;;  %v1784_v29 = vmul.f32 -0.25, %v4244_v13  ;;  %v506_v54 = vld [vmem:[#allocation2 + $0x1b9] sm:$0xff]  ;;  %v2555_v1 = vclamps-f32 %v1877_v11, 3.0  ;;  %v1785_v5 = vmul.f32 -0.25, %v4249_v41 }
  0xba   :  { %5651 = vst [vmem:[#allocation54_spill] sm:$0xff] %v4253_v47  ;;  %v794_v6 = vld [vmem:[#allocation2 + $0x1ba] sm:$0xff]  ;;  %v1817_v14 = vmul.f32 0.5, %v4253_v47  ;;  %v4265_v39 = vadd.f32 %v793_v21, %v5653_v40  ;;  %v2556_v38 = vclamps-f32 %v1878_v25, 3.0  ;;  %v4268_v49 = vadd.f32 %v569_v12, %v537_v26  ;;  %v1308_v47 = vld [vmem:[#allocation2 + $0x3] sm:$0xff]  ;;  %v4285_v26 = vld [vmem:[#allocation2 + $0x30] sm:$0xff] }
  0xbb   :  { %v1879_v37 = vsub.f32 %v1847_v59, %v3723_v51  ;;  %v1848_v46 = vadd.f32 %v1816_v50, %v1784_v29  ;;  %v570_v28 = vld [vmem:[#allocation2 + $0x1bb] sm:$0xff]  ;;  %1973 = vst.msk [vmem:[%s5251_s1 + $0xc8] sm:$0xff] %vm104_vm0, %v2555_v1  ;;  %v4277_v40 = vadd.f32 %v794_v6, %v3787_v3  ;;  %v891_v59 = vadd.f32 %v859_v9, %v827_v20  ;;  %v828_v20 = vld [vmem:[#allocation2 + $0x8] sm:$0xff] }
  0xbc   :  { %5654 = vst [vmem:[#allocation48_spill] sm:$0xff] %v4265_v39  ;;  %5655 = vst [vmem:[#allocation43_spill] sm:$0xff] %v4268_v49  ;;  %v1849_v36 = vadd.f32 %v1817_v14, %v1785_v5  ;;  %v1818_v11 = vmul.f32 0.5, %v4265_v39  ;;  %v5656_v42 = vld [vmem:[#allocation103_spill] sm:$0xff]  ;;  %v1786_v12 = vmul.f32 -0.25, %v4268_v49  ;;  %v1372_v5 = vld [vmem:[#allocation2 + $0x18] sm:$0xff] }
  0xbd   :  { %v538_v21 = vadd.f32 %v5656_v42, %v506_v54  ;;  %5657 = vst [vmem:[#allocation37_spill] sm:$0xff] %v4277_v40  ;;  %v1276_v25 = vld [vmem:[#allocation2 + $0x1] sm:$0xff]  ;;  %1974 = vst.msk [vmem:[%s5251_s1 + $0xd0] sm:$0xff] %vm104_vm0, %v2556_v38  ;;  %v2557_v51 = vclamps-f32 %v1879_v37, 3.0  ;;  %v1880_v50 = vsub.f32 %v1848_v46, %v5631_v30  ;;  %v1819_v6 = vmul.f32 0.5, %v4277_v40  ;;  %v860_v38 = vld [vmem:[#allocation2 + $0xc] sm:$0xff] }
  0xbe   :  { %v1052_v29 = vld [vmem:[#allocation2 + $0x2] sm:$0xff]  ;;  %v1881_v54 = vsub.f32 %v1849_v36, %v3761_v35  ;;  %v1850_v14 = vadd.f32 %v1818_v11, %v1786_v12  ;;  %v1340_v9 = vadd.f32 %v1308_v47, %v1276_v25  ;;  %v1309_v42 = vld [vmem:[#allocation2 + $0xb] sm:$0xff] }
  0xbf   :  { %v4288_v3 = vadd.f32 %v570_v28, %v538_v21  ;;  %v4291_v1 = vld [vmem:[#allocation2 + $0x60] sm:$0xff]  ;;  %1975 = vst.msk [vmem:[%s5251_s1 + $0xd8] sm:$0xff] %vm104_vm0, %v2557_v51  ;;  %v2558_v30 = vclamps-f32 %v1880_v50, 3.0  ;;  %v1116_v46 = vadd.f32 %v4285_v26, %v1052_v29  ;;  %v1277_v36 = vld [vmem:[#allocation2 + $0x9] sm:$0xff]  ;;  %v4305_v51 = vld [vmem:[#allocation2 + $0x38] sm:$0xff]  ;;  %v892_v29 = vadd.f32 %v860_v38, %v828_v20 }
  0xc0   :  { %v2559_v37 = vclamps-f32 %v1881_v54, 3.0  ;;  %v1436_v28 = vld [vmem:[#allocation2 + $0x1c] sm:$0xff]  ;;  %v1882_v21 = vsub.f32 %v1850_v14, %v3779_v2  ;;  %v956_v11 = vadd.f32 %v4291_v1, %v891_v59  ;;  %v1404_v47 = vadd.f32 %v1372_v5, %v1340_v9  ;;  %v1053_v25 = vld [vmem:[#allocation2 + $0xa] sm:$0xff]  ;;  %v4315_v2 = vld [vmem:[#allocation2 + $0x34] sm:$0xff] }
  0xc1   :  { %5658 = vst [vmem:[#allocation49_spill] sm:$0xff] %v4288_v3  ;;  %v1787_v35 = vmul.f32 -0.25, %v4288_v3  ;;  %1976 = vst.msk [vmem:[%s5251_s1 + $0xe0] sm:$0xff] %vm104_vm0, %v2558_v30  ;;  %v4311_v12 = vld [vmem:[#allocation2 + $0x48] sm:$0xff]  ;;  %v1373_v54 = vld [vmem:[#allocation2 + $0x20] sm:$0xff]  ;;  %v1341_v9 = vadd.f32 %v1309_v42, %v1277_v36  ;;  %v1180_v39 = vadd.f32 %v4315_v2, %v1116_v46  ;;  %v893_v41 = vadd.f32 %v1436_v28, %v1372_v5 }
  0xc2   :  { %1977 = vst.msk [vmem:[%s5251_s1 + $0xe8] sm:$0xff] %vm104_vm0, %v2559_v37  ;;  %v2560_v40 = vclamps-f32 %v1882_v21, 3.0  ;;  %v4313_v30 = vld [vmem:[#allocation2 + $0x64] sm:$0xff]  ;;  %v1468_v59 = vadd.f32 %v1436_v28, %v1404_v47  ;;  %v1117_v37 = vadd.f32 %v4305_v51, %v1053_v25  ;;  %v1310_v49 = vld [vmem:[#allocation2 + $0x1b] sm:$0xff]  ;;  %v4330_v46 = vld [vmem:[#allocation2 + $0x4c] sm:$0xff] }
  0xc3   :  { %v1851_v50 = vadd.f32 %v1819_v6, %v1787_v35  ;;  %v4317_v14 = vld [vmem:[#allocation2 + $0x68] sm:$0xff]  ;;  %v1278_v35 = vld [vmem:[#allocation2 + $0x19] sm:$0xff]  ;;  %v1020_v20 = vadd.f32 %v4313_v30, %v956_v11  ;;  %v1405_v42 = vadd.f32 %v1373_v54, %v1341_v9  ;;  %v4339_v11 = vmul.f32 -0.5, %v3814_v56 }
  0xc4   :  { %v1437_v6 = vld [vmem:[#allocation2 + $0x24] sm:$0xff]  ;;  %1978 = vst.msk [vmem:[%s5251_s1 + $0xf0] sm:$0xff] %vm104_vm0, %v2560_v40  ;;  %v1532_v36 = vadd.f32 %v4311_v12, %v1468_v59  ;;  %v957_v47 = vadd.f32 %v4317_v14, %v892_v29  ;;  %v4333_v25 = vld [vmem:[#allocation2 + $0x3c] sm:$0xff]  ;;  %v1342_v59 = vadd.f32 %v1310_v49, %v1278_v35  ;;  %v4351_v5 = vmul.f32 0.6666667, %v3783_v45 }
  0xc5   :  { %v1883_v3 = vsub.f32 %v1851_v50, %v3793_v19  ;;  %v4327_v38 = vld [vmem:[#allocation2 + $0x62] sm:$0xff]  ;;  %v1054_v19 = vld [vmem:[#allocation2 + $0x1a] sm:$0xff]  ;;  %v4335_v50 = vld [vmem:[#allocation2 + $0x50] sm:$0xff]  ;;  %v1469_v13 = vadd.f32 %v1437_v6, %v1405_v42  ;;  %v1181_v56 = vadd.f32 %v4333_v25, %v1117_v37  ;;  %v1980_v35 = vmul.f32 -0.083333336, %v1020_v20 }
  0xc6   :  { %v1596_v40 = vadd.f32 %v4330_v46, %v1532_v36  ;;  %v1279_v9 = vld [vmem:[#allocation2 + $0x21] sm:$0xff]  ;;  %v1244_v29 = vadd.f32 %v4327_v38, %v1180_v39  ;;  %v1118_v28 = vadd.f32 %v4311_v12, %v1054_v19  ;;  %v4356_v36 = vld [vmem:[#allocation2 + $0x6c] sm:$0xff]  ;;  %v4366_v45 = vmul.f32 -0.5, %v3817_v62 }
  0xc7   :  { %v2561_v21 = vclamps-f32 %v1883_v3, 3.0  ;;  %v1311_v3 = vld [vmem:[#allocation2 + $0x23] sm:$0xff]  ;;  %v1533_v42 = vadd.f32 %v4335_v50, %v1469_v13  ;;  %v1021_v39 = vadd.f32 %v4356_v36, %v957_v47  ;;  %v958_v37 = vadd.f32 %v4341_v10, %v893_v41 }
  0xc8   :  { %v1660_v49 = vadd.f32 %v4348_v7, %v1596_v40  ;;  %v4360_v27 = vld [vmem:[#allocation2 + $0x63] sm:$0xff]  ;;  %v1343_v40 = vadd.f32 %v1311_v3, %v1279_v9  ;;  %v1245_v4 = vadd.f32 %v4370_v18, %v1181_v56  ;;  %v1182_v41 = vadd.f32 %v4330_v46, %v1118_v28  ;;  %v1312_v56 = vld [vmem:[#allocation2 + $0x33] sm:$0xff] }
  0xc9   :  { %1979 = vst.msk [vmem:[%s5251_s1 + $0xf8] sm:$0xff] %vm104_vm0, %v2561_v21  ;;  %v1406_v21 = vadd.f32 %v1342_v59, %v4285_v26  ;;  %v1055_v19 = vld [vmem:[#allocation2 + $0x22] sm:$0xff]  ;;  %v1597_v13 = vadd.f32 %v4363_v60, %v1533_v42  ;;  %v4374_v59 = vmul.f32 0.6666667, %v3805_v44  ;;  %v894_v9 = vadd.f32 %v1437_v6, %v1373_v54 }
  0xca   :  { %v1724_v20 = vadd.f32 %v4360_v27, %v1660_v49  ;;  %v4380_v62 = vld [vmem:[#allocation2 + $0x7c] sm:$0xff]  ;;  %v1407_v3 = vadd.f32 %v1343_v40, %v4305_v51  ;;  %v1981_v33 = vmul.f32 -0.083333336, %v1021_v39  ;;  %v4393_v54 = vmul.f32 -0.5, %v3831_v61 }
  0xcb   :  { %v1470_v47 = vadd.f32 %v1406_v21, %v4315_v2  ;;  %v1661_v15 = vadd.f32 %v4378_v22, %v1597_v13  ;;  %v4386_v44 = vld [vmem:[#allocation2 + $0x80] sm:$0xff]  ;;  %v1119_v21 = vadd.f32 %v4335_v50, %v1055_v19  ;;  %v1022_v31 = vadd.f32 %v4380_v62, %v958_v37 }
  0xcc   :  { %v2012_v49 = vsub.f32 %v1724_v20, %v1244_v29  ;;  %v1471_v6 = vadd.f32 %v1407_v3, %v4333_v25  ;;  %v4397_v40 = vld [vmem:[#allocation2 + $0x7a] sm:$0xff]  ;;  %v4401_v19 = vmul.f32 0.6666667, %v3821_v57  ;;  %v959_v37 = vadd.f32 %v4386_v44, %v894_v9 }
  0xcd   :  { %v1534_v42 = vadd.f32 %v1470_v47, %v4291_v1  ;;  %v1725_v28 = vadd.f32 %v4389_v0, %v1661_v15  ;;  %5659 = vst [vmem:[#allocation62_spill] sm:$0xff] %v4397_v40  ;;  %v1246_v13 = vadd.f32 %v4397_v40, %v1182_v41  ;;  %v4404_v39 = vld [vmem:[#allocation2 + $0x79] sm:$0xff]  ;;  %v1344_v47 = vadd.f32 %v1312_v56, %v1280_v24  ;;  %v4420_v56 = vld [vmem:[#allocation2 + $0x81] sm:$0xff] }
  0xce   :  { %v2044_v29 = vmul.f32 0.16666667, %v2012_v49  ;;  %v1535_v61 = vadd.f32 %v1471_v6, %v4317_v14  ;;  %v1183_v53 = vadd.f32 %v4363_v60, %v1119_v21  ;;  %v1982_v57 = vmul.f32 -0.083333336, %v1022_v31  ;;  %5661 = vst [vmem:[#allocation51_spill] sm:$0xff] %v4420_v56  ;;  %v1313_v31 = vld [vmem:[#allocation2 + $0x3b] sm:$0xff] }
  0xcf   :  { %v1598_v20 = vadd.f32 %v1534_v42, %v4313_v30  ;;  %v2013_v49 = vsub.f32 %v1725_v28, %v1245_v4  ;;  %v4410_v42 = vld [vmem:[#allocation2 + $0x7b] sm:$0xff]  ;;  %v895_v9 = vadd.f32 %v4315_v2, %v4285_v26  ;;  %v1408_v6 = vadd.f32 %v4311_v12, %v1344_v47 }
  0xd0   :  { %v2076_v3 = vadd.f32 %v2044_v29, %v1980_v35  ;;  %5660 = vst [vmem:[#allocation55_spill] sm:$0xff] %v4410_v42  ;;  %v1599_v41 = vadd.f32 %v1535_v61, %v4356_v36  ;;  %v2111_v21 = vmul.f32 -0.5, %v3841_v23  ;;  %v1281_v29 = vld [vmem:[#allocation2 + $0x39] sm:$0xff]  ;;  %v1023_v28 = vadd.f32 %v4412_v55, %v959_v37  ;;  %v4433_v23 = vld [vmem:[#allocation2 + $0x90] sm:$0xff] }
  0xd1   :  { %v1662_v15 = vadd.f32 %v4404_v39, %v1598_v20  ;;  %v2045_v4 = vmul.f32 0.16666667, %v2013_v49  ;;  %v4424_v20 = vld [vmem:[#allocation2 + $0x82] sm:$0xff]  ;;  %v1120_v26 = vadd.f32 %v1056_v34, %v4291_v1  ;;  %v1472_v2 = vadd.f32 %v4330_v46, %v1408_v6 }
  0xd2   :  { %v2140_v24 = vadd.f32 %v4339_v11, %v2076_v3  ;;  %v1663_v61 = vadd.f32 %v4420_v56, %v1599_v41  ;;  %v1247_v49 = vadd.f32 %v4424_v20, %v1183_v53  ;;  %v960_v40 = vadd.f32 %v4433_v23, %v895_v9  ;;  %v1057_v56 = vld [vmem:[#allocation2 + $0x3a] sm:$0xff] }
  0xd3   :  { %v1726_v35 = vadd.f32 %v4410_v42, %v1662_v15  ;;  %v2077_v47 = vadd.f32 %v2045_v4, %v1981_v33  ;;  %v4431_v15 = vld [vmem:[#allocation2 + $0x83] sm:$0xff]  ;;  %v1536_v41 = vadd.f32 %v1472_v2, %v4341_v10  ;;  %v1345_v34 = vadd.f32 %v1313_v31, %v1281_v29  ;;  %v2691_v42 = vld [vmem:[#allocation2 + $0x32] sm:$0xff] }
  0xd4   :  { %v2204_v11 = vadd.f32 %v4351_v5, %v2140_v24  ;;  %v1727_v37 = vadd.f32 %v4431_v15, %v1663_v61  ;;  %v896_v53 = vadd.f32 %v4333_v25, %v4305_v51  ;;  %v1184_v24 = vadd.f32 %v1120_v26, %v4313_v30  ;;  %v4445_v29 = vld [vmem:[#allocation2 + $0x94] sm:$0xff] }
  0xd5   :  { %v2014_v3 = vsub.f32 %v1726_v35, %v1246_v13  ;;  %v2141_v5 = vadd.f32 %v4366_v45, %v2077_v47  ;;  %v1600_v4 = vadd.f32 %v1536_v41, %v4380_v62  ;;  %v1409_v35 = vadd.f32 %v4335_v50, %v1345_v34  ;;  %v4450_v51 = vld [vmem:[#allocation2 + $0x92] sm:$0xff] }
  0xd6   :  { %v2236_v6 = vsub.f32 %v2204_v11, %v2691_v42  ;;  %v2015_v13 = vsub.f32 %v1727_v37, %v1247_v49  ;;  %v4447_v42 = vld [vmem:[#allocation2 + $0x91] sm:$0xff]  ;;  %v1121_v45 = vadd.f32 %v1057_v56, %v4317_v14  ;;  %v1983_v31 = vmul.f32 -0.083333336, %v1023_v28  ;;  %v1282_v37 = vld [vmem:[#allocation2 + $0x49] sm:$0xff] }
  0xd7   :  { %v2046_v33 = vmul.f32 0.16666667, %v2014_v3  ;;  %v2205_v61 = vadd.f32 %v4374_v59, %v2141_v5  ;;  %v1664_v25 = vadd.f32 %v4447_v42, %v1600_v4  ;;  %v4453_v26 = vld [vmem:[#allocation2 + $0x98] sm:$0xff]  ;;  %v1473_v47 = vadd.f32 %v4363_v60, %v1409_v35  ;;  %v1314_v41 = vld [vmem:[#allocation2 + $0x4b] sm:$0xff] }
  0xd8   :  { %v2562_v9 = vclamps-f32 %v2236_v6, 3.0  ;;  %v2047_v11 = vmul.f32 0.16666667, %v2015_v13  ;;  %v2692_v59 = vld [vmem:[#allocation2 + $0x3a] sm:$0xff]  ;;  %v1024_v56 = vadd.f32 %v4445_v29, %v960_v40  ;;  %v961_v49 = vadd.f32 %v4453_v26, %v896_v53 }
  0xd9   :  { %v2078_v2 = vadd.f32 %v2046_v33, %v1982_v57  ;;  %v2237_v57 = vsub.f32 %v2205_v61, %v2692_v59  ;;  %v4462_v28 = vld [vmem:[#allocation2 + $0x93] sm:$0xff]  ;;  %v1248_v6 = vadd.f32 %v4450_v51, %v1184_v24  ;;  %v1537_v33 = vadd.f32 %v1473_v47, %v4386_v44  ;;  %v4471_v61 = vld [vmem:[#allocation2 + $0x9c] sm:$0xff]  ;;  %v2693_v24 = vld [vmem:[#allocation2 + $0x4a] sm:$0xff] }
  0xda   :  { %2594 = vst.msk [vmem:[%s5251_s1 + $0x100] sm:$0xff] %vm104_vm0, %v2562_v9  ;;  %v2079_v34 = vadd.f32 %v2047_v11, %v1983_v31  ;;  %v1728_v5 = vadd.f32 %v4462_v28, %v1664_v25  ;;  %v1185_v40 = vadd.f32 %v1121_v45, %v4356_v36  ;;  %v1346_v31 = vadd.f32 %v1314_v41, %v1282_v37  ;;  %v4482_v59 = vld [vmem:[#allocation2 + $0x9a] sm:$0xff]  ;;  %v1283_v37 = vld [vmem:[#allocation2 + $0x51] sm:$0xff] }
  0xdb   :  { %v2142_v3 = vadd.f32 %v4393_v54, %v2078_v2  ;;  %v2563_v13 = vclamps-f32 %v2237_v57, 3.0  ;;  %v2175_v54 = vmul.f32 0.6666667, %v3835_v63  ;;  %v1601_v53 = vadd.f32 %v1537_v33, %v4412_v55  ;;  %v1058_v2 = vld [vmem:[#allocation2 + $0x4a] sm:$0xff]  ;;  %v1315_v41 = vld [vmem:[#allocation2 + $0x53] sm:$0xff] }
  0xdc   :  { %v2143_v35 = vadd.f32 %v2111_v21, %v2079_v34  ;;  %v2016_v9 = vsub.f32 %v1728_v5, %v1248_v6  ;;  %v2112_v63 = vmul.f32 -0.5, %v3859_v52  ;;  %v1025_v45 = vadd.f32 %v4471_v61, %v961_v49  ;;  %v4480_v21 = vld [vmem:[#allocation2 + $0x99] sm:$0xff] }
  0xdd   :  { %v2206_v4 = vadd.f32 %v4401_v19, %v2142_v3  ;;  %2595 = vst.msk [vmem:[%s5251_s1 + $0x108] sm:$0xff] %vm104_vm0, %v2563_v13  ;;  %v1984_v19 = vmul.f32 -0.083333336, %v1024_v56  ;;  %v1665_v57 = vadd.f32 %v4480_v21, %v1601_v53  ;;  %v1410_v3 = vadd.f32 %v1346_v31, %v4291_v1  ;;  %v4487_v56 = vld [vmem:[#allocation2 + $0x9b] sm:$0xff]  ;;  %v2694_v5 = vld [vmem:[#allocation2 + $0x52] sm:$0xff] }
  0xde   :  { %v2207_v25 = vadd.f32 %v2175_v54, %v2143_v35  ;;  %v2048_v47 = vmul.f32 0.16666667, %v2016_v9  ;;  %v1249_v6 = vadd.f32 %v4482_v59, %v1185_v40  ;;  %v897_v52 = vadd.f32 %v4330_v46, %v4311_v12  ;;  %v4499_v46 = vld [vmem:[#allocation2 + $0xa8] sm:$0xff]  ;;  %v1059_v31 = vld [vmem:[#allocation2 + $0x52] sm:$0xff] }
  0xdf   :  { %v2238_v11 = vsub.f32 %v2206_v4, %v2693_v24  ;;  %v1122_v49 = vadd.f32 %v1058_v2, %v4341_v10  ;;  %v1729_v4 = vadd.f32 %v4487_v56, %v1665_v57  ;;  %v1474_v54 = vadd.f32 %v1410_v3, %v4313_v30 }
  0xe0   :  { %v2239_v33 = vsub.f32 %v2207_v25, %v2694_v5  ;;  %v2080_v13 = vadd.f32 %v2048_v47, %v1984_v19  ;;  %v2176_v40 = vmul.f32 0.6666667, %v3853_v58  ;;  %v1347_v35 = vadd.f32 %v1315_v41, %v1283_v37  ;;  %v4514_v37 = vld [vmem:[#allocation2 + $0xa9] sm:$0xff] }
  0xe1   :  { %v2564_v34 = vclamps-f32 %v2238_v11, 3.0  ;;  %v2017_v12 = vsub.f32 %v1729_v4, %v1249_v6  ;;  %v1538_v2 = vadd.f32 %v1474_v54, %v4433_v23  ;;  %v1985_v24 = vmul.f32 -0.083333336, %v1025_v45  ;;  %v2695_v6 = vld [vmem:[#allocation2 + $0x62] sm:$0xff]  ;;  %v4518_v5 = vld [vmem:[#allocation2 + $0xac] sm:$0xff] }
  0xe2   :  { %v2565_v9 = vclamps-f32 %v2239_v33, 3.0  ;;  %v2144_v53 = vadd.f32 %v2112_v63, %v2080_v13  ;;  %v962_v11 = vadd.f32 %v4499_v46, %v897_v52  ;;  %v1186_v19 = vadd.f32 %v1122_v49, %v4380_v62  ;;  %v4520_v33 = vld [vmem:[#allocation2 + $0xaa] sm:$0xff] }
  0xe3   :  { %2596 = vst.msk [vmem:[%s5251_s1 + $0x110] sm:$0xff] %vm104_vm0, %v2564_v34  ;;  %v1411_v25 = vadd.f32 %v1347_v35, %v4317_v14  ;;  %v2049_v63 = vmul.f32 0.16666667, %v2017_v12  ;;  %v1602_v47 = vadd.f32 %v1538_v2, %v4445_v29  ;;  %v898_v57 = vadd.f32 %v4363_v60, %v4335_v50  ;;  %v4526_v50 = vld [vmem:[#allocation2 + $0xab] sm:$0xff] }
  0xe4   :  { %2597 = vst.msk [vmem:[%s5251_s1 + $0x118] sm:$0xff] %vm104_vm0, %v2565_v9  ;;  %v2208_v58 = vadd.f32 %v2176_v40, %v2144_v53  ;;  %v2113_v45 = vmul.f32 -0.5, %v3869_v43  ;;  %v2177_v3 = vmul.f32 0.6666667, %v3864_v17  ;;  %v1123_v41 = vadd.f32 %v1059_v31, %v4386_v44  ;;  %v4528_v4 = vld [vmem:[#allocation2 + $0xb0] sm:$0xff] }
  0xe5   :  { %v1475_v34 = vadd.f32 %v1411_v25, %v4356_v36  ;;  %v2081_v49 = vadd.f32 %v2049_v63, %v1985_v24  ;;  %v1666_v13 = vadd.f32 %v4514_v37, %v1602_v47  ;;  %v2114_v60 = vmul.f32 -0.5, %v3879_v32  ;;  %v4549_v63 = vld [vmem:[#allocation2 + $0xb4] sm:$0xff] }
  0xe6   :  { %v2240_v52 = vsub.f32 %v2208_v58, %v2695_v6  ;;  %v1026_v43 = vadd.f32 %v4518_v5, %v962_v11  ;;  %v1250_v17 = vadd.f32 %v4520_v33, %v1186_v19  ;;  %v1348_v40 = vadd.f32 %v4360_v27, %v4348_v7  ;;  %v4545_v19 = vld [vmem:[#allocation2 + $0xb1] sm:$0xff]  ;;  %v4559_v6 = vld [vmem:[#allocation2 + $0xc0] sm:$0xff] }
  0xe7   :  { %v1539_v54 = vadd.f32 %v1475_v34, %v4453_v26  ;;  %v2145_v9 = vadd.f32 %v2113_v45, %v2081_v49  ;;  %v1730_v53 = vadd.f32 %v4526_v50, %v1666_v13  ;;  %v963_v12 = vadd.f32 %v4528_v4, %v898_v57  ;;  %v2696_v57 = vld [vmem:[#allocation2 + $0x6a] sm:$0xff]  ;;  %v4557_v34 = vld [vmem:[#allocation2 + $0xb3] sm:$0xff] }
  0xe8   :  { %v2566_v35 = vclamps-f32 %v2240_v52, 3.0  ;;  %v1187_v32 = vadd.f32 %v1123_v41, %v4412_v55  ;;  %v899_v31 = vadd.f32 %v4313_v30, %v4291_v1  ;;  %v1412_v24 = vadd.f32 %v1348_v40, %v4341_v10 }
  0xe9   :  { %v1603_v2 = vadd.f32 %v1539_v54, %v4471_v61  ;;  %v2209_v27 = vadd.f32 %v2177_v3, %v2145_v9  ;;  %v2018_v7 = vsub.f32 %v1730_v53, %v1250_v17  ;;  %v2178_v11 = vmul.f32 0.6666667, %v3883_v16  ;;  %v4555_v16 = vld [vmem:[#allocation2 + $0xb2] sm:$0xff] }
  0xea   :  { %2598 = vst.msk [vmem:[%s5251_s1 + $0x120] sm:$0xff] %vm104_vm0, %v2566_v35  ;;  %v1124_v25 = vadd.f32 %v4327_v38, %v4433_v23  ;;  %v1986_v58 = vmul.f32 -0.083333336, %v1026_v43  ;;  %v2115_v30 = vmul.f32 -0.5, %v3914_v8  ;;  %v1476_v47 = vadd.f32 %v1412_v24, %v4380_v62 }
  0xeb   :  { %v1667_v1 = vadd.f32 %v4545_v19, %v1603_v2  ;;  %v2241_v45 = vsub.f32 %v2209_v27, %v2696_v57  ;;  %v2050_v3 = vmul.f32 0.16666667, %v2018_v7  ;;  %v1027_v41 = vadd.f32 %v4549_v63, %v963_v12  ;;  %v4579_v2 = vld [vmem:[#allocation2 + $0xc1] sm:$0xff]  ;;  %v5662_v7 = vld [vmem:[#allocation5_spill] sm:$0xff] }
  0xec   :  { %v1349_v38 = vadd.f32 %v4389_v0, %v4378_v22  ;;  %v1251_v52 = vadd.f32 %v4555_v16, %v1187_v32  ;;  %v964_v49 = vadd.f32 %v4559_v6, %v899_v31  ;;  %v1540_v13 = vadd.f32 %v1476_v47, %v4499_v46  ;;  %v4577_v32 = vld [vmem:[#allocation2 + $0xc4] sm:$0xff] }
  0xed   :  { %v1731_v8 = vadd.f32 %v4557_v34, %v1667_v1  ;;  %v2567_v43 = vclamps-f32 %v2241_v45, 3.0  ;;  %v2082_v17 = vadd.f32 %v2050_v3, %v1986_v58  ;;  %v1188_v54 = vadd.f32 %v1124_v25, %v4445_v29  ;;  %v4590_v1 = vld [vmem:[#allocation2 + $0xc3] sm:$0xff] }
  0xee   :  { %v1413_v40 = vadd.f32 %v1349_v38, %v4386_v44  ;;  %v2179_v9 = vmul.f32 0.6666667, %v3897_v48  ;;  %v1604_v53 = vadd.f32 %v1540_v13, %v4518_v5  ;;  %v900_v0 = vadd.f32 %v4356_v36, %v4317_v14  ;;  %v4585_v14 = vld [vmem:[#allocation2 + $0xc2] sm:$0xff] }
  0xef   :  { %v2019_v35 = vsub.f32 %v1731_v8, %v1251_v52  ;;  %2599 = vst.msk [vmem:[%s5251_s1 + $0x128] sm:$0xff] %vm104_vm0, %v2567_v43  ;;  %v2146_v22 = vadd.f32 %v2114_v60, %v2082_v17  ;;  %v1987_v12 = vmul.f32 -0.083333336, %v1027_v41  ;;  %v1125_v31 = vadd.f32 %v4370_v18, %v4453_v26  ;;  %v4592_v47 = vld [vmem:[#allocation2 + $0xc8] sm:$0xff]  ;;  %v5663_v57 = vld [vmem:[#allocation55_spill] sm:$0xff] }
  0xf0   :  { %v1477_v48 = vadd.f32 %v1413_v40, %v4412_v55  ;;  %v1028_v27 = vadd.f32 %v4577_v32, %v964_v49  ;;  %v1668_v36 = vadd.f32 %v4579_v2, %v1604_v53  ;;  %v2116_v25 = vmul.f32 -0.5, %v5662_v7  ;;  %v5664_v38 = vld [vmem:[#allocation3_spill] sm:$0xff]  ;;  %v4603_v53 = vld [vmem:[#allocation2 + $0xc9] sm:$0xff] }
  0xf1   :  { %v2051_v24 = vmul.f32 0.16666667, %v2019_v35  ;;  %v2210_v60 = vadd.f32 %v2178_v11, %v2146_v22  ;;  %v1252_v58 = vadd.f32 %v4585_v14, %v1188_v54  ;;  %v1350_v45 = vadd.f32 %v5663_v57, %v4404_v39  ;;  %v2697_v49 = vld [vmem:[#allocation2 + $0x7a] sm:$0xff] }
  0xf2   :  { %v1541_v18 = vadd.f32 %v1477_v48, %v4528_v4  ;;  %v1732_v41 = vadd.f32 %v4590_v1, %v1668_v36  ;;  %v2180_v52 = vmul.f32 0.6666667, %v5664_v38  ;;  %v965_v8 = vadd.f32 %v4592_v47, %v900_v0  ;;  %v5665_v48 = vld [vmem:[#allocation62_spill] sm:$0xff] }
  0xf3   :  { %v2083_v3 = vadd.f32 %v2051_v24, %v1987_v12  ;;  %v2242_v11 = vsub.f32 %v2210_v60, %v2697_v49  ;;  %v1189_v13 = vadd.f32 %v1125_v31, %v4471_v61  ;;  %v1414_v17 = vadd.f32 %v1350_v45, %v4433_v23  ;;  %v4607_v12 = vld [vmem:[#allocation2 + $0xcc] sm:$0xff]  ;;  %v4625_v57 = vld [vmem:[#allocation2 + $0xd8] sm:$0xff]  ;;  %v5667_v45 = vld [vmem:[#allocation51_spill] sm:$0xff] }
  0xf4   :  { %v1605_v43 = vadd.f32 %v1541_v18, %v4549_v63  ;;  %v1988_v40 = vmul.f32 -0.083333336, %v1028_v27  ;;  %v2020_v35 = vsub.f32 %v1732_v41, %v1252_v58  ;;  %v901_v39 = vadd.f32 %v4380_v62, %v4341_v10  ;;  %v4614_v27 = vld [vmem:[#allocation2 + $0xca] sm:$0xff]  ;;  %v2698_v41 = vld [vmem:[#allocation2 + $0x82] sm:$0xff] }
  0xf5   :  { %v2147_v54 = vadd.f32 %v2115_v30, %v2083_v3  ;;  %v2568_v22 = vclamps-f32 %v2242_v11, 3.0  ;;  %v1126_v31 = vadd.f32 %v5665_v48, %v4499_v46  ;;  %v1478_v24 = vadd.f32 %v1414_v17, %v4445_v29  ;;  %v4616_v60 = vld [vmem:[#allocation2 + $0xcb] sm:$0xff]  ;;  %v4635_v48 = vld [vmem:[#allocation2 + $0xd9] sm:$0xff] }
  0xf6   :  { %v1669_v0 = vadd.f32 %v4603_v53, %v1605_v43  ;;  %v2052_v7 = vmul.f32 0.16666667, %v2020_v35  ;;  %v1029_v30 = vadd.f32 %v4607_v12, %v965_v8  ;;  %v5666_v58 = vld [vmem:[#allocation12_spill] sm:$0xff]  ;;  %v1253_v62 = vadd.f32 %v4614_v27, %v1189_v13  ;;  %v5668_v49 = vld [vmem:[#allocation21_spill] sm:$0xff] }
  0xf7   :  { %v2211_v36 = vadd.f32 %v2179_v9, %v2147_v54  ;;  %v2117_v10 = vmul.f32 -0.5, %v5666_v58  ;;  %2600 = vst.msk [vmem:[%s5251_s1 + $0x130] sm:$0xff] %vm104_vm0, %v2568_v22  ;;  %v1542_v9 = vadd.f32 %v1478_v24, %v4559_v6  ;;  %v1351_v3 = vadd.f32 %v4431_v15, %v5667_v45 }
  0xf8   :  { %v1733_v18 = vadd.f32 %v4616_v60, %v1669_v0  ;;  %v2084_v8 = vadd.f32 %v2052_v7, %v1988_v40  ;;  %v2181_v11 = vmul.f32 0.6666667, %v5668_v49  ;;  %v966_v43 = vadd.f32 %v4625_v57, %v901_v39  ;;  %v4641_v39 = vld [vmem:[#allocation2 + $0xdc] sm:$0xff] }
  0xf9   :  { %v2243_v38 = vsub.f32 %v2211_v36, %v2698_v41  ;;  %v1190_v54 = vadd.f32 %v1126_v31, %v4518_v5  ;;  %v1606_v13 = vadd.f32 %v1542_v9, %v4577_v32  ;;  %v1415_v35 = vadd.f32 %v1351_v3, %v4453_v26  ;;  %v4659_v3 = vld [vmem:[#allocation2 + $0xe0] sm:$0xff]  ;;  %v2699_v41 = vld [vmem:[#allocation2 + $0x92] sm:$0xff] }
  0xfa   :  { %v2021_v17 = vsub.f32 %v1733_v18, %v1253_v62  ;;  %v2148_v0 = vadd.f32 %v2116_v25, %v2084_v8  ;;  %v902_v15 = vadd.f32 %v4412_v55, %v4386_v44  ;;  %v1127_v40 = vadd.f32 %v4424_v20, %v4528_v4  ;;  %v4650_v55 = vld [vmem:[#allocation2 + $0xda] sm:$0xff] }
  0xfb   :  { %v2569_v22 = vclamps-f32 %v2243_v38, 3.0  ;;  %v1989_v24 = vmul.f32 -0.083333336, %v1029_v30  ;;  %v1670_v31 = vadd.f32 %v4635_v48, %v1606_v13  ;;  %v1479_v7 = vadd.f32 %v1415_v35, %v4471_v61  ;;  %v4652_v44 = vld [vmem:[#allocation2 + $0xdb] sm:$0xff] }
  0xfc   :  { %v2053_v36 = vmul.f32 0.16666667, %v2021_v17  ;;  %v2212_v25 = vadd.f32 %v2180_v52, %v2148_v0  ;;  %v1030_v58 = vadd.f32 %v4641_v39, %v966_v43  ;;  %v5669_v20 = vld [vmem:[#allocation7_spill] sm:$0xff]  ;;  %v1352_v62 = vadd.f32 %v4462_v28, %v4447_v42  ;;  %v5670_v35 = vld [vmem:[#allocation6_spill] sm:$0xff] }
  0xfd   :  { %2601 = vst.msk [vmem:[%s5251_s1 + $0x138] sm:$0xff] %vm104_vm0, %v2569_v22  ;;  %v2118_v30 = vmul.f32 -0.5, %v5669_v20  ;;  %v1254_v9 = vadd.f32 %v4650_v55, %v1190_v54  ;;  %v1734_v45 = vadd.f32 %v4652_v44, %v1670_v31  ;;  %v1543_v52 = vadd.f32 %v1479_v7, %v4592_v47  ;;  %v4669_v0 = vld [vmem:[#allocation2 + $0xe1] sm:$0xff] }
  0xfe   :  { %v2085_v18 = vadd.f32 %v2053_v36, %v1989_v24  ;;  %v2244_v38 = vsub.f32 %v2212_v25, %v2699_v41  ;;  %v967_v8 = vadd.f32 %v4659_v3, %v902_v15  ;;  %v1191_v49 = vadd.f32 %v1127_v40, %v4549_v63  ;;  %v4676_v7 = vld [vmem:[#allocation2 + $0xe2] sm:$0xff] }
  0xff   :  { %v1416_v43 = vadd.f32 %v1352_v62, %v4499_v46  ;;  %v2022_v13 = vsub.f32 %v1734_v45, %v1254_v9  ;;  %v1607_v42 = vadd.f32 %v1543_v52, %v4607_v12  ;;  %v903_v28 = vadd.f32 %v4445_v29, %v4433_v23  ;;  %v2700_v62 = vld [vmem:[#allocation2 + $0x9a] sm:$0xff] }
 0x100   :  { %v2149_v17 = vadd.f32 %v2117_v10, %v2085_v18  ;;  %v2570_v54 = vclamps-f32 %v2244_v38, 3.0  ;;  %v2182_v22 = vmul.f32 0.6666667, %v5670_v35  ;;  %v1128_v24 = vadd.f32 %v4450_v51, %v4559_v6  ;;  %v4674_v10 = vld [vmem:[#allocation2 + $0xe4] sm:$0xff] }
 0x101   :  { %v1480_v15 = vadd.f32 %v1416_v43, %v4518_v5  ;;  %v1990_v36 = vmul.f32 -0.083333336, %v1030_v58  ;;  %v2054_v31 = vmul.f32 0.16666667, %v2022_v13  ;;  %v1671_v25 = vadd.f32 %v4669_v0, %v1607_v42  ;;  %v4685_v51 = vld [vmem:[#allocation2 + $0xe3] sm:$0xff] }
 0x102   :  { %v2213_v40 = vadd.f32 %v2181_v11, %v2149_v17  ;;  %2602 = vst.msk [vmem:[%s5251_s1 + $0x140] sm:$0xff] %vm104_vm0, %v2570_v54  ;;  %v1031_v23 = vadd.f32 %v4674_v10, %v967_v8  ;;  %v1255_v29 = vadd.f32 %v4676_v7, %v1191_v49  ;;  %v4687_v11 = vld [vmem:[#allocation2 + $0xf0] sm:$0xff]  ;;  %v1353_v20 = vadd.f32 %v4487_v56, %v4480_v21  ;;  %v5671_v42 = vld [vmem:[#allocation4_spill] sm:$0xff] }
 0x103   :  { %v1544_v58 = vadd.f32 %v1480_v15, %v4625_v57  ;;  %v2086_v9 = vadd.f32 %v2054_v31, %v1990_v36  ;;  %v1735_v45 = vadd.f32 %v4685_v51, %v1671_v25  ;;  %v968_v52 = vadd.f32 %v4687_v11, %v903_v28  ;;  %v4699_v21 = vld [vmem:[#allocation2 + $0xf1] sm:$0xff]  ;;  %v5672_v28 = vld [vmem:[#allocation23_spill] sm:$0xff] }
 0x104   :  { %v2245_v18 = vsub.f32 %v2213_v40, %v2700_v62  ;;  %v1192_v41 = vadd.f32 %v1128_v24, %v4577_v32  ;;  %v904_v8 = vadd.f32 %v4471_v61, %v4453_v26  ;;  %v1417_v49 = vadd.f32 %v1353_v20, %v4528_v4  ;;  %v4705_v24 = vld [vmem:[#allocation2 + $0xf4] sm:$0xff] }
 0x105   :  { %v1608_v38 = vadd.f32 %v1544_v58, %v4641_v39  ;;  %v2150_v17 = vadd.f32 %v2118_v30, %v2086_v9  ;;  %v2023_v13 = vsub.f32 %v1735_v45, %v1255_v29  ;;  %v1129_v56 = vadd.f32 %v4482_v59, %v4592_v47  ;;  %v4714_v36 = vld [vmem:[#allocation2 + $0xf2] sm:$0xff] }
 0x106   :  { %v2571_v43 = vclamps-f32 %v2245_v18, 3.0  ;;  %v2119_v54 = vmul.f32 -0.5, %v5671_v42  ;;  %v2183_v35 = vmul.f32 0.6666667, %v5672_v28  ;;  %v1481_v26 = vadd.f32 %v1417_v49, %v4549_v63  ;;  %v4716_v31 = vld [vmem:[#allocation2 + $0xf3] sm:$0xff] }
 0x107   :  { %v1672_v15 = vadd.f32 %v4699_v21, %v1608_v38  ;;  %v2214_v61 = vadd.f32 %v2182_v22, %v2150_v17  ;;  %v1991_v30 = vmul.f32 -0.083333336, %v1031_v23  ;;  %v2055_v40 = vmul.f32 0.16666667, %v2023_v13  ;;  %v4720_v58 = vld [vmem:[#allocation2 + $0xf8] sm:$0xff]  ;;  %v2701_v22 = vld [vmem:[#allocation2 + $0xaa] sm:$0xff] }
 0x108   :  { %2603 = vst.msk [vmem:[%s5251_s1 + $0x148] sm:$0xff] %vm104_vm0, %v2571_v43  ;;  %v1032_v59 = vadd.f32 %v4705_v24, %v968_v52  ;;  %v1256_v25 = vadd.f32 %v4714_v36, %v1192_v41  ;;  %v1545_v20 = vadd.f32 %v1481_v26, %v4659_v3  ;;  %v1354_v62 = vadd.f32 %v4526_v50, %v4514_v37  ;;  %v5673_v38 = vld [vmem:[#allocation8_spill] sm:$0xff]  ;;  %v4730_v42 = vld [vmem:[#allocation2 + $0xf9] sm:$0xff] }
 0x109   :  { %v1736_v29 = vadd.f32 %v4716_v31, %v1672_v15  ;;  %v2246_v23 = vsub.f32 %v2214_v61, %v2701_v22  ;;  %v2087_v18 = vadd.f32 %v2055_v40, %v1991_v30  ;;  %v969_v9 = vadd.f32 %v4720_v58, %v904_v8  ;;  %v4738_v15 = vld [vmem:[#allocation2 + $0xfa] sm:$0xff]  ;;  %v2702_v22 = vld [vmem:[#allocation2 + $0xb2] sm:$0xff] }
 0x10a   :  { %v1193_v45 = vadd.f32 %v1129_v56, %v4607_v12  ;;  %v2120_v49 = vmul.f32 -0.5, %v5673_v38  ;;  %v1609_v41 = vadd.f32 %v1545_v20, %v4674_v10  ;;  %v1418_v43 = vadd.f32 %v1354_v62, %v4559_v6  ;;  %v4736_v56 = vld [vmem:[#allocation2 + $0xfc] sm:$0xff] }
 0x10b   :  { %v2024_v52 = vsub.f32 %v1736_v29, %v1256_v25  ;;  %v2572_v17 = vclamps-f32 %v2246_v23, 3.0  ;;  %v2151_v13 = vadd.f32 %v2119_v54, %v2087_v18  ;;  %v905_v37 = vadd.f32 %v4518_v5, %v4499_v46  ;;  %v5674_v46 = vld [vmem:[#allocation17_spill] sm:$0xff]  ;;  %v4749_v40 = vld [vmem:[#allocation2 + $0xfb] sm:$0xff]  ;;  %v4752_v29 = vld [vmem:[#allocation2 + $0x108] sm:$0xff] }
 0x10c   :  { %v1130_v50 = vadd.f32 %v4520_v33, %v4625_v57  ;;  %v1992_v8 = vmul.f32 -0.083333336, %v1032_v59  ;;  %v1673_v26 = vadd.f32 %v4730_v42, %v1609_v41  ;;  %v1482_v61 = vadd.f32 %v1418_v43, %v4577_v32  ;;  %v5675_v23 = vld [vmem:[#allocation9_spill] sm:$0xff] }
 0x10d   :  { %v2056_v28 = vmul.f32 0.16666667, %v2024_v52  ;;  %2604 = vst.msk [vmem:[%s5251_s1 + $0x150] sm:$0xff] %vm104_vm0, %v2572_v17  ;;  %v2215_v54 = vadd.f32 %v2183_v35, %v2151_v13  ;;  %v2184_v5 = vmul.f32 0.6666667, %v5674_v46  ;;  %v1033_v33 = vadd.f32 %v4736_v56, %v969_v9  ;;  %v4781_v46 = vld [vmem:[#allocation2 + $0x10b] sm:$0xff] }
 0x10e   :  { %v1257_v30 = vadd.f32 %v4738_v15, %v1193_v45  ;;  %v1737_v25 = vadd.f32 %v4749_v40, %v1673_v26  ;;  %v1546_v20 = vadd.f32 %v1482_v61, %v4687_v11  ;;  %v1355_v62 = vadd.f32 %v4557_v34, %v4545_v19  ;;  %v4768_v26 = vld [vmem:[#allocation2 + $0x10c] sm:$0xff] }
 0x10f   :  { %v2088_v59 = vadd.f32 %v2056_v28, %v1992_v8  ;;  %v2247_v35 = vsub.f32 %v2215_v54, %v2702_v22  ;;  %v2121_v18 = vmul.f32 -0.5, %v5675_v23  ;;  %v970_v9 = vadd.f32 %v4752_v29, %v905_v37  ;;  %v4762_v8 = vld [vmem:[#allocation2 + $0x109] sm:$0xff]  ;;  %v5676_v54 = vld [vmem:[#allocation14_spill] sm:$0xff] }
 0x110   :  { %v1194_v45 = vadd.f32 %v1130_v50, %v4641_v39  ;;  %v2025_v38 = vsub.f32 %v1737_v25, %v1257_v30  ;;  %v1610_v41 = vadd.f32 %v1546_v20, %v4705_v24  ;;  %v1419_v43 = vadd.f32 %v1355_v62, %v4592_v47  ;;  %v4786_v20 = vld [vmem:[#allocation2 + $0x110] sm:$0xff] }
 0x111   :  { %v2152_v52 = vadd.f32 %v2120_v49, %v2088_v59  ;;  %v2573_v17 = vclamps-f32 %v2247_v35, 3.0  ;;  %v1993_v13 = vmul.f32 -0.083333336, %v1033_v33  ;;  %v906_v19 = vadd.f32 %v4549_v63, %v4528_v4  ;;  %v4770_v49 = vld [vmem:[#allocation2 + $0x10a] sm:$0xff]  ;;  %v2703_v33 = vld [vmem:[#allocation2 + $0xc2] sm:$0xff] }
 0x112   :  { %v1131_v34 = vadd.f32 %v4555_v16, %v4659_v3  ;;  %v2057_v37 = vmul.f32 0.16666667, %v2025_v38  ;;  %v1674_v50 = vadd.f32 %v4762_v8, %v1610_v41  ;;  %v1483_v61 = vadd.f32 %v1419_v43, %v4607_v12  ;;  %v5677_v38 = vld [vmem:[#allocation22_spill] sm:$0xff]  ;;  %v5678_v43 = vld [vmem:[#allocation25_spill] sm:$0xff] }
 0x113   :  { %v2216_v28 = vadd.f32 %v2184_v5, %v2152_v52  ;;  %2605 = vst.msk [vmem:[%s5251_s1 + $0x158] sm:$0xff] %vm104_vm0, %v2573_v17  ;;  %v2185_v4 = vmul.f32 0.6666667, %v5676_v54  ;;  %v1034_v63 = vadd.f32 %v4768_v26, %v970_v9  ;;  %v1258_v16 = vadd.f32 %v4770_v49, %v1194_v45  ;;  %v4813_v54 = vld [vmem:[#allocation2 + $0x113] sm:$0xff] }
 0x114   :  { %v1356_v5 = vadd.f32 %v4590_v1, %v4579_v2  ;;  %v2089_v59 = vadd.f32 %v2057_v37, %v1993_v13  ;;  %v1738_v25 = vadd.f32 %v4781_v46, %v1674_v50  ;;  %v1547_v62 = vadd.f32 %v1483_v61, %v4720_v58  ;;  %v4797_v13 = vld [vmem:[#allocation2 + $0x111] sm:$0xff] }
 0x115   :  { %v2248_v30 = vsub.f32 %v2216_v28, %v2703_v33  ;;  %v971_v22 = vadd.f32 %v4786_v20, %v906_v19  ;;  %v1195_v35 = vadd.f32 %v1131_v34, %v4674_v10  ;;  %v907_v23 = vadd.f32 %v4577_v32, %v4559_v6  ;;  %v4806_v28 = vld [vmem:[#allocation2 + $0x114] sm:$0xff] }
 0x116   :  { %v1420_v9 = vadd.f32 %v1356_v5, %v4625_v57  ;;  %v2153_v2 = vadd.f32 %v2121_v18, %v2089_v59  ;;  %v2026_v1 = vsub.f32 %v1738_v25, %v1258_v16  ;;  %v1611_v52 = vadd.f32 %v1547_v62, %v4736_v56  ;;  %v4808_v37 = vld [vmem:[#allocation2 + $0x112] sm:$0xff]  ;;  %v4815_v16 = vld [vmem:[#allocation2 + $0x120] sm:$0xff] }
 0x117   :  { %v2574_v45 = vclamps-f32 %v2248_v30, 3.0  ;;  %v2122_v41 = vmul.f32 -0.5, %v5677_v38  ;;  %v2186_v17 = vmul.f32 0.6666667, %v5678_v43  ;;  %v1132_v19 = vadd.f32 %v4585_v14, %v4687_v11 }
 0x118   :  { %v1484_v34 = vadd.f32 %v1420_v9, %v4641_v39  ;;  %v2217_v6 = vadd.f32 %v2185_v4, %v2153_v2  ;;  %v1994_v32 = vmul.f32 -0.083333336, %v1034_v63  ;;  %v2058_v18 = vmul.f32 0.16666667, %v2026_v1  ;;  %v2704_v63 = vld [vmem:[#allocation2 + $0xca] sm:$0xff] }
 0x119   :  { %2606 = vst.msk [vmem:[%s5251_s1 + $0x160] sm:$0xff] %vm104_vm0, %v2574_v45  ;;  %v1675_v50 = vadd.f32 %v4797_v13, %v1611_v52  ;;  %v1035_v61 = vadd.f32 %v4806_v28, %v971_v22  ;;  %v1259_v14 = vadd.f32 %v4808_v37, %v1195_v35  ;;  %v1357_v4 = vadd.f32 %v4616_v60, %v4603_v53  ;;  %v4827_v53 = vld [vmem:[#allocation2 + $0x121] sm:$0xff]  ;;  %v5679_v52 = vld [vmem:[#allocation10_spill] sm:$0xff] }
 0x11a   :  { %v1548_v5 = vadd.f32 %v1484_v34, %v4752_v29  ;;  %v2249_v33 = vsub.f32 %v2217_v6, %v2704_v63  ;;  %v2090_v30 = vadd.f32 %v2058_v18, %v1994_v32  ;;  %v972_v25 = vadd.f32 %v4815_v16, %v907_v23  ;;  %v5680_v23 = vld [vmem:[#allocation16_spill] sm:$0xff] }
 0x11b   :  { %v1739_v59 = vadd.f32 %v4813_v54, %v1675_v50  ;;  %v1196_v62 = vadd.f32 %v1132_v19, %v4705_v24  ;;  %v908_v35 = vadd.f32 %v4607_v12, %v4592_v47  ;;  %v1421_v9 = vadd.f32 %v1357_v4, %v4659_v3  ;;  %v4833_v19 = vld [vmem:[#allocation2 + $0x124] sm:$0xff] }
 0x11c   :  { %v1612_v22 = vadd.f32 %v1548_v5, %v4768_v26  ;;  %v2575_v45 = vclamps-f32 %v2249_v33, 3.0  ;;  %v2154_v2 = vadd.f32 %v2122_v41, %v2090_v30  ;;  %v1133_v60 = vadd.f32 %v4614_v27, %v4720_v58  ;;  %v4842_v32 = vld [vmem:[#allocation2 + $0x122] sm:$0xff] }
 0x11d   :  { %v2027_v1 = vsub.f32 %v1739_v59, %v1259_v14  ;;  %v2123_v38 = vmul.f32 -0.5, %v5679_v52  ;;  %v2187_v43 = vmul.f32 0.6666667, %v5680_v23  ;;  %v1485_v47 = vadd.f32 %v1421_v9, %v4674_v10  ;;  %v4844_v18 = vld [vmem:[#allocation2 + $0x123] sm:$0xff] }
 0x11e   :  { %v1676_v34 = vadd.f32 %v4827_v53, %v1612_v22  ;;  %2607 = vst.msk [vmem:[%s5251_s1 + $0x168] sm:$0xff] %vm104_vm0, %v2575_v45  ;;  %v2218_v12 = vadd.f32 %v2186_v17, %v2154_v2  ;;  %v1995_v41 = vmul.f32 -0.083333336, %v1035_v61  ;;  %v1036_v27 = vadd.f32 %v4833_v19, %v972_v25  ;;  %v4848_v5 = vld [vmem:[#allocation2 + $0x128] sm:$0xff]  ;;  %v2705_v17 = vld [vmem:[#allocation2 + $0xda] sm:$0xff] }
 0x11f   :  { %v2059_v6 = vmul.f32 0.16666667, %v2027_v1  ;;  %v1260_v50 = vadd.f32 %v4842_v32, %v1196_v62  ;;  %v1549_v4 = vadd.f32 %v1485_v47, %v4786_v20  ;;  %v1358_v63 = vadd.f32 %v4652_v44, %v4635_v48  ;;  %v5681_v22 = vld [vmem:[#allocation18_spill] sm:$0xff]  ;;  %v4858_v52 = vld [vmem:[#allocation2 + $0x129] sm:$0xff] }
 0x120   :  { %v1740_v14 = vadd.f32 %v4844_v18, %v1676_v34  ;;  %v2250_v61 = vsub.f32 %v2218_v12, %v2705_v17  ;;  %v973_v30 = vadd.f32 %v4848_v5, %v908_v35  ;;  %v1197_v59 = vadd.f32 %v1133_v60, %v4736_v56  ;;  %v4864_v60 = vld [vmem:[#allocation2 + $0x12c] sm:$0xff]  ;;  %v2706_v17 = vld [vmem:[#allocation2 + $0xe2] sm:$0xff] }
 0x121   :  { %v2091_v33 = vadd.f32 %v2059_v6, %v1995_v41  ;;  %v2124_v9 = vmul.f32 -0.5, %v5681_v22  ;;  %v1613_v62 = vadd.f32 %v1549_v4, %v4806_v28  ;;  %v1422_v45 = vadd.f32 %v1358_v63, %v4687_v11  ;;  %v4866_v34 = vld [vmem:[#allocation2 + $0x12a] sm:$0xff] }
 0x122   :  { %v2028_v25 = vsub.f32 %v1740_v14, %v1260_v50  ;;  %v2576_v2 = vclamps-f32 %v2250_v61, 3.0  ;;  %v909_v48 = vadd.f32 %v4641_v39, %v4625_v57  ;;  %v1134_v44 = vadd.f32 %v4650_v55, %v4752_v29  ;;  %v5682_v57 = vld [vmem:[#allocation15_spill] sm:$0xff]  ;;  %v4877_v6 = vld [vmem:[#allocation2 + $0x12b] sm:$0xff]  ;;  %v4880_v14 = vld [vmem:[#allocation2 + $0x138] sm:$0xff] }
 0x123   :  { %v2155_v1 = vadd.f32 %v2123_v38, %v2091_v33  ;;  %v1996_v35 = vmul.f32 -0.083333336, %v1036_v27  ;;  %v1677_v47 = vadd.f32 %v4858_v52, %v1613_v62  ;;  %v1486_v12 = vadd.f32 %v1422_v45, %v4705_v24  ;;  %v5683_v61 = vld [vmem:[#allocation40_spill] sm:$0xff] }
 0x124   :  { %v2060_v23 = vmul.f32 0.16666667, %v2028_v25  ;;  %2608 = vst.msk [vmem:[%s5251_s1 + $0x170] sm:$0xff] %vm104_vm0, %v2576_v2  ;;  %v2188_v39 = vmul.f32 0.6666667, %v5682_v57  ;;  %v1037_v55 = vadd.f32 %v4864_v60, %v973_v30  ;;  %v1261_v41 = vadd.f32 %v4866_v34, %v1197_v59  ;;  %v4909_v57 = vld [vmem:[#allocation2 + $0x13b] sm:$0xff] }
 0x125   :  { %v2219_v38 = vadd.f32 %v2187_v43, %v2155_v1  ;;  %v1741_v50 = vadd.f32 %v4877_v6, %v1677_v47  ;;  %v1550_v4 = vadd.f32 %v1486_v12, %v4815_v16  ;;  %v1359_v63 = vadd.f32 %v4685_v51, %v4669_v0  ;;  %v4896_v47 = vld [vmem:[#allocation2 + $0x13c] sm:$0xff] }
 0x126   :  { %v2092_v27 = vadd.f32 %v2060_v23, %v1996_v35  ;;  %v2125_v33 = vmul.f32 -0.5, %v5683_v61  ;;  %v974_v30 = vadd.f32 %v4880_v14, %v909_v48  ;;  %v1198_v59 = vadd.f32 %v1134_v44, %v4768_v26  ;;  %v4890_v35 = vld [vmem:[#allocation2 + $0x139] sm:$0xff] }
 0x127   :  { %v2251_v43 = vsub.f32 %v2219_v38, %v2706_v17  ;;  %v2029_v22 = vsub.f32 %v1741_v50, %v1261_v41  ;;  %v1614_v62 = vadd.f32 %v1550_v4, %v4833_v19  ;;  %v1423_v45 = vadd.f32 %v1359_v63, %v4720_v58  ;;  %v5684_v38 = vld [vmem:[#allocation24_spill] sm:$0xff]  ;;  %v4914_v4 = vld [vmem:[#allocation2 + $0x140] sm:$0xff] }
 0x128   :  { %v2156_v25 = vadd.f32 %v2124_v9, %v2092_v27  ;;  %v1997_v1 = vmul.f32 -0.083333336, %v1037_v55  ;;  %v910_v0 = vadd.f32 %v4674_v10, %v4659_v3  ;;  %v1135_v51 = vadd.f32 %v4676_v7, %v4786_v20  ;;  %v4898_v9 = vld [vmem:[#allocation2 + $0x13a] sm:$0xff]  ;;  %v2707_v55 = vld [vmem:[#allocation2 + $0xf2] sm:$0xff] }
 0x129   :  { %v2577_v2 = vclamps-f32 %v2251_v43, 3.0  ;;  %v2061_v48 = vmul.f32 0.16666667, %v2029_v22  ;;  %v1678_v44 = vadd.f32 %v4890_v35, %v1614_v62  ;;  %v1487_v12 = vadd.f32 %v1423_v45, %v4736_v56  ;;  %v5685_v22 = vld [vmem:[#allocation11_spill] sm:$0xff] }
 0x12a   :  { %v2220_v23 = vadd.f32 %v2188_v39, %v2156_v25  ;;  %v2189_v3 = vmul.f32 0.6666667, %v5684_v38  ;;  %v1038_v10 = vadd.f32 %v4896_v47, %v974_v30  ;;  %v1262_v7 = vadd.f32 %v4898_v9, %v1198_v59  ;;  %v5686_v45 = vld [vmem:[#allocation19_spill] sm:$0xff] }
 0x12b   :  { %2609 = vst.msk [vmem:[%s5251_s1 + $0x178] sm:$0xff] %vm104_vm0, %v2577_v2  ;;  %v1360_v39 = vadd.f32 %v4716_v31, %v4699_v21  ;;  %v2093_v27 = vadd.f32 %v2061_v48, %v1997_v1  ;;  %v1742_v50 = vadd.f32 %v4909_v57, %v1678_v44  ;;  %v1551_v63 = vadd.f32 %v1487_v12, %v4848_v5  ;;  %v4925_v1 = vld [vmem:[#allocation2 + $0x141] sm:$0xff] }
 0x12c   :  { %v2252_v41 = vsub.f32 %v2220_v23, %v2707_v55  ;;  %v975_v17 = vadd.f32 %v4914_v4, %v910_v0  ;;  %v1199_v43 = vadd.f32 %v1135_v51, %v4806_v28  ;;  %v911_v61 = vadd.f32 %v4705_v24, %v4687_v11  ;;  %v4934_v23 = vld [vmem:[#allocation2 + $0x144] sm:$0xff] }
 0x12d   :  { %v1424_v30 = vadd.f32 %v1360_v39, %v4752_v29  ;;  %v2157_v21 = vadd.f32 %v2125_v33, %v2093_v27  ;;  %v2030_v31 = vsub.f32 %v1742_v50, %v1262_v7  ;;  %v1615_v25 = vadd.f32 %v1551_v63, %v4864_v60  ;;  %v4936_v48 = vld [vmem:[#allocation2 + $0x142] sm:$0xff]  ;;  %v4943_v7 = vld [vmem:[#allocation2 + $0x150] sm:$0xff] }
 0x12e   :  { %v2578_v59 = vclamps-f32 %v2252_v41, 3.0  ;;  %v2126_v62 = vmul.f32 -0.5, %v5685_v22  ;;  %v2190_v2 = vmul.f32 0.6666667, %v5686_v45  ;;  %v1136_v0 = vadd.f32 %v4714_v36, %v4815_v16  ;;  %v4941_v38 = vld [vmem:[#allocation2 + $0x143] sm:$0xff] }
 0x12f   :  { %v1488_v51 = vadd.f32 %v1424_v30, %v4768_v26  ;;  %v2221_v11 = vadd.f32 %v2189_v3, %v2157_v21  ;;  %v1998_v24 = vmul.f32 -0.083333336, %v1038_v10  ;;  %v2062_v33 = vmul.f32 0.16666667, %v2030_v31  ;;  %v2708_v10 = vld [vmem:[#allocation2 + $0xfa] sm:$0xff] }
 0x130   :  { %2610 = vst.msk [vmem:[%s5251_s1 + $0x180] sm:$0xff] %vm104_vm0, %v2578_v59  ;;  %v1679_v44 = vadd.f32 %v4925_v1, %v1615_v25  ;;  %v1039_v12 = vadd.f32 %v4934_v23, %v975_v17  ;;  %v1263_v36 = vadd.f32 %v4936_v48, %v1199_v43  ;;  %v1361_v3 = vadd.f32 %v4749_v40, %v4730_v42  ;;  %v4955_v42 = vld [vmem:[#allocation2 + $0x151] sm:$0xff] }
 0x131   :  { %v1552_v39 = vadd.f32 %v1488_v51, %v4880_v14  ;;  %v2253_v55 = vsub.f32 %v2221_v11, %v2708_v10  ;;  %v2094_v41 = vadd.f32 %v2062_v33, %v1998_v24  ;;  %v976_v50 = vadd.f32 %v4943_v7, %v911_v61  ;;  %v5687_v25 = vld [vmem:[#allocation34_spill] sm:$0xff]  ;;  %v5688_v61 = vld [vmem:[#allocation41_spill] sm:$0xff] }
 0x132   :  { %v1743_v27 = vadd.f32 %v4941_v38, %v1679_v44  ;;  %v1200_v63 = vadd.f32 %v1136_v0, %v4833_v19  ;;  %v912_v43 = vadd.f32 %v4736_v56, %v4720_v58  ;;  %v1425_v30 = vadd.f32 %v1361_v3, %v4786_v20  ;;  %v4961_v0 = vld [vmem:[#allocation2 + $0x154] sm:$0xff] }
 0x133   :  { %v1616_v17 = vadd.f32 %v1552_v39, %v4896_v47  ;;  %v2579_v59 = vclamps-f32 %v2253_v55, 3.0  ;;  %v2158_v21 = vadd.f32 %v2126_v62, %v2094_v41  ;;  %v1137_v40 = vadd.f32 %v4738_v15, %v4848_v5  ;;  %v4970_v24 = vld [vmem:[#allocation2 + $0x152] sm:$0xff] }
 0x134   :  { %v2031_v31 = vsub.f32 %v1743_v27, %v1263_v36  ;;  %v2127_v22 = vmul.f32 -0.5, %v5687_v25  ;;  %v2191_v45 = vmul.f32 0.6666667, %v5688_v61  ;;  %v1489_v58 = vadd.f32 %v1425_v30, %v4806_v28  ;;  %v4972_v33 = vld [vmem:[#allocation2 + $0x153] sm:$0xff] }
 0x135   :  { %v1680_v51 = vadd.f32 %v4955_v42, %v1616_v17  ;;  %2611 = vst.msk [vmem:[%s5251_s1 + $0x188] sm:$0xff] %vm104_vm0, %v2579_v59  ;;  %v2222_v56 = vadd.f32 %v2190_v2, %v2158_v21  ;;  %v1999_v62 = vmul.f32 -0.083333336, %v1039_v12  ;;  %v1040_v15 = vadd.f32 %v4961_v0, %v976_v50  ;;  %v4976_v39 = vld [vmem:[#allocation2 + $0x158] sm:$0xff]  ;;  %v2709_v2 = vld [vmem:[#allocation2 + $0x10a] sm:$0xff]  ;;  %v5689_v17 = vld [vmem:[#allocation27_spill] sm:$0xff] }
 0x136   :  { %v2063_v11 = vmul.f32 0.16666667, %v2031_v31  ;;  %v1264_v44 = vadd.f32 %v4970_v24, %v1200_v63  ;;  %v1553_v3 = vadd.f32 %v1489_v58, %v4914_v4  ;;  %v1362_v10 = vadd.f32 %v4781_v46, %v4762_v8  ;;  %v4986_v25 = vld [vmem:[#allocation2 + $0x159] sm:$0xff] }
 0x137   :  { %v1744_v36 = vadd.f32 %v4972_v33, %v1680_v51  ;;  %v2254_v12 = vsub.f32 %v2222_v56, %v2709_v2  ;;  %v977_v41 = vadd.f32 %v4976_v39, %v912_v43  ;;  %v1201_v27 = vadd.f32 %v1137_v40, %v4864_v60  ;;  %v4992_v40 = vld [vmem:[#allocation2 + $0x15c] sm:$0xff]  ;;  %v2710_v2 = vld [vmem:[#allocation2 + $0x112] sm:$0xff] }
 0x138   :  { %v2095_v55 = vadd.f32 %v2063_v11, %v1999_v62  ;;  %v2128_v30 = vmul.f32 -0.5, %v5689_v17  ;;  %v1617_v63 = vadd.f32 %v1553_v3, %v4934_v23  ;;  %v1426_v59 = vadd.f32 %v1362_v10, %v4815_v16  ;;  %v4994_v51 = vld [vmem:[#allocation2 + $0x15a] sm:$0xff] }
 0x139   :  { %v2032_v50 = vsub.f32 %v1744_v36, %v1264_v44  ;;  %v2580_v21 = vclamps-f32 %v2254_v12, 3.0  ;;  %v913_v8 = vadd.f32 %v4768_v26, %v4752_v29  ;;  %v1138_v46 = vadd.f32 %v4770_v49, %v4880_v14  ;;  %v5690_v29 = vld [vmem:[#allocation20_spill] sm:$0xff]  ;;  %v5005_v11 = vld [vmem:[#allocation2 + $0x15b] sm:$0xff] }
 0x13a   :  { %v2159_v31 = vadd.f32 %v2127_v22, %v2095_v55  ;;  %v2000_v43 = vmul.f32 -0.083333336, %v1040_v15  ;;  %v1681_v58 = vadd.f32 %v4986_v25, %v1617_v63  ;;  %v1490_v56 = vadd.f32 %v1426_v59, %v4833_v19  ;;  %v5008_v36 = vld [vmem:[#allocation2 + $0x168] sm:$0xff]  ;;  %v5691_v12 = vld [vmem:[#allocation42_spill] sm:$0xff] }
 0x13b   :  { %v2064_v61 = vmul.f32 0.16666667, %v2032_v50  ;;  %2612 = vst.msk [vmem:[%s5251_s1 + $0x190] sm:$0xff] %vm104_vm0, %v2580_v21  ;;  %v2192_v26 = vmul.f32 0.6666667, %v5690_v29  ;;  %v1041_v49 = vadd.f32 %v4992_v40, %v977_v41  ;;  %v1265_v62 = vadd.f32 %v4994_v51, %v1201_v27  ;;  %v5037_v29 = vld [vmem:[#allocation2 + $0x16b] sm:$0xff] }
 0x13c   :  { %v2223_v22 = vadd.f32 %v2191_v45, %v2159_v31  ;;  %v1745_v44 = vadd.f32 %v5005_v11, %v1681_v58  ;;  %v1554_v3 = vadd.f32 %v1490_v56, %v4943_v7  ;;  %v1363_v10 = vadd.f32 %v4813_v54, %v4797_v13  ;;  %v5024_v58 = vld [vmem:[#allocation2 + $0x16c] sm:$0xff] }
 0x13d   :  { %v2096_v15 = vadd.f32 %v2064_v61, %v2000_v43  ;;  %v2129_v55 = vmul.f32 -0.5, %v5691_v12  ;;  %v978_v41 = vadd.f32 %v5008_v36, %v913_v8  ;;  %v1202_v27 = vadd.f32 %v1138_v46, %v4896_v47  ;;  %v5018_v43 = vld [vmem:[#allocation2 + $0x169] sm:$0xff] }
 0x13e   :  { %v2255_v45 = vsub.f32 %v2223_v22, %v2710_v2  ;;  %v2033_v17 = vsub.f32 %v1745_v44, %v1265_v62  ;;  %v1618_v63 = vadd.f32 %v1554_v3, %v4961_v0  ;;  %v1427_v59 = vadd.f32 %v1363_v10, %v4848_v5  ;;  %v5692_v22 = vld [vmem:[#allocation13_spill] sm:$0xff] }
 0x13f   :  { %v2160_v50 = vadd.f32 %v2128_v30, %v2096_v15  ;;  %v2001_v31 = vmul.f32 -0.083333336, %v1041_v49  ;;  %v914_v13 = vadd.f32 %v4806_v28, %v4786_v20  ;;  %v1139_v54 = vadd.f32 %v4808_v37, %v4914_v4  ;;  %v5026_v30 = vld [vmem:[#allocation2 + $0x16a] sm:$0xff]  ;;  %v2711_v49 = vld [vmem:[#allocation2 + $0x122] sm:$0xff] }
 0x140   :  { %v2581_v21 = vclamps-f32 %v2255_v45, 3.0  ;;  %v2065_v8 = vmul.f32 0.16666667, %v2033_v17  ;;  %v1682_v46 = vadd.f32 %v5018_v43, %v1618_v63  ;;  %v1491_v56 = vadd.f32 %v1427_v59, %v4864_v60  ;;  %v5042_v3 = vld [vmem:[#allocation2 + $0x170] sm:$0xff]  ;;  %v5693_v17 = vld [vmem:[#allocation31_spill] sm:$0xff]  ;;  %v5694_v59 = vld [vmem:[#allocation38_spill] sm:$0xff] }
 0x141   :  { %v2224_v61 = vadd.f32 %v2192_v26, %v2160_v50  ;;  %v2193_v20 = vmul.f32 0.6666667, %v5692_v22  ;;  %v1042_v28 = vadd.f32 %v5024_v58, %v978_v41  ;;  %v1266_v37 = vadd.f32 %v5026_v30, %v1202_v27  ;;  %v5069_v22 = vld [vmem:[#allocation2 + $0x173] sm:$0xff] }
 0x142   :  { %2613 = vst.msk [vmem:[%s5251_s1 + $0x198] sm:$0xff] %vm104_vm0, %v2581_v21  ;;  %v1364_v26 = vadd.f32 %v4844_v18, %v4827_v53  ;;  %v2097_v15 = vadd.f32 %v2065_v8, %v2001_v31  ;;  %v1746_v44 = vadd.f32 %v5037_v29, %v1682_v46  ;;  %v1555_v10 = vadd.f32 %v1491_v56, %v4976_v39  ;;  %v5053_v31 = vld [vmem:[#allocation2 + $0x171] sm:$0xff] }
 0x143   :  { %v2256_v62 = vsub.f32 %v2224_v61, %v2711_v49  ;;  %v979_v2 = vadd.f32 %v5042_v3, %v914_v13  ;;  %v1203_v45 = vadd.f32 %v1139_v54, %v4934_v23  ;;  %v915_v12 = vadd.f32 %v4833_v19, %v4815_v16  ;;  %v5062_v61 = vld [vmem:[#allocation2 + $0x174] sm:$0xff] }
 0x144   :  { %v1428_v41 = vadd.f32 %v1364_v26, %v4880_v14  ;;  %v2161_v53 = vadd.f32 %v2129_v55, %v2097_v15  ;;  %v2034_v18 = vsub.f32 %v1746_v44, %v1266_v37  ;;  %v1619_v50 = vadd.f32 %v1555_v10, %v4992_v40  ;;  %v5064_v8 = vld [vmem:[#allocation2 + $0x172] sm:$0xff]  ;;  %v5071_v37 = vld [vmem:[#allocation2 + $0x180] sm:$0xff] }
 0x145   :  { %v2582_v27 = vclamps-f32 %v2256_v62, 3.0  ;;  %v2130_v63 = vmul.f32 -0.5, %v5693_v17  ;;  %v2194_v21 = vmul.f32 0.6666667, %v5694_v59  ;;  %v1140_v13 = vadd.f32 %v4842_v32, %v4943_v7  ;;  %v5696_v59 = vld [vmem:[#allocation28_spill] sm:$0xff] }
 0x146   :  { %v1492_v54 = vadd.f32 %v1428_v41, %v4896_v47  ;;  %v2225_v16 = vadd.f32 %v2193_v20, %v2161_v53  ;;  %v2002_v19 = vmul.f32 -0.083333336, %v1042_v28  ;;  %v2066_v55 = vmul.f32 0.16666667, %v2034_v18  ;;  %v2712_v28 = vld [vmem:[#allocation2 + $0x12a] sm:$0xff] }
 0x147   :  { %2614 = vst.msk [vmem:[%s5251_s1 + $0x1a0] sm:$0xff] %vm104_vm0, %v2582_v27  ;;  %v1683_v46 = vadd.f32 %v5053_v31, %v1619_v50  ;;  %v1043_v56 = vadd.f32 %v5062_v61, %v979_v2  ;;  %v1267_v32 = vadd.f32 %v5064_v8, %v1203_v45  ;;  %v1365_v20 = vadd.f32 %v4877_v6, %v4858_v52  ;;  %v1652_v52 = vld [vmem:[#allocation2 + $0x181] sm:$0xff]  ;;  %v5695_v50 = vld [vmem:[#allocation26_spill] sm:$0xff] }
 0x148   :  { %v1556_v26 = vadd.f32 %v1492_v54, %v5008_v36  ;;  %v2257_v49 = vsub.f32 %v2225_v16, %v2712_v28  ;;  %v2098_v62 = vadd.f32 %v2066_v55, %v2002_v19  ;;  %v980_v44 = vadd.f32 %v5071_v37, %v915_v12  ;;  %v5087_v54 = vld [vmem:[#allocation2 + $0x184] sm:$0xff] }
 0x149   :  { %v1747_v15 = vadd.f32 %v5069_v22, %v1683_v46  ;;  %v1204_v10 = vadd.f32 %v1140_v13, %v4961_v0  ;;  %v916_v45 = vadd.f32 %v4864_v60, %v4848_v5  ;;  %v1429_v41 = vadd.f32 %v1365_v20, %v4914_v4  ;;  %v1716_v55 = vld [vmem:[#allocation2 + $0x183] sm:$0xff] }
 0x14a   :  { %v1620_v2 = vadd.f32 %v1556_v26, %v5024_v58  ;;  %v2583_v27 = vclamps-f32 %v2257_v49, 3.0  ;;  %v2162_v53 = vadd.f32 %v2130_v63, %v2098_v62  ;;  %v1141_v6 = vadd.f32 %v4866_v34, %v4976_v39  ;;  %v1236_v34 = vld [vmem:[#allocation2 + $0x182] sm:$0xff]  ;;  %v2713_v49 = vld [vmem:[#allocation2 + $0x13a] sm:$0xff] }
 0x14b   :  { %v2035_v18 = vsub.f32 %v1747_v15, %v1267_v32  ;;  %v2131_v17 = vmul.f32 -0.5, %v5695_v50  ;;  %v2195_v12 = vmul.f32 0.6666667, %v5696_v59  ;;  %v1493_v16 = vadd.f32 %v1429_v41, %v4934_v23  ;;  %v5095_v26 = vld [vmem:[#allocation2 + $0x188] sm:$0xff] }
 0x14c   :  { %v1684_v13 = vadd.f32 %v1652_v52, %v1620_v2  ;;  %2615 = vst.msk [vmem:[%s5251_s1 + $0x1a8] sm:$0xff] %vm104_vm0, %v2583_v27  ;;  %v2226_v5 = vadd.f32 %v2194_v21, %v2162_v53  ;;  %v2003_v60 = vmul.f32 -0.083333336, %v1043_v56  ;;  %v1044_v19 = vadd.f32 %v5087_v54, %v980_v44  ;;  %v5697_v44 = vld [vmem:[#allocation39_spill] sm:$0xff]  ;;  %v1653_v52 = vld [vmem:[#allocation2 + $0x189] sm:$0xff] }
 0x14d   :  { %v2067_v63 = vmul.f32 0.16666667, %v2035_v18  ;;  %v1268_v46 = vadd.f32 %v1236_v34, %v1204_v10  ;;  %v1557_v20 = vadd.f32 %v1493_v16, %v5042_v3  ;;  %v1366_v28 = vadd.f32 %v4909_v57, %v4890_v35  ;;  %v5109_v59 = vld [vmem:[#allocation2 + $0x18c] sm:$0xff]  ;;  %v5118_v34 = vld [vmem:[#allocation2 + $0x198] sm:$0xff] }
 0x14e   :  { %v1748_v32 = vadd.f32 %v1716_v55, %v1684_v13  ;;  %v2258_v62 = vsub.f32 %v2226_v5, %v2713_v49  ;;  %v981_v21 = vadd.f32 %v5095_v26, %v916_v45  ;;  %v1205_v56 = vadd.f32 %v1141_v6, %v4992_v40  ;;  %v1237_v6 = vld [vmem:[#allocation2 + $0x18a] sm:$0xff] }
 0x14f   :  { %v2099_v15 = vadd.f32 %v2067_v63, %v2003_v60  ;;  %v2132_v41 = vmul.f32 -0.5, %v5697_v44  ;;  %v1621_v10 = vadd.f32 %v1557_v20, %v5062_v61  ;;  %v1430_v27 = vadd.f32 %v1366_v28, %v4943_v7  ;;  %v5698_v5 = vld [vmem:[#allocation44_spill] sm:$0xff]  ;;  %v5699_v28 = vld [vmem:[#allocation33_spill] sm:$0xff] }
 0x150   :  { %v2036_v2 = vsub.f32 %v1748_v32, %v1268_v46  ;;  %v2584_v53 = vclamps-f32 %v2258_v62, 3.0  ;;  %v917_v35 = vadd.f32 %v4896_v47, %v4880_v14  ;;  %v1142_v57 = vadd.f32 %v4898_v9, %v5008_v36  ;;  %v1717_v9 = vld [vmem:[#allocation2 + $0x18b] sm:$0xff]  ;;  %v2714_v32 = vld [vmem:[#allocation2 + $0x142] sm:$0xff] }
 0x151   :  { %v2163_v18 = vadd.f32 %v2131_v17, %v2099_v15  ;;  %v2004_v50 = vmul.f32 -0.083333336, %v1044_v19  ;;  %v1685_v13 = vadd.f32 %v1653_v52, %v1621_v10  ;;  %v1494_v16 = vadd.f32 %v1430_v27, %v4961_v0 }
 0x152   :  { %v2068_v45 = vmul.f32 0.16666667, %v2036_v2  ;;  %2616 = vst.msk [vmem:[%s5251_s1 + $0x1b0] sm:$0xff] %vm104_vm0, %v2584_v53  ;;  %v2196_v60 = vmul.f32 0.6666667, %v5698_v5  ;;  %v1045_v14 = vadd.f32 %v5109_v59, %v981_v21  ;;  %v1269_v47 = vadd.f32 %v1237_v6, %v1205_v56  ;;  %v1238_v56 = vld [vmem:[#allocation2 + $0x19a] sm:$0xff] }
 0x153   :  { %v2227_v17 = vadd.f32 %v2195_v12, %v2163_v18  ;;  %v1749_v19 = vadd.f32 %v1717_v9, %v1685_v13  ;;  %v1558_v55 = vadd.f32 %v1494_v16, %v5071_v37  ;;  %v1367_v46 = vadd.f32 %v4941_v38, %v4925_v1  ;;  %v1654_v53 = vld [vmem:[#allocation2 + $0x199] sm:$0xff] }
 0x154   :  { %v2100_v63 = vadd.f32 %v2068_v45, %v2004_v50  ;;  %v2133_v49 = vmul.f32 -0.5, %v5699_v28  ;;  %v982_v12 = vadd.f32 %v5118_v34, %v917_v35  ;;  %v1206_v62 = vadd.f32 %v1142_v57, %v5024_v58  ;;  %v5132_v35 = vld [vmem:[#allocation2 + $0x19c] sm:$0xff]  ;;  %v5700_v50 = vld [vmem:[#allocation32_spill] sm:$0xff]  ;;  %v2715_v13 = vld [vmem:[#allocation2 + $0x152] sm:$0xff] }
 0x155   :  { %v2259_v20 = vsub.f32 %v2227_v17, %v2714_v32  ;;  %v2037_v21 = vsub.f32 %v1749_v19, %v1269_v47  ;;  %v1622_v2 = vadd.f32 %v1558_v55, %v5087_v54  ;;  %v1431_v44 = vadd.f32 %v1367_v46, %v4976_v39 }
 0x156   :  { %v2164_v15 = vadd.f32 %v2132_v41, %v2100_v63  ;;  %v2005_v27 = vmul.f32 -0.083333336, %v1045_v14  ;;  %v918_v1 = vadd.f32 %v4934_v23, %v4914_v4  ;;  %v1143_v38 = vadd.f32 %v4936_v48, %v5042_v3  ;;  %v1718_v23 = vld [vmem:[#allocation2 + $0x19b] sm:$0xff] }
 0x157   :  { %v2585_v10 = vclamps-f32 %v2259_v20, 3.0  ;;  %v2069_v52 = vmul.f32 0.16666667, %v2037_v21  ;;  %v1686_v41 = vadd.f32 %v1654_v53, %v1622_v2  ;;  %v1495_v57 = vadd.f32 %v1431_v44, %v4992_v40  ;;  %v5701_v20 = vld [vmem:[#allocation60_spill] sm:$0xff]  ;;  %v5154_v21 = vld [vmem:[#allocation2 + $0x1b0] sm:$0xff] }
 0x158   :  { %v2228_v18 = vadd.f32 %v2196_v60, %v2164_v15  ;;  %v2197_v45 = vmul.f32 0.6666667, %v5700_v50  ;;  %v1046_v6 = vadd.f32 %v5132_v35, %v982_v12  ;;  %v1270_v4 = vadd.f32 %v1238_v56, %v1206_v62  ;;  %v5143_v60 = vld [vmem:[#allocation2 + $0x1a0] sm:$0xff]  ;;  %v5702_v12 = vld [vmem:[#allocation29_spill] sm:$0xff] }
 0x159   :  { %2617 = vst.msk [vmem:[%s5251_s1 + $0x1b8] sm:$0xff] %vm104_vm0, %v2585_v10  ;;  %v1368_v48 = vadd.f32 %v4972_v33, %v4955_v42  ;;  %v2101_v17 = vadd.f32 %v2069_v52, %v2005_v27  ;;  %v1750_v5 = vadd.f32 %v1718_v23, %v1686_v41  ;;  %v1559_v14 = vadd.f32 %v1495_v57, %v5095_v26  ;;  %v1239_v33 = vld [vmem:[#allocation2 + $0x1a2] sm:$0xff] }
 0x15a   :  { %v2260_v16 = vsub.f32 %v2228_v18, %v2715_v13  ;;  %v983_v47 = vadd.f32 %v5143_v60, %v918_v1  ;;  %v1207_v9 = vadd.f32 %v1143_v38, %v5062_v61  ;;  %v919_v63 = vadd.f32 %v4961_v0, %v4943_v7  ;;  %v1655_v15 = vld [vmem:[#allocation2 + $0x1a1] sm:$0xff] }
 0x15b   :  { %v1432_v19 = vadd.f32 %v1368_v48, %v5008_v36  ;;  %v2165_v46 = vadd.f32 %v2133_v49, %v2101_v17  ;;  %v2038_v42 = vsub.f32 %v1750_v5, %v1270_v4  ;;  %v1623_v32 = vadd.f32 %v1559_v14, %v5109_v59  ;;  %v5163_v44 = vld [vmem:[#allocation2 + $0x1a4] sm:$0xff]  ;;  %v2716_v18 = vld [vmem:[#allocation2 + $0x15a] sm:$0xff]  ;;  %v1656_v17 = vld [vmem:[#allocation2 + $0x1b1] sm:$0xff] }
 0x15c   :  { %v2586_v55 = vclamps-f32 %v2260_v16, 3.0  ;;  %v2134_v28 = vmul.f32 -0.5, %v5701_v20  ;;  %v2198_v62 = vmul.f32 0.6666667, %v5702_v12  ;;  %v1144_v56 = vadd.f32 %v4970_v24, %v5071_v37  ;;  %v1719_v1 = vld [vmem:[#allocation2 + $0x1a3] sm:$0xff] }
 0x15d   :  { %v1496_v7 = vadd.f32 %v1432_v19, %v5024_v58  ;;  %v2229_v0 = vadd.f32 %v2197_v45, %v2165_v46  ;;  %v2006_v49 = vmul.f32 -0.083333336, %v1046_v6  ;;  %v2070_v2 = vmul.f32 0.16666667, %v2038_v42  ;;  %v5170_v45 = vld [vmem:[#allocation2 + $0x1b4] sm:$0xff]  ;;  %v5703_v14 = vld [vmem:[#allocation35_spill] sm:$0xff] }
 0x15e   :  { %2618 = vst.msk [vmem:[%s5251_s1 + $0x1c0] sm:$0xff] %vm104_vm0, %v2586_v55  ;;  %v1687_v10 = vadd.f32 %v1655_v15, %v1623_v32  ;;  %v1047_v27 = vadd.f32 %v5163_v44, %v983_v47  ;;  %v1271_v53 = vadd.f32 %v1239_v33, %v1207_v9  ;;  %v1369_v24 = vadd.f32 %v5005_v11, %v4986_v25  ;;  %v1240_v11 = vld [vmem:[#allocation2 + $0x1b2] sm:$0xff] }
 0x15f   :  { %v1560_v38 = vadd.f32 %v1496_v7, %v5118_v34  ;;  %v2261_v52 = vsub.f32 %v2229_v0, %v2716_v18  ;;  %v2102_v41 = vadd.f32 %v2070_v2, %v2006_v49  ;;  %v984_v50 = vadd.f32 %v5154_v21, %v919_v63  ;;  %v5180_v63 = vld [vmem:[#allocation2 + $0x1b8] sm:$0xff] }
 0x160   :  { %v1751_v57 = vadd.f32 %v1719_v1, %v1687_v10  ;;  %v1208_v6 = vadd.f32 %v1144_v56, %v5087_v54  ;;  %v920_v23 = vadd.f32 %v4992_v40, %v4976_v39  ;;  %v1433_v48 = vadd.f32 %v1369_v24, %v5042_v3  ;;  %v1720_v42 = vld [vmem:[#allocation2 + $0x1b3] sm:$0xff]  ;;  %v5194_v2 = vld [vmem:[#allocation2 + $0x1bc] sm:$0xff] }
 0x161   :  { %v1624_v4 = vadd.f32 %v1560_v38, %v5132_v35  ;;  %v2587_v13 = vclamps-f32 %v2261_v52, 3.0  ;;  %v2166_v16 = vadd.f32 %v2134_v28, %v2102_v41  ;;  %v1145_v5 = vadd.f32 %v4994_v51, %v5095_v26  ;;  %v2717_v28 = vld [vmem:[#allocation2 + $0x16a] sm:$0xff]  ;;  %v1241_v10 = vld [vmem:[#allocation2 + $0x1ba] sm:$0xff] }
 0x162   :  { %v2039_v25 = vsub.f32 %v1751_v57, %v1271_v53  ;;  %v2135_v47 = vmul.f32 -0.5, %v5703_v14  ;;  %v1497_v19 = vadd.f32 %v1433_v48, %v5062_v61  ;;  %v2007_v40 = vmul.f32 -0.083333336, %v1047_v27  ;;  %v954_v57 = vld [vmem:[#allocation2 + $0x1c8] sm:$0xff] }
 0x163   :  { %v1688_v9 = vadd.f32 %v1656_v17, %v1624_v4  ;;  %2619 = vst.msk [vmem:[%s5251_s1 + $0x1c8] sm:$0xff] %vm104_vm0, %v2587_v13  ;;  %v2230_v39 = vadd.f32 %v2198_v62, %v2166_v16  ;;  %v1048_v46 = vadd.f32 %v5170_v45, %v984_v50  ;;  %v1272_v33 = vadd.f32 %v1240_v11, %v1208_v6  ;;  %v5704_v62 = vld [vmem:[#allocation50_spill] sm:$0xff]  ;;  %v1658_v14 = vld [vmem:[#allocation2 + $0x1c9] sm:$0xff] }
 0x164   :  { %v2071_v55 = vmul.f32 0.16666667, %v2039_v25  ;;  %v1561_v32 = vadd.f32 %v1497_v19, %v5143_v60  ;;  %v1370_v20 = vadd.f32 %v5037_v29, %v5018_v43  ;;  %v985_v56 = vadd.f32 %v5180_v63, %v920_v23  ;;  %v1657_v43 = vld [vmem:[#allocation2 + $0x1b9] sm:$0xff]  ;;  %v5706_v25 = vld [vmem:[#allocation36_spill] sm:$0xff] }
 0x165   :  { %v1752_v51 = vadd.f32 %v1720_v42, %v1688_v9  ;;  %v2262_v12 = vsub.f32 %v2230_v39, %v2717_v28  ;;  %v1209_v7 = vadd.f32 %v1145_v5, %v5109_v59  ;;  %v2199_v0 = vmul.f32 0.6666667, %v5704_v62  ;;  %v5705_v6 = vld [vmem:[#allocation30_spill] sm:$0xff]  ;;  %v1018_v19 = vld [vmem:[#allocation2 + $0x1cc] sm:$0xff] }
 0x166   :  { %v2103_v15 = vadd.f32 %v2071_v55, %v2007_v40  ;;  %v1625_v27 = vadd.f32 %v1561_v32, %v5163_v44  ;;  %v1434_v53 = vadd.f32 %v1370_v20, %v5071_v37  ;;  %v921_v29 = vadd.f32 %v5024_v58, %v5008_v36  ;;  %v1721_v58 = vld [vmem:[#allocation2 + $0x1bb] sm:$0xff]  ;;  %v1242_v39 = vld [vmem:[#allocation2 + $0x1ca] sm:$0xff] }
 0x167   :  { %v2040_v49 = vsub.f32 %v1752_v51, %v1272_v33  ;;  %v2588_v1 = vclamps-f32 %v2262_v12, 3.0  ;;  %v1146_v24 = vadd.f32 %v5026_v30, %v5118_v34  ;;  %v2008_v18 = vmul.f32 -0.083333336, %v1048_v46  ;;  %v955_v51 = vld [vmem:[#allocation2 + $0x1d0] sm:$0xff] }
 0x168   :  { %v2167_v38 = vadd.f32 %v2135_v47, %v2103_v15  ;;  %v1689_v41 = vadd.f32 %v1657_v43, %v1625_v27  ;;  %v1498_v50 = vadd.f32 %v1434_v53, %v5087_v54  ;;  %v2136_v4 = vmul.f32 -0.5, %v5705_v6  ;;  %v2718_v54 = vld [vmem:[#allocation2 + $0x172] sm:$0xff] }
 0x169   :  { %v2072_v52 = vmul.f32 0.16666667, %v2040_v49  ;;  %2620 = vst.msk [vmem:[%s5251_s1 + $0x1d0] sm:$0xff] %vm104_vm0, %v2588_v1  ;;  %v1049_v23 = vadd.f32 %v5194_v2, %v985_v56  ;;  %v1273_v36 = vadd.f32 %v1241_v10, %v1209_v7  ;;  %v1371_v13 = vadd.f32 %v5069_v22, %v5053_v31  ;;  %v1722_v12 = vld [vmem:[#allocation2 + $0x1cb] sm:$0xff]  ;;  %v5708_v56 = vld [vmem:[#allocation54_spill] sm:$0xff] }
 0x16a   :  { %v2231_v37 = vadd.f32 %v2199_v0, %v2167_v38  ;;  %v1753_v30 = vadd.f32 %v1721_v58, %v1689_v41  ;;  %v1562_v34 = vadd.f32 %v1498_v50, %v5154_v21  ;;  %v2200_v11 = vmul.f32 0.6666667, %v5706_v25  ;;  %v1659_v0 = vld [vmem:[#allocation2 + $0x1d1] sm:$0xff] }
 0x16b   :  { %v2104_v48 = vadd.f32 %v2072_v52, %v2008_v18  ;;  %v986_v17 = vadd.f32 %v954_v57, %v921_v29  ;;  %v1210_v5 = vadd.f32 %v1146_v24, %v5132_v35  ;;  %v1435_v55 = vadd.f32 %v1371_v13, %v5095_v26  ;;  %v5707_v26 = vld [vmem:[#allocation61_spill] sm:$0xff]  ;;  %v5709_v18 = vld [vmem:[#allocation43_spill] sm:$0xff] }
 0x16c   :  { %v2263_v16 = vsub.f32 %v2231_v37, %v2718_v54  ;;  %v2041_v9 = vsub.f32 %v1753_v30, %v1273_v36  ;;  %v1626_v40 = vadd.f32 %v1562_v34, %v5170_v45  ;;  %v2009_v46 = vmul.f32 -0.083333336, %v1049_v23  ;;  %v1019_v53 = vld [vmem:[#allocation2 + $0x1d4] sm:$0xff]  ;;  %v2720_v57 = vld [vmem:[#allocation2 + $0x18a] sm:$0xff] }
 0x16d   :  { %v2168_v47 = vadd.f32 %v2136_v4, %v2104_v48  ;;  %v922_v31 = vadd.f32 %v5062_v61, %v5042_v3  ;;  %v1147_v22 = vadd.f32 %v5064_v8, %v5143_v60  ;;  %v1499_v32 = vadd.f32 %v1435_v55, %v5109_v59  ;;  %v2719_v3 = vld [vmem:[#allocation2 + $0x182] sm:$0xff]  ;;  %v1243_v38 = vld [vmem:[#allocation2 + $0x1d2] sm:$0xff]  ;;  %v2721_v54 = vld [vmem:[#allocation2 + $0x19a] sm:$0xff] }
 0x16e   :  { %v2589_v21 = vclamps-f32 %v2263_v16, 3.0  ;;  %v2073_v33 = vmul.f32 0.16666667, %v2041_v9  ;;  %v1690_v35 = vadd.f32 %v1658_v14, %v1626_v40  ;;  %v2137_v45 = vmul.f32 -0.5, %v5707_v26  ;;  %v1723_v41 = vld [vmem:[#allocation2 + $0x1d3] sm:$0xff]  ;;  %v5710_v36 = vld [vmem:[#allocation48_spill] sm:$0xff] }
 0x16f   :  { %v2232_v42 = vadd.f32 %v2200_v11, %v2168_v47  ;;  %v1050_v20 = vadd.f32 %v1018_v19, %v986_v17  ;;  %v1274_v28 = vadd.f32 %v1242_v39, %v1210_v5  ;;  %v1563_v60 = vadd.f32 %v1499_v32, %v5180_v63  ;;  %v5711_v11 = vld [vmem:[#allocation49_spill] sm:$0xff]  ;;  %v2722_v39 = vld [vmem:[#allocation2 + $0x1a2] sm:$0xff] }
 0x170   :  { %2621 = vst.msk [vmem:[%s5251_s1 + $0x1d8] sm:$0xff] %vm104_vm0, %v2589_v21  ;;  %v2105_v15 = vadd.f32 %v2073_v33, %v2009_v46  ;;  %v1754_v8 = vadd.f32 %v1722_v12, %v1690_v35  ;;  %v2201_v7 = vmul.f32 0.6666667, %v5708_v56  ;;  %v987_v62 = vadd.f32 %v955_v51, %v922_v31  ;;  %v5712_v47 = vld [vmem:[#allocation37_spill] sm:$0xff] }
 0x171   :  { %v2264_v61 = vsub.f32 %v2232_v42, %v2719_v3  ;;  %v1211_v59 = vadd.f32 %v1147_v22, %v5163_v44  ;;  %v1627_v1 = vadd.f32 %v1563_v60, %v5194_v2  ;;  %v2010_v63 = vmul.f32 -0.083333336, %v1050_v20 }
 0x172   :  { %v2169_v10 = vadd.f32 %v2137_v45, %v2105_v15  ;;  %v2042_v27 = vsub.f32 %v1754_v8, %v1274_v28  ;;  %v2138_v52 = vmul.f32 -0.5, %v5709_v18  ;;  %v1051_v44 = vadd.f32 %v1019_v53, %v987_v62 }
 0x173   :  { %v2590_v49 = vclamps-f32 %v2264_v61, 3.0  ;;  %v1691_v24 = vadd.f32 %v1659_v0, %v1627_v1  ;;  %v1275_v6 = vadd.f32 %v1243_v38, %v1211_v59  ;;  %v2202_v58 = vmul.f32 0.6666667, %v5710_v36 }
 0x174   :  { %v2233_v43 = vadd.f32 %v2201_v7, %v2169_v10  ;;  %v2074_v29 = vmul.f32 0.16666667, %v2042_v27  ;;  %v2011_v34 = vmul.f32 -0.083333336, %v1051_v44  ;;  %v2139_v17 = vmul.f32 -0.5, %v5711_v11 }
 0x175   :  { %2622 = vst.msk [vmem:[%s5251_s1 + $0x1e0] sm:$0xff] %vm104_vm0, %v2590_v49  ;;  %v1755_v4 = vadd.f32 %v1723_v41, %v1691_v24  ;;  %v2203_v9 = vmul.f32 0.6666667, %v5712_v47 }
 0x176   :  { %v2265_v50 = vsub.f32 %v2233_v43, %v2720_v57  ;;  %v2106_v37 = vadd.f32 %v2074_v29, %v2010_v63 }
 0x177   :  { %v2043_v48 = vsub.f32 %v1755_v4, %v1275_v6 }
 0x178   :  { %v2591_v2 = vclamps-f32 %v2265_v50, 3.0  ;;  %v2170_v23 = vadd.f32 %v2138_v52, %v2106_v37 }
 0x179   :  { %v2075_v13 = vmul.f32 0.16666667, %v2043_v48 }
 0x17a   :  { %2623 = vst.msk [vmem:[%s5251_s1 + $0x1e8] sm:$0xff] %vm104_vm0, %v2591_v2  ;;  %v2234_v30 = vadd.f32 %v2202_v58, %v2170_v23 }
 0x17b   :  { %v2107_v25 = vadd.f32 %v2075_v13, %v2011_v34 }
 0x17c   :  { %v2266_v16 = vsub.f32 %v2234_v30, %v2721_v54 }
 0x17d   :  { %v2171_v14 = vadd.f32 %v2139_v17, %v2107_v25 }
 0x17e   :  { %v2592_v5 = vclamps-f32 %v2266_v16, 3.0 }
 0x17f   :  { %v2235_v19 = vadd.f32 %v2203_v9, %v2171_v14 }
 0x180   :  { %2624 = vst.msk [vmem:[%s5251_s1 + $0x1f0] sm:$0xff] %vm104_vm0, %v2592_v5 }
 0x181   :  { %v2267_v40 = vsub.f32 %v2235_v19, %v2722_v39 }
 0x183   :  { %v2593_v55 = vclamps-f32 %v2267_v40, 3.0 }
 0x185   :  { %2625 = vst.msk [vmem:[%s5251_s1 + $0x1f8] sm:$0xff] %vm104_vm0, %v2593_v55 }

</bundles_post_ra>
